<compile_context>
chip_gen: v7x
topology: tpu7x:2x2x1
jax: 0.10.0
libtpu: 0.0.40
codegen_flags: <defaults>
</compile_context>

<pallas_src>
import math
from functools import partial

import numpy as np
import jax
import jax.numpy as jnp
from jax.experimental import pallas as pl
from jax.experimental.pallas import tpu as pltpu  # noqa: F401  (TPU backend)

# ---- scaled-down Llama3 config (same structure as the PyTorch module) ----
DIM = 128
N_HEADS = 4
HEAD_DIM = DIM // N_HEADS            # 32
N_KV_HEADS = 2
N_KV_HEAD_REP = N_HEADS // N_KV_HEADS
FFN_DIM = 256
VOCAB_SIZE = 512
N_LAYERS = 2
MAX_SEQ_LEN = 16
MAX_BATCH_SIZE = 2
NORM_EPS = 1e-5
ROPE_THETA = 500000.0

QDIM = N_HEADS * HEAD_DIM            # 128
KVDIM = N_KV_HEADS * HEAD_DIM        # 64
NEG_INF = -1e30


# --------------------------- fused Pallas kernel ---------------------------

def _transformer_kernel(x_ref, cos_ref, sin_ref, rope_ref,
                        attn_norm_ref, ffn_norm_ref,
                        wqkv_ref, wo_ref, w13_ref, w2_ref,
                        final_norm_ref, wout_ref,
                        o_ref, *, bsz, seqlen, start_pos):
    h = x_ref[...]                                   # (M, DIM) f32
    cos_q = cos_ref[...]                             # (M, QDIM) — pattern repeats per head
    sin_q = sin_ref[...]
    rot = rope_ref[...]                              # (QDIM, QDIM) pair-rotation matrix
    rot_k = rot[:KVDIM, :KVDIM]
    cos_k = cos_q[:, :KVDIM]
    sin_k = sin_q[:, :KVDIM]

    def rmsnorm(v, w):                               # all f32
        ms = jnp.mean(v * v, axis=-1, keepdims=True)
        return v * jax.lax.rsqrt(ms + NORM_EPS) * w

    # causal mask for the current block, generated in-kernel (hoisted, reused)
    if seqlen > 1:
        ri = jax.lax.broadcasted_iota(jnp.int32, (seqlen, seqlen), 0)
        ci = jax.lax.broadcasted_iota(jnp.int32, (seqlen, seqlen), 1)
        causal_add = jnp.where(ci > ri, jnp.float32(NEG_INF), jnp.float32(0.0))
    else:
        causal_add = None

    for l in range(N_LAYERS):
        # ---- attention sub-block ----
        xn = rmsnorm(h, attn_norm_ref[l])                                   # (M, DIM)
        qkv = jnp.dot(xn, wqkv_ref[l], preferred_element_type=jnp.float32)  # (M, 256)
        q = qkv[:, :QDIM]                    # 1/sqrt(HEAD_DIM) already folded into wq
        k = qkv[:, QDIM:QDIM + KVDIM]
        v = qkv[:, QDIM + KVDIM:]

        # interleaved RoPE: out = x*cos + (x @ R)*sin   (R swaps/negates pairs)
        q = q * cos_q + jnp.dot(q, rot, preferred_element_type=jnp.float32) * sin_q
        k = k * cos_k + jnp.dot(k, rot_k, preferred_element_type=jnp.float32) * sin_k

        # GQA attention: per-batch / per-head, head dim packed into lanes
        rows = []
        for b in range(bsz):
            qb = q[b * seqlen:(b + 1) * seqlen]       # (S, QDIM)
            kb = k[b * seqlen:(b + 1) * seqlen]       # (S, KVDIM)
            vb = v[b * seqlen:(b + 1) * seqlen]       # (S, KVDIM)
            heads = []
            for hh in range(N_HEADS):
                kvh = hh // N_KV_HEAD_REP
                qh = qb[:, hh * HEAD_DIM:(hh + 1) * HEAD_DIM]
                kh = kb[:, kvh * HEAD_DIM:(kvh + 1) * HEAD_DIM]
                vh = vb[:, kvh * HEAD_DIM:(kvh + 1) * HEAD_DIM]
                # q @ k^T via dot_general contracting last dims (no explicit transpose)
                s = jax.lax.dot_general(qh, kh, (((1,), (1,)), ((), ())),
                                        preferred_element_type=jnp.float32)  # (S, S)
                if causal_add is not None:
                    s = s + causal_add
                m = jnp.max(s, axis=-1, keepdims=True)
                if start_pos > 0:
                    # fresh zero-initialized KV cache: positions < start_pos have
                    # zero keys (score 0) and zero values -> they only contribute
                    # start_pos * exp(0 - m) to the softmax denominator.
                    m = jnp.maximum(m, 0.0)
                e = jnp.exp(s - m)
                denom = jnp.sum(e, axis=-1, keepdims=True)
                if start_pos > 0:
                    denom = denom + start_pos * jnp.exp(-m)
                p = e * pl.reciprocal(denom, approx=True)
                heads.append(jnp.dot(p, vh, preferred_element_type=jnp.float32))
            rows.append(jnp.concatenate(heads, axis=-1))                    # (S, QDIM)
        attn = jnp.concatenate(rows, axis=0) if bsz > 1 else rows[0]        # (M, QDIM)
        h = h + jnp.dot(attn, wo_ref[l], preferred_element_type=jnp.float32)

        # ---- SwiGLU FFN sub-block (fused w1 || w3) ----
        hn = rmsnorm(h, ffn_norm_ref[l])
        h13 = jnp.dot(hn, w13_ref[l], preferred_element_type=jnp.float32)   # (M, 2*FFN)
        a = h13[:, :FFN_DIM]
        g = h13[:, FFN_DIM:]
        act = a * jax.nn.sigmoid(a) * g                                     # SiLU(w1 x)*(w3 x)
        h = h + jnp.dot(act, w2_ref[l], preferred_element_type=jnp.float32)

    # ---- final norm + output projection ----
    hn = rmsnorm(h, final_norm_ref[...])
    o_ref[...] = jnp.dot(hn, wout_ref[...], preferred_element_type=jnp.float32)


# ------------------------------- JAX glue -------------------------------

def _rope_constants(start_pos, seqlen, bsz):
    """Host-side (trace-time) constants: interleaved cos/sin tiled across heads
    and batch, plus the pair-rotation matrix R with (x@R)[2i]=-x[2i+1],
    (x@R)[2i+1]=x[2i]."""
    half = HEAD_DIM // 2
    freqs = 1.0 / (ROPE_THETA ** (np.arange(0, HEAD_DIM, 2)[:half].astype(np.float32)
                                  / HEAD_DIM))
    t = np.arange(start_pos, start_pos + seqlen, dtype=np.float32)
    ang = np.outer(t, freqs)                                   # (S, Dh/2)
    cos = np.repeat(np.cos(ang), 2, axis=-1)                   # (S, Dh) duplicated pairs
    sin = np.repeat(np.sin(ang), 2, axis=-1)
    cos_q = np.tile(np.tile(cos, (1, N_HEADS)), (bsz, 1)).astype(np.float32)  # (B*S, QDIM)
    sin_q = np.tile(np.tile(sin, (1, N_HEADS)), (bsz, 1)).astype(np.float32)

    rot = np.zeros((QDIM, QDIM), np.float32)
    ii = np.arange(QDIM // 2)
    rot[2 * ii + 1, 2 * ii] = -1.0
    rot[2 * ii, 2 * ii + 1] = 1.0
    return jnp.asarray(cos_q), jnp.asarray(sin_q), jnp.asarray(rot)


def transformer_forward(packed, tokens, *, start_pos):
    bsz, seqlen = tokens.shape
    M = bsz * seqlen
    h = jnp.take(packed["tok_embeddings"], tokens, axis=0).reshape(M, DIM)
    cos_q, sin_q, rot = _rope_constants(start_pos, seqlen, bsz)

    kernel = partial(_transformer_kernel, bsz=bsz, seqlen=seqlen, start_pos=start_pos)
    logits = pl.pallas_call(
        kernel,
        out_shape=jax.ShapeDtypeStruct((M, VOCAB_SIZE), jnp.float32),
    )(h, cos_q, sin_q, rot,
      packed["attn_norm"], packed["ffn_norm"],
      packed["wqkv"], packed["wo"], packed["w13"], packed["w2"],
      packed["norm"], packed["output"])
    return logits.reshape(bsz, seqlen, VOCAB_SIZE)
    # TODO(synk): persistent KV cache threaded across calls (real incremental
    # decode with input_output_aliases) is not implemented; the fresh-module
    # zero-cache semantics of the reference are reproduced analytically above.


def init_params(key):
    """Per-matrix params mirroring the nn.Module layout; weights stored
    TRANSPOSED as [in_features, out_features]."""
    scale = 0.02
    keys = jax.random.split(key, 2 + N_LAYERS)
    params = {
        "tok_embeddings": scale * jax.random.normal(keys[0], (VOCAB_SIZE, DIM), jnp.float32),
        "output": scale * jax.random.normal(keys[1], (DIM, VOCAB_SIZE), jnp.float32),
        "norm": jnp.ones((DIM,), jnp.float32),
        "layers": [],
    }
    for l in range(N_LAYERS):
        lk = jax.random.split(keys[2 + l], 7)
        params["layers"].append(dict(
            wq=scale * jax.random.normal(lk[0], (DIM, N_HEADS * HEAD_DIM), jnp.float32),
            wk=scale * jax.random.normal(lk[1], (DIM, N_KV_HEADS * HEAD_DIM), jnp.float32),
            wv=scale * jax.random.normal(lk[2], (DIM, N_KV_HEADS * HEAD_DIM), jnp.float32),
            wo=scale * jax.random.normal(lk[3], (N_HEADS * HEAD_DIM, DIM), jnp.float32),
            w1=scale * jax.random.normal(lk[4], (DIM, FFN_DIM), jnp.float32),
            w3=scale * jax.random.normal(lk[5], (DIM, FFN_DIM), jnp.float32),
            w2=scale * jax.random.normal(lk[6], (FFN_DIM, DIM), jnp.float32),
            attention_norm=jnp.ones((DIM,), jnp.float32),
            ffn_norm=jnp.ones((DIM,), jnp.float32),
        ))
    return params


def pack_params(params):
    """Fuse QKV and w1||w3, fold the attention scale into wq, and stack the
    per-layer weights so the whole model is passed as a handful of VMEM-resident
    arrays to a single kernel."""
    q_scale = 1.0 / math.sqrt(HEAD_DIM)
    wqkv, wo, w13, w2, anorm, fnorm = [], [], [], [], [], []
    for lp in params["layers"]:
        wqkv.append(jnp.concatenate([lp["wq"] * q_scale, lp["wk"], lp["wv"]], axis=1))
        wo.append(lp["wo"])
        w13.append(jnp.concatenate([lp["w1"], lp["w3"]], axis=1))
        w2.append(lp["w2"])
        anorm.append(lp["attention_norm"].reshape(1, DIM))
        fnorm.append(lp["ffn_norm"].reshape(1, DIM))
    return {
        "tok_embeddings": params["tok_embeddings"],
        "wqkv": jnp.stack(wqkv),          # (L, DIM, QDIM + 2*KVDIM)
        "wo": jnp.stack(wo),              # (L, QDIM, DIM)
        "w13": jnp.stack(w13),            # (L, DIM, 2*FFN_DIM)
        "w2": jnp.stack(w2),              # (L, FFN_DIM, DIM)
        "attn_norm": jnp.stack(anorm),    # (L, 1, DIM)
        "ffn_norm": jnp.stack(fnorm),     # (L, 1, DIM)
        "norm": params["norm"].reshape(1, DIM),
        "output": params["output"],       # (DIM, VOCAB)
    }


if __name__ == "__main__":
    key = jax.random.PRNGKey(0)
    pkey, tkey = jax.random.split(key)
    params = init_params(pkey)
    packed = pack_params(params)

    bsz, seqlen, start_pos = 2, 8, 0
    tokens = jax.random.randint(tkey, (bsz, seqlen), 0, VOCAB_SIZE, dtype=jnp.int32)

    fwd = jax.jit(partial(transformer_forward, start_pos=start_pos))
    out = fwd(packed, tokens)
    jax.block_until_ready(out)
    assert out.shape == (bsz, seqlen, VOCAB_SIZE) and out.dtype == jnp.float32
    assert bool(jnp.isfinite(out).all())
    print("KERNEL_OK")
</pallas_src>

<mosaic_0001>
module attributes {stable_mosaic.version = 11 : i64} {
  func.func @_transformer_kernel(%arg0: memref<16x128xf32, #tpu.memory_space<vmem>>, %arg1: memref<16x128xf32, #tpu.memory_space<vmem>>, %arg2: memref<16x128xf32, #tpu.memory_space<vmem>>, %arg3: memref<128x128xf32, #tpu.memory_space<vmem>>, %arg4: memref<2x1x128xf32, #tpu.memory_space<vmem>>, %arg5: memref<2x1x128xf32, #tpu.memory_space<vmem>>, %arg6: memref<2x128x256xf32, #tpu.memory_space<vmem>>, %arg7: memref<2x128x128xf32, #tpu.memory_space<vmem>>, %arg8: memref<2x128x512xf32, #tpu.memory_space<vmem>>, %arg9: memref<2x256x128xf32, #tpu.memory_space<vmem>>, %arg10: memref<1x128xf32, #tpu.memory_space<vmem>>, %arg11: memref<128x512xf32, #tpu.memory_space<vmem>>, %arg12: memref<16x512xf32, #tpu.memory_space<vmem>>) attributes {dimension_semantics = [], scalar_prefetch = 0 : i64, scratch_operands = 0 : i64, tpu.core_type = #tpu.core_type<tc>} {
    %c0 = arith.constant 0 : index
    %c0_0 = arith.constant 0 : index
    %0 = vector.load %arg0[%c0, %c0_0] : memref<16x128xf32, #tpu.memory_space<vmem>>, vector<16x128xf32>
    %c0_1 = arith.constant 0 : index
    %c0_2 = arith.constant 0 : index
    %1 = vector.load %arg1[%c0_1, %c0_2] : memref<16x128xf32, #tpu.memory_space<vmem>>, vector<16x128xf32>
    %c0_3 = arith.constant 0 : index
    %c0_4 = arith.constant 0 : index
    %2 = vector.load %arg2[%c0_3, %c0_4] : memref<16x128xf32, #tpu.memory_space<vmem>>, vector<16x128xf32>
    %c0_5 = arith.constant 0 : index
    %c0_6 = arith.constant 0 : index
    %3 = vector.load %arg3[%c0_5, %c0_6] : memref<128x128xf32, #tpu.memory_space<vmem>>, vector<128x128xf32>
    %4 = vector.extract_strided_slice %3 {offsets = [0, 0], sizes = [64, 64], strides = [1, 1]} : vector<128x128xf32> to vector<64x64xf32>
    %5 = vector.extract_strided_slice %1 {offsets = [0, 0], sizes = [16, 64], strides = [1, 1]} : vector<16x128xf32> to vector<16x64xf32>
    %6 = vector.extract_strided_slice %2 {offsets = [0, 0], sizes = [16, 64], strides = [1, 1]} : vector<16x128xf32> to vector<16x64xf32>
    %7 = tpu.iota {dimensions = array<i32: 0>} : vector<8x8xi32>
    %8 = tpu.iota {dimensions = array<i32: 1>} : vector<8x8xi32>
    %9 = arith.cmpi sgt, %8, %7 : vector<8x8xi32>
    %cst = arith.constant -1.000000e+30 : f32
    %cst_7 = arith.constant 0.000000e+00 : f32
    %10 = vector.broadcast %cst : f32 to vector<8x8xf32>
    %11 = vector.broadcast %cst_7 : f32 to vector<8x8xf32>
    %12 = arith.select %9, %10, %11 : vector<8x8xi1>, vector<8x8xf32>
    %c0_8 = arith.constant 0 : index
    %c0_9 = arith.constant 0 : index
    %c0_10 = arith.constant 0 : index
    %13 = vector.load %arg4[%c0_8, %c0_9, %c0_10] : memref<2x1x128xf32, #tpu.memory_space<vmem>>, vector<1x1x128xf32>
    %14 = vector.shape_cast %13 : vector<1x1x128xf32> to vector<1x128xf32>
    %15 = arith.mulf %0, %0 : vector<16x128xf32>
    %cst_11 = arith.constant dense<0.000000e+00> : vector<16xf32>
    %16 = vector.multi_reduction <add>, %15, %cst_11 [1] : vector<16x128xf32> to vector<16xf32>
    %17 = vector.shape_cast %16 : vector<16xf32> to vector<16x1xf32>
    %cst_12 = arith.constant 1.280000e+02 : f32
    %18 = vector.broadcast %cst_12 : f32 to vector<16x1xf32>
    %19 = arith.divf %17, %18 : vector<16x1xf32>
    %cst_13 = arith.constant 9.99999974E-6 : f32
    %20 = vector.broadcast %cst_13 : f32 to vector<16x1xf32>
    %21 = arith.addf %19, %20 : vector<16x1xf32>
    %22 = math.rsqrt %21 : vector<16x1xf32>
    %23 = vector.broadcast %22 : vector<16x1xf32> to vector<16x128xf32>
    %24 = arith.mulf %0, %23 : vector<16x128xf32>
    %25 = vector.broadcast %14 : vector<1x128xf32> to vector<16x128xf32>
    %26 = arith.mulf %24, %25 : vector<16x128xf32>
    %c0_14 = arith.constant 0 : index
    %c0_15 = arith.constant 0 : index
    %c0_16 = arith.constant 0 : index
    %27 = vector.load %arg6[%c0_14, %c0_15, %c0_16] : memref<2x128x256xf32, #tpu.memory_space<vmem>>, vector<1x128x256xf32>
    %28 = vector.shape_cast %27 : vector<1x128x256xf32> to vector<128x256xf32>
    %cst_17 = arith.constant dense<0.000000e+00> : vector<16x256xf32>
    %29 = tpu.matmul %26, %28, %cst_17 {dimension_numbers = #tpu.dot_dimension_numbers<[1], [0], [0], [1], [0, 0, 1, 1], [], []>} : vector<16x128xf32>, vector<128x256xf32>, vector<16x256xf32> -> vector<16x256xf32>
    %30 = vector.extract_strided_slice %29 {offsets = [0, 0], sizes = [16, 128], strides = [1, 1]} : vector<16x256xf32> to vector<16x128xf32>
    %31 = vector.extract_strided_slice %29 {offsets = [0, 128], sizes = [16, 64], strides = [1, 1]} : vector<16x256xf32> to vector<16x64xf32>
    %32 = vector.extract_strided_slice %29 {offsets = [0, 192], sizes = [16, 64], strides = [1, 1]} : vector<16x256xf32> to vector<16x64xf32>
    %33 = arith.mulf %30, %1 : vector<16x128xf32>
    %cst_18 = arith.constant dense<0.000000e+00> : vector<16x128xf32>
    %34 = tpu.matmul %30, %3, %cst_18 {dimension_numbers = #tpu.dot_dimension_numbers<[1], [0], [0], [1], [0, 0, 1, 1], [], []>} : vector<16x128xf32>, vector<128x128xf32>, vector<16x128xf32> -> vector<16x128xf32>
    %35 = arith.mulf %34, %2 : vector<16x128xf32>
    %36 = arith.addf %33, %35 : vector<16x128xf32>
    %37 = arith.mulf %31, %5 : vector<16x64xf32>
    %cst_19 = arith.constant dense<0.000000e+00> : vector<16x64xf32>
    %38 = tpu.matmul %31, %4, %cst_19 {dimension_numbers = #tpu.dot_dimension_numbers<[1], [0], [0], [1], [0, 0, 1, 1], [], []>} : vector<16x64xf32>, vector<64x64xf32>, vector<16x64xf32> -> vector<16x64xf32>
    %39 = arith.mulf %38, %6 : vector<16x64xf32>
    %40 = arith.addf %37, %39 : vector<16x64xf32>
    %41 = vector.extract_strided_slice %36 {offsets = [0, 0], sizes = [8, 128], strides = [1, 1]} : vector<16x128xf32> to vector<8x128xf32>
    %42 = vector.extract_strided_slice %40 {offsets = [0, 0], sizes = [8, 64], strides = [1, 1]} : vector<16x64xf32> to vector<8x64xf32>
    %43 = vector.extract_strided_slice %32 {offsets = [0, 0], sizes = [8, 64], strides = [1, 1]} : vector<16x64xf32> to vector<8x64xf32>
    %44 = vector.extract_strided_slice %41 {offsets = [0, 0], sizes = [8, 32], strides = [1, 1]} : vector<8x128xf32> to vector<8x32xf32>
    %45 = vector.extract_strided_slice %42 {offsets = [0, 0], sizes = [8, 32], strides = [1, 1]} : vector<8x64xf32> to vector<8x32xf32>
    %46 = vector.extract_strided_slice %43 {offsets = [0, 0], sizes = [8, 32], strides = [1, 1]} : vector<8x64xf32> to vector<8x32xf32>
    %cst_20 = arith.constant dense<0.000000e+00> : vector<8x8xf32>
    %47 = tpu.matmul %44, %45, %cst_20 {dimension_numbers = #tpu.dot_dimension_numbers<[1], [1], [0], [0], [0, 0, 1, 0], [], []>} : vector<8x32xf32>, vector<8x32xf32>, vector<8x8xf32> -> vector<8x8xf32>
    %48 = arith.addf %47, %12 : vector<8x8xf32>
    %cst_21 = arith.constant dense<0xFF800000> : vector<8xf32>
    %49 = vector.multi_reduction <maximumf>, %48, %cst_21 [1] : vector<8x8xf32> to vector<8xf32>
    %50 = vector.shape_cast %49 : vector<8xf32> to vector<8x1xf32>
    %51 = vector.broadcast %50 : vector<8x1xf32> to vector<8x8xf32>
    %52 = arith.subf %48, %51 : vector<8x8xf32>
    %53 = math.exp %52 : vector<8x8xf32>
    %cst_22 = arith.constant dense<0.000000e+00> : vector<8xf32>
    %54 = vector.multi_reduction <add>, %53, %cst_22 [1] : vector<8x8xf32> to vector<8xf32>
    %55 = vector.shape_cast %54 : vector<8xf32> to vector<8x1xf32>
    %56 = tpu.reciprocal %55 {approx = true} : vector<8x1xf32> -> vector<8x1xf32>
    %57 = vector.broadcast %56 : vector<8x1xf32> to vector<8x8xf32>
    %58 = arith.mulf %53, %57 : vector<8x8xf32>
    %cst_23 = arith.constant dense<0.000000e+00> : vector<8x32xf32>
    %59 = tpu.matmul %58, %46, %cst_23 {dimension_numbers = #tpu.dot_dimension_numbers<[1], [0], [0], [1], [0, 0, 1, 1], [], []>} : vector<8x8xf32>, vector<8x32xf32>, vector<8x32xf32> -> vector<8x32xf32>
    %60 = vector.extract_strided_slice %41 {offsets = [0, 32], sizes = [8, 32], strides = [1, 1]} : vector<8x128xf32> to vector<8x32xf32>
    %61 = vector.extract_strided_slice %42 {offsets = [0, 0], sizes = [8, 32], strides = [1, 1]} : vector<8x64xf32> to vector<8x32xf32>
    %62 = vector.extract_strided_slice %43 {offsets = [0, 0], sizes = [8, 32], strides = [1, 1]} : vector<8x64xf32> to vector<8x32xf32>
    %cst_24 = arith.constant dense<0.000000e+00> : vector<8x8xf32>
    %63 = tpu.matmul %60, %61, %cst_24 {dimension_numbers = #tpu.dot_dimension_numbers<[1], [1], [0], [0], [0, 0, 1, 0], [], []>} : vector<8x32xf32>, vector<8x32xf32>, vector<8x8xf32> -> vector<8x8xf32>
    %64 = arith.addf %63, %12 : vector<8x8xf32>
    %cst_25 = arith.constant dense<0xFF800000> : vector<8xf32>
    %65 = vector.multi_reduction <maximumf>, %64, %cst_25 [1] : vector<8x8xf32> to vector<8xf32>
    %66 = vector.shape_cast %65 : vector<8xf32> to vector<8x1xf32>
    %67 = vector.broadcast %66 : vector<8x1xf32> to vector<8x8xf32>
    %68 = arith.subf %64, %67 : vector<8x8xf32>
    %69 = math.exp %68 : vector<8x8xf32>
    %cst_26 = arith.constant dense<0.000000e+00> : vector<8xf32>
    %70 = vector.multi_reduction <add>, %69, %cst_26 [1] : vector<8x8xf32> to vector<8xf32>
    %71 = vector.shape_cast %70 : vector<8xf32> to vector<8x1xf32>
    %72 = tpu.reciprocal %71 {approx = true} : vector<8x1xf32> -> vector<8x1xf32>
    %73 = vector.broadcast %72 : vector<8x1xf32> to vector<8x8xf32>
    %74 = arith.mulf %69, %73 : vector<8x8xf32>
    %cst_27 = arith.constant dense<0.000000e+00> : vector<8x32xf32>
    %75 = tpu.matmul %74, %62, %cst_27 {dimension_numbers = #tpu.dot_dimension_numbers<[1], [0], [0], [1], [0, 0, 1, 1], [], []>} : vector<8x8xf32>, vector<8x32xf32>, vector<8x32xf32> -> vector<8x32xf32>
    %76 = vector.extract_strided_slice %41 {offsets = [0, 64], sizes = [8, 32], strides = [1, 1]} : vector<8x128xf32> to vector<8x32xf32>
    %77 = vector.extract_strided_slice %42 {offsets = [0, 32], sizes = [8, 32], strides = [1, 1]} : vector<8x64xf32> to vector<8x32xf32>
    %78 = vector.extract_strided_slice %43 {offsets = [0, 32], sizes = [8, 32], strides = [1, 1]} : vector<8x64xf32> to vector<8x32xf32>
    %cst_28 = arith.constant dense<0.000000e+00> : vector<8x8xf32>
    %79 = tpu.matmul %76, %77, %cst_28 {dimension_numbers = #tpu.dot_dimension_numbers<[1], [1], [0], [0], [0, 0, 1, 0], [], []>} : vector<8x32xf32>, vector<8x32xf32>, vector<8x8xf32> -> vector<8x8xf32>
    %80 = arith.addf %79, %12 : vector<8x8xf32>
    %cst_29 = arith.constant dense<0xFF800000> : vector<8xf32>
    %81 = vector.multi_reduction <maximumf>, %80, %cst_29 [1] : vector<8x8xf32> to vector<8xf32>
    %82 = vector.shape_cast %81 : vector<8xf32> to vector<8x1xf32>
    %83 = vector.broadcast %82 : vector<8x1xf32> to vector<8x8xf32>
    %84 = arith.subf %80, %83 : vector<8x8xf32>
    %85 = math.exp %84 : vector<8x8xf32>
    %cst_30 = arith.constant dense<0.000000e+00> : vector<8xf32>
    %86 = vector.multi_reduction <add>, %85, %cst_30 [1] : vector<8x8xf32> to vector<8xf32>
    %87 = vector.shape_cast %86 : vector<8xf32> to vector<8x1xf32>
    %88 = tpu.reciprocal %87 {approx = true} : vector<8x1xf32> -> vector<8x1xf32>
    %89 = vector.broadcast %88 : vector<8x1xf32> to vector<8x8xf32>
    %90 = arith.mulf %85, %89 : vector<8x8xf32>
    %cst_31 = arith.constant dense<0.000000e+00> : vector<8x32xf32>
    %91 = tpu.matmul %90, %78, %cst_31 {dimension_numbers = #tpu.dot_dimension_numbers<[1], [0], [0], [1], [0, 0, 1, 1], [], []>} : vector<8x8xf32>, vector<8x32xf32>, vector<8x32xf32> -> vector<8x32xf32>
    %92 = vector.extract_strided_slice %41 {offsets = [0, 96], sizes = [8, 32], strides = [1, 1]} : vector<8x128xf32> to vector<8x32xf32>
    %93 = vector.extract_strided_slice %42 {offsets = [0, 32], sizes = [8, 32], strides = [1, 1]} : vector<8x64xf32> to vector<8x32xf32>
    %94 = vector.extract_strided_slice %43 {offsets = [0, 32], sizes = [8, 32], strides = [1, 1]} : vector<8x64xf32> to vector<8x32xf32>
    %cst_32 = arith.constant dense<0.000000e+00> : vector<8x8xf32>
    %95 = tpu.matmul %92, %93, %cst_32 {dimension_numbers = #tpu.dot_dimension_numbers<[1], [1], [0], [0], [0, 0, 1, 0], [], []>} : vector<8x32xf32>, vector<8x32xf32>, vector<8x8xf32> -> vector<8x8xf32>
    %96 = arith.addf %95, %12 : vector<8x8xf32>
    %cst_33 = arith.constant dense<0xFF800000> : vector<8xf32>
    %97 = vector.multi_reduction <maximumf>, %96, %cst_33 [1] : vector<8x8xf32> to vector<8xf32>
    %98 = vector.shape_cast %97 : vector<8xf32> to vector<8x1xf32>
    %99 = vector.broadcast %98 : vector<8x1xf32> to vector<8x8xf32>
    %100 = arith.subf %96, %99 : vector<8x8xf32>
    %101 = math.exp %100 : vector<8x8xf32>
    %cst_34 = arith.constant dense<0.000000e+00> : vector<8xf32>
    %102 = vector.multi_reduction <add>, %101, %cst_34 [1] : vector<8x8xf32> to vector<8xf32>
    %103 = vector.shape_cast %102 : vector<8xf32> to vector<8x1xf32>
    %104 = tpu.reciprocal %103 {approx = true} : vector<8x1xf32> -> vector<8x1xf32>
    %105 = vector.broadcast %104 : vector<8x1xf32> to vector<8x8xf32>
    %106 = arith.mulf %101, %105 : vector<8x8xf32>
    %cst_35 = arith.constant dense<0.000000e+00> : vector<8x32xf32>
    %107 = tpu.matmul %106, %94, %cst_35 {dimension_numbers = #tpu.dot_dimension_numbers<[1], [0], [0], [1], [0, 0, 1, 1], [], []>} : vector<8x8xf32>, vector<8x32xf32>, vector<8x32xf32> -> vector<8x32xf32>
    %108 = tpu.concatenate %59, %75, %91, %107 in 1 : vector<8x32xf32>, vector<8x32xf32>, vector<8x32xf32>, vector<8x32xf32> -> vector<8x128xf32>
    %109 = vector.extract_strided_slice %36 {offsets = [8, 0], sizes = [8, 128], strides = [1, 1]} : vector<16x128xf32> to vector<8x128xf32>
    %110 = vector.extract_strided_slice %40 {offsets = [8, 0], sizes = [8, 64], strides = [1, 1]} : vector<16x64xf32> to vector<8x64xf32>
    %111 = vector.extract_strided_slice %32 {offsets = [8, 0], sizes = [8, 64], strides = [1, 1]} : vector<16x64xf32> to vector<8x64xf32>
    %112 = vector.extract_strided_slice %109 {offsets = [0, 0], sizes = [8, 32], strides = [1, 1]} : vector<8x128xf32> to vector<8x32xf32>
    %113 = vector.extract_strided_slice %110 {offsets = [0, 0], sizes = [8, 32], strides = [1, 1]} : vector<8x64xf32> to vector<8x32xf32>
    %114 = vector.extract_strided_slice %111 {offsets = [0, 0], sizes = [8, 32], strides = [1, 1]} : vector<8x64xf32> to vector<8x32xf32>
    %cst_36 = arith.constant dense<0.000000e+00> : vector<8x8xf32>
    %115 = tpu.matmul %112, %113, %cst_36 {dimension_numbers = #tpu.dot_dimension_numbers<[1], [1], [0], [0], [0, 0, 1, 0], [], []>} : vector<8x32xf32>, vector<8x32xf32>, vector<8x8xf32> -> vector<8x8xf32>
    %116 = arith.addf %115, %12 : vector<8x8xf32>
    %cst_37 = arith.constant dense<0xFF800000> : vector<8xf32>
    %117 = vector.multi_reduction <maximumf>, %116, %cst_37 [1] : vector<8x8xf32> to vector<8xf32>
    %118 = vector.shape_cast %117 : vector<8xf32> to vector<8x1xf32>
    %119 = vector.broadcast %118 : vector<8x1xf32> to vector<8x8xf32>
    %120 = arith.subf %116, %119 : vector<8x8xf32>
    %121 = math.exp %120 : vector<8x8xf32>
    %cst_38 = arith.constant dense<0.000000e+00> : vector<8xf32>
    %122 = vector.multi_reduction <add>, %121, %cst_38 [1] : vector<8x8xf32> to vector<8xf32>
    %123 = vector.shape_cast %122 : vector<8xf32> to vector<8x1xf32>
    %124 = tpu.reciprocal %123 {approx = true} : vector<8x1xf32> -> vector<8x1xf32>
    %125 = vector.broadcast %124 : vector<8x1xf32> to vector<8x8xf32>
    %126 = arith.mulf %121, %125 : vector<8x8xf32>
    %cst_39 = arith.constant dense<0.000000e+00> : vector<8x32xf32>
    %127 = tpu.matmul %126, %114, %cst_39 {dimension_numbers = #tpu.dot_dimension_numbers<[1], [0], [0], [1], [0, 0, 1, 1], [], []>} : vector<8x8xf32>, vector<8x32xf32>, vector<8x32xf32> -> vector<8x32xf32>
    %128 = vector.extract_strided_slice %109 {offsets = [0, 32], sizes = [8, 32], strides = [1, 1]} : vector<8x128xf32> to vector<8x32xf32>
    %129 = vector.extract_strided_slice %110 {offsets = [0, 0], sizes = [8, 32], strides = [1, 1]} : vector<8x64xf32> to vector<8x32xf32>
    %130 = vector.extract_strided_slice %111 {offsets = [0, 0], sizes = [8, 32], strides = [1, 1]} : vector<8x64xf32> to vector<8x32xf32>
    %cst_40 = arith.constant dense<0.000000e+00> : vector<8x8xf32>
    %131 = tpu.matmul %128, %129, %cst_40 {dimension_numbers = #tpu.dot_dimension_numbers<[1], [1], [0], [0], [0, 0, 1, 0], [], []>} : vector<8x32xf32>, vector<8x32xf32>, vector<8x8xf32> -> vector<8x8xf32>
    %132 = arith.addf %131, %12 : vector<8x8xf32>
    %cst_41 = arith.constant dense<0xFF800000> : vector<8xf32>
    %133 = vector.multi_reduction <maximumf>, %132, %cst_41 [1] : vector<8x8xf32> to vector<8xf32>
    %134 = vector.shape_cast %133 : vector<8xf32> to vector<8x1xf32>
    %135 = vector.broadcast %134 : vector<8x1xf32> to vector<8x8xf32>
    %136 = arith.subf %132, %135 : vector<8x8xf32>
    %137 = math.exp %136 : vector<8x8xf32>
    %cst_42 = arith.constant dense<0.000000e+00> : vector<8xf32>
    %138 = vector.multi_reduction <add>, %137, %cst_42 [1] : vector<8x8xf32> to vector<8xf32>
    %139 = vector.shape_cast %138 : vector<8xf32> to vector<8x1xf32>
    %140 = tpu.reciprocal %139 {approx = true} : vector<8x1xf32> -> vector<8x1xf32>
    %141 = vector.broadcast %140 : vector<8x1xf32> to vector<8x8xf32>
    %142 = arith.mulf %137, %141 : vector<8x8xf32>
    %cst_43 = arith.constant dense<0.000000e+00> : vector<8x32xf32>
    %143 = tpu.matmul %142, %130, %cst_43 {dimension_numbers = #tpu.dot_dimension_numbers<[1], [0], [0], [1], [0, 0, 1, 1], [], []>} : vector<8x8xf32>, vector<8x32xf32>, vector<8x32xf32> -> vector<8x32xf32>
    %144 = vector.extract_strided_slice %109 {offsets = [0, 64], sizes = [8, 32], strides = [1, 1]} : vector<8x128xf32> to vector<8x32xf32>
    %145 = vector.extract_strided_slice %110 {offsets = [0, 32], sizes = [8, 32], strides = [1, 1]} : vector<8x64xf32> to vector<8x32xf32>
    %146 = vector.extract_strided_slice %111 {offsets = [0, 32], sizes = [8, 32], strides = [1, 1]} : vector<8x64xf32> to vector<8x32xf32>
    %cst_44 = arith.constant dense<0.000000e+00> : vector<8x8xf32>
    %147 = tpu.matmul %144, %145, %cst_44 {dimension_numbers = #tpu.dot_dimension_numbers<[1], [1], [0], [0], [0, 0, 1, 0], [], []>} : vector<8x32xf32>, vector<8x32xf32>, vector<8x8xf32> -> vector<8x8xf32>
    %148 = arith.addf %147, %12 : vector<8x8xf32>
    %cst_45 = arith.constant dense<0xFF800000> : vector<8xf32>
    %149 = vector.multi_reduction <maximumf>, %148, %cst_45 [1] : vector<8x8xf32> to vector<8xf32>
    %150 = vector.shape_cast %149 : vector<8xf32> to vector<8x1xf32>
    %151 = vector.broadcast %150 : vector<8x1xf32> to vector<8x8xf32>
    %152 = arith.subf %148, %151 : vector<8x8xf32>
    %153 = math.exp %152 : vector<8x8xf32>
    %cst_46 = arith.constant dense<0.000000e+00> : vector<8xf32>
    %154 = vector.multi_reduction <add>, %153, %cst_46 [1] : vector<8x8xf32> to vector<8xf32>
    %155 = vector.shape_cast %154 : vector<8xf32> to vector<8x1xf32>
    %156 = tpu.reciprocal %155 {approx = true} : vector<8x1xf32> -> vector<8x1xf32>
    %157 = vector.broadcast %156 : vector<8x1xf32> to vector<8x8xf32>
    %158 = arith.mulf %153, %157 : vector<8x8xf32>
    %cst_47 = arith.constant dense<0.000000e+00> : vector<8x32xf32>
    %159 = tpu.matmul %158, %146, %cst_47 {dimension_numbers = #tpu.dot_dimension_numbers<[1], [0], [0], [1], [0, 0, 1, 1], [], []>} : vector<8x8xf32>, vector<8x32xf32>, vector<8x32xf32> -> vector<8x32xf32>
    %160 = vector.extract_strided_slice %109 {offsets = [0, 96], sizes = [8, 32], strides = [1, 1]} : vector<8x128xf32> to vector<8x32xf32>
    %161 = vector.extract_strided_slice %110 {offsets = [0, 32], sizes = [8, 32], strides = [1, 1]} : vector<8x64xf32> to vector<8x32xf32>
    %162 = vector.extract_strided_slice %111 {offsets = [0, 32], sizes = [8, 32], strides = [1, 1]} : vector<8x64xf32> to vector<8x32xf32>
    %cst_48 = arith.constant dense<0.000000e+00> : vector<8x8xf32>
    %163 = tpu.matmul %160, %161, %cst_48 {dimension_numbers = #tpu.dot_dimension_numbers<[1], [1], [0], [0], [0, 0, 1, 0], [], []>} : vector<8x32xf32>, vector<8x32xf32>, vector<8x8xf32> -> vector<8x8xf32>
    %164 = arith.addf %163, %12 : vector<8x8xf32>
    %cst_49 = arith.constant dense<0xFF800000> : vector<8xf32>
    %165 = vector.multi_reduction <maximumf>, %164, %cst_49 [1] : vector<8x8xf32> to vector<8xf32>
    %166 = vector.shape_cast %165 : vector<8xf32> to vector<8x1xf32>
    %167 = vector.broadcast %166 : vector<8x1xf32> to vector<8x8xf32>
    %168 = arith.subf %164, %167 : vector<8x8xf32>
    %169 = math.exp %168 : vector<8x8xf32>
    %cst_50 = arith.constant dense<0.000000e+00> : vector<8xf32>
    %170 = vector.multi_reduction <add>, %169, %cst_50 [1] : vector<8x8xf32> to vector<8xf32>
    %171 = vector.shape_cast %170 : vector<8xf32> to vector<8x1xf32>
    %172 = tpu.reciprocal %171 {approx = true} : vector<8x1xf32> -> vector<8x1xf32>
    %173 = vector.broadcast %172 : vector<8x1xf32> to vector<8x8xf32>
    %174 = arith.mulf %169, %173 : vector<8x8xf32>
    %cst_51 = arith.constant dense<0.000000e+00> : vector<8x32xf32>
    %175 = tpu.matmul %174, %162, %cst_51 {dimension_numbers = #tpu.dot_dimension_numbers<[1], [0], [0], [1], [0, 0, 1, 1], [], []>} : vector<8x8xf32>, vector<8x32xf32>, vector<8x32xf32> -> vector<8x32xf32>
    %176 = tpu.concatenate %127, %143, %159, %175 in 1 : vector<8x32xf32>, vector<8x32xf32>, vector<8x32xf32>, vector<8x32xf32> -> vector<8x128xf32>
    %177 = tpu.concatenate %108, %176 in 0 : vector<8x128xf32>, vector<8x128xf32> -> vector<16x128xf32>
    %c0_52 = arith.constant 0 : index
    %c0_53 = arith.constant 0 : index
    %c0_54 = arith.constant 0 : index
    %178 = vector.load %arg7[%c0_52, %c0_53, %c0_54] : memref<2x128x128xf32, #tpu.memory_space<vmem>>, vector<1x128x128xf32>
    %179 = vector.shape_cast %178 : vector<1x128x128xf32> to vector<128x128xf32>
    %cst_55 = arith.constant dense<0.000000e+00> : vector<16x128xf32>
    %180 = tpu.matmul %177, %179, %cst_55 {dimension_numbers = #tpu.dot_dimension_numbers<[1], [0], [0], [1], [0, 0, 1, 1], [], []>} : vector<16x128xf32>, vector<128x128xf32>, vector<16x128xf32> -> vector<16x128xf32>
    %181 = arith.addf %0, %180 : vector<16x128xf32>
    %c0_56 = arith.constant 0 : index
    %c0_57 = arith.constant 0 : index
    %c0_58 = arith.constant 0 : index
    %182 = vector.load %arg5[%c0_56, %c0_57, %c0_58] : memref<2x1x128xf32, #tpu.memory_space<vmem>>, vector<1x1x128xf32>
    %183 = vector.shape_cast %182 : vector<1x1x128xf32> to vector<1x128xf32>
    %184 = arith.mulf %181, %181 : vector<16x128xf32>
    %cst_59 = arith.constant dense<0.000000e+00> : vector<16xf32>
    %185 = vector.multi_reduction <add>, %184, %cst_59 [1] : vector<16x128xf32> to vector<16xf32>
    %186 = vector.shape_cast %185 : vector<16xf32> to vector<16x1xf32>
    %cst_60 = arith.constant 1.280000e+02 : f32
    %187 = vector.broadcast %cst_60 : f32 to vector<16x1xf32>
    %188 = arith.divf %186, %187 : vector<16x1xf32>
    %cst_61 = arith.constant 9.99999974E-6 : f32
    %189 = vector.broadcast %cst_61 : f32 to vector<16x1xf32>
    %190 = arith.addf %188, %189 : vector<16x1xf32>
    %191 = math.rsqrt %190 : vector<16x1xf32>
    %192 = vector.broadcast %191 : vector<16x1xf32> to vector<16x128xf32>
    %193 = arith.mulf %181, %192 : vector<16x128xf32>
    %194 = vector.broadcast %183 : vector<1x128xf32> to vector<16x128xf32>
    %195 = arith.mulf %193, %194 : vector<16x128xf32>
    %c0_62 = arith.constant 0 : index
    %c0_63 = arith.constant 0 : index
    %c0_64 = arith.constant 0 : index
    %196 = vector.load %arg8[%c0_62, %c0_63, %c0_64] : memref<2x128x512xf32, #tpu.memory_space<vmem>>, vector<1x128x512xf32>
    %197 = vector.shape_cast %196 : vector<1x128x512xf32> to vector<128x512xf32>
    %cst_65 = arith.constant dense<0.000000e+00> : vector<16x512xf32>
    %198 = tpu.matmul %195, %197, %cst_65 {dimension_numbers = #tpu.dot_dimension_numbers<[1], [0], [0], [1], [0, 0, 1, 1], [], []>} : vector<16x128xf32>, vector<128x512xf32>, vector<16x512xf32> -> vector<16x512xf32>
    %199 = vector.extract_strided_slice %198 {offsets = [0, 0], sizes = [16, 256], strides = [1, 1]} : vector<16x512xf32> to vector<16x256xf32>
    %200 = vector.extract_strided_slice %198 {offsets = [0, 256], sizes = [16, 256], strides = [1, 1]} : vector<16x512xf32> to vector<16x256xf32>
    %201 = arith.negf %199 : vector<16x256xf32>
    %202 = math.exp %201 : vector<16x256xf32>
    %cst_66 = arith.constant 1.000000e+00 : f32
    %203 = vector.broadcast %cst_66 : f32 to vector<16x256xf32>
    %204 = arith.addf %203, %202 : vector<16x256xf32>
    %205 = arith.divf %203, %204 : vector<16x256xf32>
    %206 = arith.mulf %199, %205 : vector<16x256xf32>
    %207 = arith.mulf %206, %200 : vector<16x256xf32>
    %c0_67 = arith.constant 0 : index
    %c0_68 = arith.constant 0 : index
    %c0_69 = arith.constant 0 : index
    %208 = vector.load %arg9[%c0_67, %c0_68, %c0_69] : memref<2x256x128xf32, #tpu.memory_space<vmem>>, vector<1x256x128xf32>
    %209 = vector.shape_cast %208 : vector<1x256x128xf32> to vector<256x128xf32>
    %cst_70 = arith.constant dense<0.000000e+00> : vector<16x128xf32>
    %210 = tpu.matmul %207, %209, %cst_70 {dimension_numbers = #tpu.dot_dimension_numbers<[1], [0], [0], [1], [0, 0, 1, 1], [], []>} : vector<16x256xf32>, vector<256x128xf32>, vector<16x128xf32> -> vector<16x128xf32>
    %211 = arith.addf %181, %210 : vector<16x128xf32>
    %c1 = arith.constant 1 : index
    %c0_71 = arith.constant 0 : index
    %c0_72 = arith.constant 0 : index
    %212 = vector.load %arg4[%c1, %c0_71, %c0_72] : memref<2x1x128xf32, #tpu.memory_space<vmem>>, vector<1x1x128xf32>
    %213 = vector.shape_cast %212 : vector<1x1x128xf32> to vector<1x128xf32>
    %214 = arith.mulf %211, %211 : vector<16x128xf32>
    %cst_73 = arith.constant dense<0.000000e+00> : vector<16xf32>
    %215 = vector.multi_reduction <add>, %214, %cst_73 [1] : vector<16x128xf32> to vector<16xf32>
    %216 = vector.shape_cast %215 : vector<16xf32> to vector<16x1xf32>
    %cst_74 = arith.constant 1.280000e+02 : f32
    %217 = vector.broadcast %cst_74 : f32 to vector<16x1xf32>
    %218 = arith.divf %216, %217 : vector<16x1xf32>
    %cst_75 = arith.constant 9.99999974E-6 : f32
    %219 = vector.broadcast %cst_75 : f32 to vector<16x1xf32>
    %220 = arith.addf %218, %219 : vector<16x1xf32>
    %221 = math.rsqrt %220 : vector<16x1xf32>
    %222 = vector.broadcast %221 : vector<16x1xf32> to vector<16x128xf32>
    %223 = arith.mulf %211, %222 : vector<16x128xf32>
    %224 = vector.broadcast %213 : vector<1x128xf32> to vector<16x128xf32>
    %225 = arith.mulf %223, %224 : vector<16x128xf32>
    %c1_76 = arith.constant 1 : index
    %c0_77 = arith.constant 0 : index
    %c0_78 = arith.constant 0 : index
    %226 = vector.load %arg6[%c1_76, %c0_77, %c0_78] : memref<2x128x256xf32, #tpu.memory_space<vmem>>, vector<1x128x256xf32>
    %227 = vector.shape_cast %226 : vector<1x128x256xf32> to vector<128x256xf32>
    %cst_79 = arith.constant dense<0.000000e+00> : vector<16x256xf32>
    %228 = tpu.matmul %225, %227, %cst_79 {dimension_numbers = #tpu.dot_dimension_numbers<[1], [0], [0], [1], [0, 0, 1, 1], [], []>} : vector<16x128xf32>, vector<128x256xf32>, vector<16x256xf32> -> vector<16x256xf32>
    %229 = vector.extract_strided_slice %228 {offsets = [0, 0], sizes = [16, 128], strides = [1, 1]} : vector<16x256xf32> to vector<16x128xf32>
    %230 = vector.extract_strided_slice %228 {offsets = [0, 128], sizes = [16, 64], strides = [1, 1]} : vector<16x256xf32> to vector<16x64xf32>
    %231 = vector.extract_strided_slice %228 {offsets = [0, 192], sizes = [16, 64], strides = [1, 1]} : vector<16x256xf32> to vector<16x64xf32>
    %232 = arith.mulf %229, %1 : vector<16x128xf32>
    %cst_80 = arith.constant dense<0.000000e+00> : vector<16x128xf32>
    %233 = tpu.matmul %229, %3, %cst_80 {dimension_numbers = #tpu.dot_dimension_numbers<[1], [0], [0], [1], [0, 0, 1, 1], [], []>} : vector<16x128xf32>, vector<128x128xf32>, vector<16x128xf32> -> vector<16x128xf32>
    %234 = arith.mulf %233, %2 : vector<16x128xf32>
    %235 = arith.addf %232, %234 : vector<16x128xf32>
    %236 = arith.mulf %230, %5 : vector<16x64xf32>
    %cst_81 = arith.constant dense<0.000000e+00> : vector<16x64xf32>
    %237 = tpu.matmul %230, %4, %cst_81 {dimension_numbers = #tpu.dot_dimension_numbers<[1], [0], [0], [1], [0, 0, 1, 1], [], []>} : vector<16x64xf32>, vector<64x64xf32>, vector<16x64xf32> -> vector<16x64xf32>
    %238 = arith.mulf %237, %6 : vector<16x64xf32>
    %239 = arith.addf %236, %238 : vector<16x64xf32>
    %240 = vector.extract_strided_slice %235 {offsets = [0, 0], sizes = [8, 128], strides = [1, 1]} : vector<16x128xf32> to vector<8x128xf32>
    %241 = vector.extract_strided_slice %239 {offsets = [0, 0], sizes = [8, 64], strides = [1, 1]} : vector<16x64xf32> to vector<8x64xf32>
    %242 = vector.extract_strided_slice %231 {offsets = [0, 0], sizes = [8, 64], strides = [1, 1]} : vector<16x64xf32> to vector<8x64xf32>
    %243 = vector.extract_strided_slice %240 {offsets = [0, 0], sizes = [8, 32], strides = [1, 1]} : vector<8x128xf32> to vector<8x32xf32>
    %244 = vector.extract_strided_slice %241 {offsets = [0, 0], sizes = [8, 32], strides = [1, 1]} : vector<8x64xf32> to vector<8x32xf32>
    %245 = vector.extract_strided_slice %242 {offsets = [0, 0], sizes = [8, 32], strides = [1, 1]} : vector<8x64xf32> to vector<8x32xf32>
    %cst_82 = arith.constant dense<0.000000e+00> : vector<8x8xf32>
    %246 = tpu.matmul %243, %244, %cst_82 {dimension_numbers = #tpu.dot_dimension_numbers<[1], [1], [0], [0], [0, 0, 1, 0], [], []>} : vector<8x32xf32>, vector<8x32xf32>, vector<8x8xf32> -> vector<8x8xf32>
    %247 = arith.addf %246, %12 : vector<8x8xf32>
    %cst_83 = arith.constant dense<0xFF800000> : vector<8xf32>
    %248 = vector.multi_reduction <maximumf>, %247, %cst_83 [1] : vector<8x8xf32> to vector<8xf32>
    %249 = vector.shape_cast %248 : vector<8xf32> to vector<8x1xf32>
    %250 = vector.broadcast %249 : vector<8x1xf32> to vector<8x8xf32>
    %251 = arith.subf %247, %250 : vector<8x8xf32>
    %252 = math.exp %251 : vector<8x8xf32>
    %cst_84 = arith.constant dense<0.000000e+00> : vector<8xf32>
    %253 = vector.multi_reduction <add>, %252, %cst_84 [1] : vector<8x8xf32> to vector<8xf32>
    %254 = vector.shape_cast %253 : vector<8xf32> to vector<8x1xf32>
    %255 = tpu.reciprocal %254 {approx = true} : vector<8x1xf32> -> vector<8x1xf32>
    %256 = vector.broadcast %255 : vector<8x1xf32> to vector<8x8xf32>
    %257 = arith.mulf %252, %256 : vector<8x8xf32>
    %cst_85 = arith.constant dense<0.000000e+00> : vector<8x32xf32>
    %258 = tpu.matmul %257, %245, %cst_85 {dimension_numbers = #tpu.dot_dimension_numbers<[1], [0], [0], [1], [0, 0, 1, 1], [], []>} : vector<8x8xf32>, vector<8x32xf32>, vector<8x32xf32> -> vector<8x32xf32>
    %259 = vector.extract_strided_slice %240 {offsets = [0, 32], sizes = [8, 32], strides = [1, 1]} : vector<8x128xf32> to vector<8x32xf32>
    %260 = vector.extract_strided_slice %241 {offsets = [0, 0], sizes = [8, 32], strides = [1, 1]} : vector<8x64xf32> to vector<8x32xf32>
    %261 = vector.extract_strided_slice %242 {offsets = [0, 0], sizes = [8, 32], strides = [1, 1]} : vector<8x64xf32> to vector<8x32xf32>
    %cst_86 = arith.constant dense<0.000000e+00> : vector<8x8xf32>
    %262 = tpu.matmul %259, %260, %cst_86 {dimension_numbers = #tpu.dot_dimension_numbers<[1], [1], [0], [0], [0, 0, 1, 0], [], []>} : vector<8x32xf32>, vector<8x32xf32>, vector<8x8xf32> -> vector<8x8xf32>
    %263 = arith.addf %262, %12 : vector<8x8xf32>
    %cst_87 = arith.constant dense<0xFF800000> : vector<8xf32>
    %264 = vector.multi_reduction <maximumf>, %263, %cst_87 [1] : vector<8x8xf32> to vector<8xf32>
    %265 = vector.shape_cast %264 : vector<8xf32> to vector<8x1xf32>
    %266 = vector.broadcast %265 : vector<8x1xf32> to vector<8x8xf32>
    %267 = arith.subf %263, %266 : vector<8x8xf32>
    %268 = math.exp %267 : vector<8x8xf32>
    %cst_88 = arith.constant dense<0.000000e+00> : vector<8xf32>
    %269 = vector.multi_reduction <add>, %268, %cst_88 [1] : vector<8x8xf32> to vector<8xf32>
    %270 = vector.shape_cast %269 : vector<8xf32> to vector<8x1xf32>
    %271 = tpu.reciprocal %270 {approx = true} : vector<8x1xf32> -> vector<8x1xf32>
    %272 = vector.broadcast %271 : vector<8x1xf32> to vector<8x8xf32>
    %273 = arith.mulf %268, %272 : vector<8x8xf32>
    %cst_89 = arith.constant dense<0.000000e+00> : vector<8x32xf32>
    %274 = tpu.matmul %273, %261, %cst_89 {dimension_numbers = #tpu.dot_dimension_numbers<[1], [0], [0], [1], [0, 0, 1, 1], [], []>} : vector<8x8xf32>, vector<8x32xf32>, vector<8x32xf32> -> vector<8x32xf32>
    %275 = vector.extract_strided_slice %240 {offsets = [0, 64], sizes = [8, 32], strides = [1, 1]} : vector<8x128xf32> to vector<8x32xf32>
    %276 = vector.extract_strided_slice %241 {offsets = [0, 32], sizes = [8, 32], strides = [1, 1]} : vector<8x64xf32> to vector<8x32xf32>
    %277 = vector.extract_strided_slice %242 {offsets = [0, 32], sizes = [8, 32], strides = [1, 1]} : vector<8x64xf32> to vector<8x32xf32>
    %cst_90 = arith.constant dense<0.000000e+00> : vector<8x8xf32>
    %278 = tpu.matmul %275, %276, %cst_90 {dimension_numbers = #tpu.dot_dimension_numbers<[1], [1], [0], [0], [0, 0, 1, 0], [], []>} : vector<8x32xf32>, vector<8x32xf32>, vector<8x8xf32> -> vector<8x8xf32>
    %279 = arith.addf %278, %12 : vector<8x8xf32>
    %cst_91 = arith.constant dense<0xFF800000> : vector<8xf32>
    %280 = vector.multi_reduction <maximumf>, %279, %cst_91 [1] : vector<8x8xf32> to vector<8xf32>
    %281 = vector.shape_cast %280 : vector<8xf32> to vector<8x1xf32>
    %282 = vector.broadcast %281 : vector<8x1xf32> to vector<8x8xf32>
    %283 = arith.subf %279, %282 : vector<8x8xf32>
    %284 = math.exp %283 : vector<8x8xf32>
    %cst_92 = arith.constant dense<0.000000e+00> : vector<8xf32>
    %285 = vector.multi_reduction <add>, %284, %cst_92 [1] : vector<8x8xf32> to vector<8xf32>
    %286 = vector.shape_cast %285 : vector<8xf32> to vector<8x1xf32>
    %287 = tpu.reciprocal %286 {approx = true} : vector<8x1xf32> -> vector<8x1xf32>
    %288 = vector.broadcast %287 : vector<8x1xf32> to vector<8x8xf32>
    %289 = arith.mulf %284, %288 : vector<8x8xf32>
    %cst_93 = arith.constant dense<0.000000e+00> : vector<8x32xf32>
    %290 = tpu.matmul %289, %277, %cst_93 {dimension_numbers = #tpu.dot_dimension_numbers<[1], [0], [0], [1], [0, 0, 1, 1], [], []>} : vector<8x8xf32>, vector<8x32xf32>, vector<8x32xf32> -> vector<8x32xf32>
    %291 = vector.extract_strided_slice %240 {offsets = [0, 96], sizes = [8, 32], strides = [1, 1]} : vector<8x128xf32> to vector<8x32xf32>
    %292 = vector.extract_strided_slice %241 {offsets = [0, 32], sizes = [8, 32], strides = [1, 1]} : vector<8x64xf32> to vector<8x32xf32>
    %293 = vector.extract_strided_slice %242 {offsets = [0, 32], sizes = [8, 32], strides = [1, 1]} : vector<8x64xf32> to vector<8x32xf32>
    %cst_94 = arith.constant dense<0.000000e+00> : vector<8x8xf32>
    %294 = tpu.matmul %291, %292, %cst_94 {dimension_numbers = #tpu.dot_dimension_numbers<[1], [1], [0], [0], [0, 0, 1, 0], [], []>} : vector<8x32xf32>, vector<8x32xf32>, vector<8x8xf32> -> vector<8x8xf32>
    %295 = arith.addf %294, %12 : vector<8x8xf32>
    %cst_95 = arith.constant dense<0xFF800000> : vector<8xf32>
    %296 = vector.multi_reduction <maximumf>, %295, %cst_95 [1] : vector<8x8xf32> to vector<8xf32>
    %297 = vector.shape_cast %296 : vector<8xf32> to vector<8x1xf32>
    %298 = vector.broadcast %297 : vector<8x1xf32> to vector<8x8xf32>
    %299 = arith.subf %295, %298 : vector<8x8xf32>
    %300 = math.exp %299 : vector<8x8xf32>
    %cst_96 = arith.constant dense<0.000000e+00> : vector<8xf32>
    %301 = vector.multi_reduction <add>, %300, %cst_96 [1] : vector<8x8xf32> to vector<8xf32>
    %302 = vector.shape_cast %301 : vector<8xf32> to vector<8x1xf32>
    %303 = tpu.reciprocal %302 {approx = true} : vector<8x1xf32> -> vector<8x1xf32>
    %304 = vector.broadcast %303 : vector<8x1xf32> to vector<8x8xf32>
    %305 = arith.mulf %300, %304 : vector<8x8xf32>
    %cst_97 = arith.constant dense<0.000000e+00> : vector<8x32xf32>
    %306 = tpu.matmul %305, %293, %cst_97 {dimension_numbers = #tpu.dot_dimension_numbers<[1], [0], [0], [1], [0, 0, 1, 1], [], []>} : vector<8x8xf32>, vector<8x32xf32>, vector<8x32xf32> -> vector<8x32xf32>
    %307 = tpu.concatenate %258, %274, %290, %306 in 1 : vector<8x32xf32>, vector<8x32xf32>, vector<8x32xf32>, vector<8x32xf32> -> vector<8x128xf32>
    %308 = vector.extract_strided_slice %235 {offsets = [8, 0], sizes = [8, 128], strides = [1, 1]} : vector<16x128xf32> to vector<8x128xf32>
    %309 = vector.extract_strided_slice %239 {offsets = [8, 0], sizes = [8, 64], strides = [1, 1]} : vector<16x64xf32> to vector<8x64xf32>
    %310 = vector.extract_strided_slice %231 {offsets = [8, 0], sizes = [8, 64], strides = [1, 1]} : vector<16x64xf32> to vector<8x64xf32>
    %311 = vector.extract_strided_slice %308 {offsets = [0, 0], sizes = [8, 32], strides = [1, 1]} : vector<8x128xf32> to vector<8x32xf32>
    %312 = vector.extract_strided_slice %309 {offsets = [0, 0], sizes = [8, 32], strides = [1, 1]} : vector<8x64xf32> to vector<8x32xf32>
    %313 = vector.extract_strided_slice %310 {offsets = [0, 0], sizes = [8, 32], strides = [1, 1]} : vector<8x64xf32> to vector<8x32xf32>
    %cst_98 = arith.constant dense<0.000000e+00> : vector<8x8xf32>
    %314 = tpu.matmul %311, %312, %cst_98 {dimension_numbers = #tpu.dot_dimension_numbers<[1], [1], [0], [0], [0, 0, 1, 0], [], []>} : vector<8x32xf32>, vector<8x32xf32>, vector<8x8xf32> -> vector<8x8xf32>
    %315 = arith.addf %314, %12 : vector<8x8xf32>
    %cst_99 = arith.constant dense<0xFF800000> : vector<8xf32>
    %316 = vector.multi_reduction <maximumf>, %315, %cst_99 [1] : vector<8x8xf32> to vector<8xf32>
    %317 = vector.shape_cast %316 : vector<8xf32> to vector<8x1xf32>
    %318 = vector.broadcast %317 : vector<8x1xf32> to vector<8x8xf32>
    %319 = arith.subf %315, %318 : vector<8x8xf32>
    %320 = math.exp %319 : vector<8x8xf32>
    %cst_100 = arith.constant dense<0.000000e+00> : vector<8xf32>
    %321 = vector.multi_reduction <add>, %320, %cst_100 [1] : vector<8x8xf32> to vector<8xf32>
    %322 = vector.shape_cast %321 : vector<8xf32> to vector<8x1xf32>
    %323 = tpu.reciprocal %322 {approx = true} : vector<8x1xf32> -> vector<8x1xf32>
    %324 = vector.broadcast %323 : vector<8x1xf32> to vector<8x8xf32>
    %325 = arith.mulf %320, %324 : vector<8x8xf32>
    %cst_101 = arith.constant dense<0.000000e+00> : vector<8x32xf32>
    %326 = tpu.matmul %325, %313, %cst_101 {dimension_numbers = #tpu.dot_dimension_numbers<[1], [0], [0], [1], [0, 0, 1, 1], [], []>} : vector<8x8xf32>, vector<8x32xf32>, vector<8x32xf32> -> vector<8x32xf32>
    %327 = vector.extract_strided_slice %308 {offsets = [0, 32], sizes = [8, 32], strides = [1, 1]} : vector<8x128xf32> to vector<8x32xf32>
    %328 = vector.extract_strided_slice %309 {offsets = [0, 0], sizes = [8, 32], strides = [1, 1]} : vector<8x64xf32> to vector<8x32xf32>
    %329 = vector.extract_strided_slice %310 {offsets = [0, 0], sizes = [8, 32], strides = [1, 1]} : vector<8x64xf32> to vector<8x32xf32>
    %cst_102 = arith.constant dense<0.000000e+00> : vector<8x8xf32>
    %330 = tpu.matmul %327, %328, %cst_102 {dimension_numbers = #tpu.dot_dimension_numbers<[1], [1], [0], [0], [0, 0, 1, 0], [], []>} : vector<8x32xf32>, vector<8x32xf32>, vector<8x8xf32> -> vector<8x8xf32>
    %331 = arith.addf %330, %12 : vector<8x8xf32>
    %cst_103 = arith.constant dense<0xFF800000> : vector<8xf32>
    %332 = vector.multi_reduction <maximumf>, %331, %cst_103 [1] : vector<8x8xf32> to vector<8xf32>
    %333 = vector.shape_cast %332 : vector<8xf32> to vector<8x1xf32>
    %334 = vector.broadcast %333 : vector<8x1xf32> to vector<8x8xf32>
    %335 = arith.subf %331, %334 : vector<8x8xf32>
    %336 = math.exp %335 : vector<8x8xf32>
    %cst_104 = arith.constant dense<0.000000e+00> : vector<8xf32>
    %337 = vector.multi_reduction <add>, %336, %cst_104 [1] : vector<8x8xf32> to vector<8xf32>
    %338 = vector.shape_cast %337 : vector<8xf32> to vector<8x1xf32>
    %339 = tpu.reciprocal %338 {approx = true} : vector<8x1xf32> -> vector<8x1xf32>
    %340 = vector.broadcast %339 : vector<8x1xf32> to vector<8x8xf32>
    %341 = arith.mulf %336, %340 : vector<8x8xf32>
    %cst_105 = arith.constant dense<0.000000e+00> : vector<8x32xf32>
    %342 = tpu.matmul %341, %329, %cst_105 {dimension_numbers = #tpu.dot_dimension_numbers<[1], [0], [0], [1], [0, 0, 1, 1], [], []>} : vector<8x8xf32>, vector<8x32xf32>, vector<8x32xf32> -> vector<8x32xf32>
    %343 = vector.extract_strided_slice %308 {offsets = [0, 64], sizes = [8, 32], strides = [1, 1]} : vector<8x128xf32> to vector<8x32xf32>
    %344 = vector.extract_strided_slice %309 {offsets = [0, 32], sizes = [8, 32], strides = [1, 1]} : vector<8x64xf32> to vector<8x32xf32>
    %345 = vector.extract_strided_slice %310 {offsets = [0, 32], sizes = [8, 32], strides = [1, 1]} : vector<8x64xf32> to vector<8x32xf32>
    %cst_106 = arith.constant dense<0.000000e+00> : vector<8x8xf32>
    %346 = tpu.matmul %343, %344, %cst_106 {dimension_numbers = #tpu.dot_dimension_numbers<[1], [1], [0], [0], [0, 0, 1, 0], [], []>} : vector<8x32xf32>, vector<8x32xf32>, vector<8x8xf32> -> vector<8x8xf32>
    %347 = arith.addf %346, %12 : vector<8x8xf32>
    %cst_107 = arith.constant dense<0xFF800000> : vector<8xf32>
    %348 = vector.multi_reduction <maximumf>, %347, %cst_107 [1] : vector<8x8xf32> to vector<8xf32>
    %349 = vector.shape_cast %348 : vector<8xf32> to vector<8x1xf32>
    %350 = vector.broadcast %349 : vector<8x1xf32> to vector<8x8xf32>
    %351 = arith.subf %347, %350 : vector<8x8xf32>
    %352 = math.exp %351 : vector<8x8xf32>
    %cst_108 = arith.constant dense<0.000000e+00> : vector<8xf32>
    %353 = vector.multi_reduction <add>, %352, %cst_108 [1] : vector<8x8xf32> to vector<8xf32>
    %354 = vector.shape_cast %353 : vector<8xf32> to vector<8x1xf32>
    %355 = tpu.reciprocal %354 {approx = true} : vector<8x1xf32> -> vector<8x1xf32>
    %356 = vector.broadcast %355 : vector<8x1xf32> to vector<8x8xf32>
    %357 = arith.mulf %352, %356 : vector<8x8xf32>
    %cst_109 = arith.constant dense<0.000000e+00> : vector<8x32xf32>
    %358 = tpu.matmul %357, %345, %cst_109 {dimension_numbers = #tpu.dot_dimension_numbers<[1], [0], [0], [1], [0, 0, 1, 1], [], []>} : vector<8x8xf32>, vector<8x32xf32>, vector<8x32xf32> -> vector<8x32xf32>
    %359 = vector.extract_strided_slice %308 {offsets = [0, 96], sizes = [8, 32], strides = [1, 1]} : vector<8x128xf32> to vector<8x32xf32>
    %360 = vector.extract_strided_slice %309 {offsets = [0, 32], sizes = [8, 32], strides = [1, 1]} : vector<8x64xf32> to vector<8x32xf32>
    %361 = vector.extract_strided_slice %310 {offsets = [0, 32], sizes = [8, 32], strides = [1, 1]} : vector<8x64xf32> to vector<8x32xf32>
    %cst_110 = arith.constant dense<0.000000e+00> : vector<8x8xf32>
    %362 = tpu.matmul %359, %360, %cst_110 {dimension_numbers = #tpu.dot_dimension_numbers<[1], [1], [0], [0], [0, 0, 1, 0], [], []>} : vector<8x32xf32>, vector<8x32xf32>, vector<8x8xf32> -> vector<8x8xf32>
    %363 = arith.addf %362, %12 : vector<8x8xf32>
    %cst_111 = arith.constant dense<0xFF800000> : vector<8xf32>
    %364 = vector.multi_reduction <maximumf>, %363, %cst_111 [1] : vector<8x8xf32> to vector<8xf32>
    %365 = vector.shape_cast %364 : vector<8xf32> to vector<8x1xf32>
    %366 = vector.broadcast %365 : vector<8x1xf32> to vector<8x8xf32>
    %367 = arith.subf %363, %366 : vector<8x8xf32>
    %368 = math.exp %367 : vector<8x8xf32>
    %cst_112 = arith.constant dense<0.000000e+00> : vector<8xf32>
    %369 = vector.multi_reduction <add>, %368, %cst_112 [1] : vector<8x8xf32> to vector<8xf32>
    %370 = vector.shape_cast %369 : vector<8xf32> to vector<8x1xf32>
    %371 = tpu.reciprocal %370 {approx = true} : vector<8x1xf32> -> vector<8x1xf32>
    %372 = vector.broadcast %371 : vector<8x1xf32> to vector<8x8xf32>
    %373 = arith.mulf %368, %372 : vector<8x8xf32>
    %cst_113 = arith.constant dense<0.000000e+00> : vector<8x32xf32>
    %374 = tpu.matmul %373, %361, %cst_113 {dimension_numbers = #tpu.dot_dimension_numbers<[1], [0], [0], [1], [0, 0, 1, 1], [], []>} : vector<8x8xf32>, vector<8x32xf32>, vector<8x32xf32> -> vector<8x32xf32>
    %375 = tpu.concatenate %326, %342, %358, %374 in 1 : vector<8x32xf32>, vector<8x32xf32>, vector<8x32xf32>, vector<8x32xf32> -> vector<8x128xf32>
    %376 = tpu.concatenate %307, %375 in 0 : vector<8x128xf32>, vector<8x128xf32> -> vector<16x128xf32>
    %c1_114 = arith.constant 1 : index
    %c0_115 = arith.constant 0 : index
    %c0_116 = arith.constant 0 : index
    %377 = vector.load %arg7[%c1_114, %c0_115, %c0_116] : memref<2x128x128xf32, #tpu.memory_space<vmem>>, vector<1x128x128xf32>
    %378 = vector.shape_cast %377 : vector<1x128x128xf32> to vector<128x128xf32>
    %cst_117 = arith.constant dense<0.000000e+00> : vector<16x128xf32>
    %379 = tpu.matmul %376, %378, %cst_117 {dimension_numbers = #tpu.dot_dimension_numbers<[1], [0], [0], [1], [0, 0, 1, 1], [], []>} : vector<16x128xf32>, vector<128x128xf32>, vector<16x128xf32> -> vector<16x128xf32>
    %380 = arith.addf %211, %379 : vector<16x128xf32>
    %c1_118 = arith.constant 1 : index
    %c0_119 = arith.constant 0 : index
    %c0_120 = arith.constant 0 : index
    %381 = vector.load %arg5[%c1_118, %c0_119, %c0_120] : memref<2x1x128xf32, #tpu.memory_space<vmem>>, vector<1x1x128xf32>
    %382 = vector.shape_cast %381 : vector<1x1x128xf32> to vector<1x128xf32>
    %383 = arith.mulf %380, %380 : vector<16x128xf32>
    %cst_121 = arith.constant dense<0.000000e+00> : vector<16xf32>
    %384 = vector.multi_reduction <add>, %383, %cst_121 [1] : vector<16x128xf32> to vector<16xf32>
    %385 = vector.shape_cast %384 : vector<16xf32> to vector<16x1xf32>
    %cst_122 = arith.constant 1.280000e+02 : f32
    %386 = vector.broadcast %cst_122 : f32 to vector<16x1xf32>
    %387 = arith.divf %385, %386 : vector<16x1xf32>
    %cst_123 = arith.constant 9.99999974E-6 : f32
    %388 = vector.broadcast %cst_123 : f32 to vector<16x1xf32>
    %389 = arith.addf %387, %388 : vector<16x1xf32>
    %390 = math.rsqrt %389 : vector<16x1xf32>
    %391 = vector.broadcast %390 : vector<16x1xf32> to vector<16x128xf32>
    %392 = arith.mulf %380, %391 : vector<16x128xf32>
    %393 = vector.broadcast %382 : vector<1x128xf32> to vector<16x128xf32>
    %394 = arith.mulf %392, %393 : vector<16x128xf32>
    %c1_124 = arith.constant 1 : index
    %c0_125 = arith.constant 0 : index
    %c0_126 = arith.constant 0 : index
    %395 = vector.load %arg8[%c1_124, %c0_125, %c0_126] : memref<2x128x512xf32, #tpu.memory_space<vmem>>, vector<1x128x512xf32>
    %396 = vector.shape_cast %395 : vector<1x128x512xf32> to vector<128x512xf32>
    %cst_127 = arith.constant dense<0.000000e+00> : vector<16x512xf32>
    %397 = tpu.matmul %394, %396, %cst_127 {dimension_numbers = #tpu.dot_dimension_numbers<[1], [0], [0], [1], [0, 0, 1, 1], [], []>} : vector<16x128xf32>, vector<128x512xf32>, vector<16x512xf32> -> vector<16x512xf32>
    %398 = vector.extract_strided_slice %397 {offsets = [0, 0], sizes = [16, 256], strides = [1, 1]} : vector<16x512xf32> to vector<16x256xf32>
    %399 = vector.extract_strided_slice %397 {offsets = [0, 256], sizes = [16, 256], strides = [1, 1]} : vector<16x512xf32> to vector<16x256xf32>
    %400 = arith.negf %398 : vector<16x256xf32>
    %401 = math.exp %400 : vector<16x256xf32>
    %cst_128 = arith.constant 1.000000e+00 : f32
    %402 = vector.broadcast %cst_128 : f32 to vector<16x256xf32>
    %403 = arith.addf %402, %401 : vector<16x256xf32>
    %404 = arith.divf %402, %403 : vector<16x256xf32>
    %405 = arith.mulf %398, %404 : vector<16x256xf32>
    %406 = arith.mulf %405, %399 : vector<16x256xf32>
    %c1_129 = arith.constant 1 : index
    %c0_130 = arith.constant 0 : index
    %c0_131 = arith.constant 0 : index
    %407 = vector.load %arg9[%c1_129, %c0_130, %c0_131] : memref<2x256x128xf32, #tpu.memory_space<vmem>>, vector<1x256x128xf32>
    %408 = vector.shape_cast %407 : vector<1x256x128xf32> to vector<256x128xf32>
    %cst_132 = arith.constant dense<0.000000e+00> : vector<16x128xf32>
    %409 = tpu.matmul %406, %408, %cst_132 {dimension_numbers = #tpu.dot_dimension_numbers<[1], [0], [0], [1], [0, 0, 1, 1], [], []>} : vector<16x256xf32>, vector<256x128xf32>, vector<16x128xf32> -> vector<16x128xf32>
    %410 = arith.addf %380, %409 : vector<16x128xf32>
    %c0_133 = arith.constant 0 : index
    %c0_134 = arith.constant 0 : index
    %411 = vector.load %arg10[%c0_133, %c0_134] : memref<1x128xf32, #tpu.memory_space<vmem>>, vector<1x128xf32>
    %412 = arith.mulf %410, %410 : vector<16x128xf32>
    %cst_135 = arith.constant dense<0.000000e+00> : vector<16xf32>
    %413 = vector.multi_reduction <add>, %412, %cst_135 [1] : vector<16x128xf32> to vector<16xf32>
    %414 = vector.shape_cast %413 : vector<16xf32> to vector<16x1xf32>
    %cst_136 = arith.constant 1.280000e+02 : f32
    %415 = vector.broadcast %cst_136 : f32 to vector<16x1xf32>
    %416 = arith.divf %414, %415 : vector<16x1xf32>
    %cst_137 = arith.constant 9.99999974E-6 : f32
    %417 = vector.broadcast %cst_137 : f32 to vector<16x1xf32>
    %418 = arith.addf %416, %417 : vector<16x1xf32>
    %419 = math.rsqrt %418 : vector<16x1xf32>
    %420 = vector.broadcast %419 : vector<16x1xf32> to vector<16x128xf32>
    %421 = arith.mulf %410, %420 : vector<16x128xf32>
    %422 = vector.broadcast %411 : vector<1x128xf32> to vector<16x128xf32>
    %423 = arith.mulf %421, %422 : vector<16x128xf32>
    %c0_138 = arith.constant 0 : index
    %c0_139 = arith.constant 0 : index
    %424 = vector.load %arg11[%c0_138, %c0_139] : memref<128x512xf32, #tpu.memory_space<vmem>>, vector<128x512xf32>
    %cst_140 = arith.constant dense<0.000000e+00> : vector<16x512xf32>
    %425 = tpu.matmul %423, %424, %cst_140 {dimension_numbers = #tpu.dot_dimension_numbers<[1], [0], [0], [1], [0, 0, 1, 1], [], []>} : vector<16x128xf32>, vector<128x512xf32>, vector<16x512xf32> -> vector<16x512xf32>
    %c0_141 = arith.constant 0 : index
    %c0_142 = arith.constant 0 : index
    %426 = vector.load %arg12[%c0_141, %c0_142] : memref<16x512xf32, #tpu.memory_space<vmem>>, vector<16x512xf32>
    tpu.vector_store %arg12[%c0_141, %c0_142], %425 {strides = array<i32>} : memref<16x512xf32, #tpu.memory_space<vmem>>, vector<16x512xf32>,
    return
  }
}

</mosaic_0001>

<bundles_post_ra>
// kernel: transformer_forward.1
= control target key start
LH: loop header
LB: loop body
LE: loop exit
PB: predicated region body
PF: predicated region fallthrough
CT: control target
= control target key end

     0   :  { %17 = vsyncpa [#allocation3], 0  ;;  %s6704_s0 = inlined_call_operand.vmem [shape: f32[16,128], index: 0, kind: input, shape index: {}]   ;;  %s6705_s1 = inlined_call_operand.vmem [shape: f32[16,128], index: 1, kind: input, shape index: {}]   ;;  %s6706_s2 = inlined_call_operand.vmem [shape: f32[16,128], index: 2, kind: input, shape index: {}]   ;;  %s6707_s3 = inlined_call_operand.vmem [shape: f32[128,128], index: 3, kind: input, shape index: {}]   ;;  %s6708_s4 = inlined_call_operand.vmem [shape: f32[2,1,128], index: 4, kind: input, shape index: {}]   ;;  %s6709_s5 = inlined_call_operand.vmem [shape: f32[2,1,128], index: 5, kind: input, shape index: {}]   ;;  %s6710_s6 = inlined_call_operand.hbm [shape: f32[2,128,256], index: 6, kind: input, shape index: {}]   ;;  %s6711_s7 = inlined_call_operand.hbm [shape: f32[2,128,128], index: 7, kind: input, shape index: {}]   ;;  %s6712_s8 = inlined_call_operand.hbm [shape: f32[2,128,512], index: 8, kind: input, shape index: {}]   ;;  %s6713_s9 = inlined_call_operand.hbm [shape: f32[2,256,128], index: 9, kind: input, shape index: {}]   ;;  %s6714_s10 = inlined_call_operand.vmem [shape: f32[1,128], index: 10, kind: input, shape index: {}]   ;;  %s6715_s11 = inlined_call_operand.hbm [shape: f32[128,512], index: 11, kind: input, shape index: {}]   ;;  %s6716_s12 = inlined_call_operand.hbm [shape: f32[16,512], index: 12, kind: output, shape index: {}]  }
   0x1   :  { %18 = vsyncpa [#allocation6], 0 }
   0x2   :  { %19 = vsyncpa [#allocation9], 0 }
   0x3   :  { %20 = vsyncpa [#allocation4], 0  ;;  %s6028_s21 = smov [#allocation5]   ;;  %s5888_s25 = scalar_lea.hbm %s6711_s7, 4096 }
   0x4   :  { %s50_s22 = sshll.u32 %s6028_s21, 4  ;;  %p5889_p0 = scmp.ne.s32.totalorder %s6711_s7, %s5888_s25  ;;  %s51_s22 = int_to_ptr.vmem [resolvable:$true] %s50_s22 }
   0x5   :  { %p5892_p1 = scmp.lt.u32.totalorder %s5888_s25, %s6711_s7 }
   0x7   :  { %p5894_p2 = pnand %p5892_p1, %p5889_p0 }
   0x9   :  { %5897 = shalt.err (!%p5894_p2)
}
   0xa   :  { %s5898_s30 = scalar_lea.vmem %s51_s22, 4096  ;;  %p5903_p4 = scmp.lt.s32.totalorder %s51_s22, %s51_s22 }
   0xb   :  { %p5899_p3 = scmp.ne.s32.totalorder %s51_s22, %s5898_s30  ;;  %p5904_p5 = scmp.lt.s32.totalorder %s5898_s30, %s5898_s30 }
   0xd   :  { %p5905_p6 = por %p5904_p5, %p5903_p4 }
   0xf   :  { %p5906_p7 = pnand %p5905_p6, %p5899_p3 }
  0x11   :  { %5909 = shalt.err (!%p5906_p7)
}
  0x12   :  { %s6029_s13 = smov 128   ;;  %s6030_s14 = smov 8  }
  0x13   :  { %56 = dma.hbm_to_vmem [thread:$0]  %s6711_s7, 4096, %s51_s22, [#allocation6], %s6029_s13, %s6029_s13, %s6030_s14  }
  0x14   :  { %s6031_s17 = smov [#allocation8]   ;;  %s6032_s19 = smov [#allocation2]  }
  0x15   :  { %s74_s18 = sshll.u32 %s6031_s17, 4  ;;  %s38_s20 = sshll.u32 %s6032_s19, 4  ;;  %s75_s18 = int_to_ptr.vmem [resolvable:$true] %s74_s18  ;;  %s39_s20 = int_to_ptr.vmem [resolvable:$true] %s38_s20 }
  0x16   :  { %s5910_s24 = scalar_lea.hbm %s6713_s9, 8192 }
  0x17   :  { %p5911_p8 = scmp.ne.s32.totalorder %s6713_s9, %s5910_s24  ;;  %p5914_p9 = scmp.lt.u32.totalorder %s5910_s24, %s6713_s9 }
  0x19   :  { %p5916_p10 = pnand %p5914_p9, %p5911_p8 }
  0x1b   :  { %5919 = shalt.err (!%p5916_p10)
}
  0x1c   :  { %s5920_s7 = scalar_lea.vmem %s75_s18, 8192  ;;  %p5925_p12 = scmp.lt.s32.totalorder %s75_s18, %s75_s18 }
  0x1d   :  { %p5921_p11 = scmp.ne.s32.totalorder %s75_s18, %s5920_s7  ;;  %p5926_p13 = scmp.lt.s32.totalorder %s5920_s7, %s5920_s7 }
  0x1f   :  { %p5927_p0 = por %p5926_p13, %p5925_p12 }
  0x21   :  { %p5928_p1 = pnand %p5927_p0, %p5921_p11 }
  0x23   :  { %5931 = shalt.err (!%p5928_p1)
}
  0x24   :  { %80 = dma.hbm_to_vmem [thread:$0]  %s6713_s9, 8192, %s75_s18, [#allocation9], %s6029_s13, %s6029_s13, %s6030_s14  }
  0x25   :  { %s5932_s16 = scalar_lea.hbm %s6710_s6, 8192 }
  0x26   :  { %p5933_p2 = scmp.ne.s32.totalorder %s6710_s6, %s5932_s16  ;;  %p5936_p3 = scmp.lt.u32.totalorder %s5932_s16, %s6710_s6 }
  0x28   :  { %p5938_p4 = pnand %p5936_p3, %p5933_p2 }
  0x2a   :  { %5941 = shalt.err (!%p5938_p4)
}
  0x2b   :  { %s5942_s24 = scalar_lea.vmem %s39_s20, 8192  ;;  %p5947_p6 = scmp.lt.s32.totalorder %s39_s20, %s39_s20 }
  0x2c   :  { %p5943_p5 = scmp.ne.s32.totalorder %s39_s20, %s5942_s24  ;;  %p5948_p7 = scmp.lt.s32.totalorder %s5942_s24, %s5942_s24 }
  0x2e   :  { %p5949_p8 = por %p5948_p7, %p5947_p6 }
  0x30   :  { %p5950_p9 = pnand %p5949_p8, %p5943_p5 }
  0x32   :  { %5953 = shalt.err (!%p5950_p9)
}
  0x33   :  { %s6033_s9 = smov 256   ;;  %s6034_s13 = smov 16  }
  0x34   :  { %44 = dma.hbm_to_vmem [thread:$0]  %s6710_s6, 8192, %s39_s20, [#allocation3], %s6033_s9, %s6033_s9, %s6034_s13  }
  0x35   :  { %s6035_s25 = smov [#allocation7]   ;;  %s5954_s7 = scalar_lea.hbm %s6712_s8, 16384 }
  0x36   :  { %s62_s26 = sshll.u32 %s6035_s25, 4  ;;  %p5955_p10 = scmp.ne.s32.totalorder %s6712_s8, %s5954_s7  ;;  %s63_s26 = int_to_ptr.vmem [resolvable:$true] %s62_s26 }
  0x37   :  { %p5958_p11 = scmp.lt.u32.totalorder %s5954_s7, %s6712_s8 }
  0x39   :  { %p5960_p12 = pnand %p5958_p11, %p5955_p10 }
  0x3b   :  { %5963 = shalt.err (!%p5960_p12)
}
  0x3c   :  { %s5964_s16 = scalar_lea.vmem %s63_s26, 16384  ;;  %p5969_p0 = scmp.lt.s32.totalorder %s63_s26, %s63_s26 }
  0x3d   :  { %p5965_p13 = scmp.ne.s32.totalorder %s63_s26, %s5964_s16  ;;  %p5970_p1 = scmp.lt.s32.totalorder %s5964_s16, %s5964_s16 }
  0x3f   :  { %p5971_p2 = por %p5970_p1, %p5969_p0 }
  0x41   :  { %p5972_p3 = pnand %p5971_p2, %p5965_p13 }
  0x43   :  { %5975 = shalt.err (!%p5972_p3)
}
  0x44   :  { %s6036_s6 = smov 512   ;;  %s6037_s20 = smov 32  }
  0x45   :  { %68 = dma.hbm_to_vmem [thread:$0]  %s6712_s8, 16384, %s63_s26, [#allocation6], %s6036_s6, %s6036_s6, %s6037_s20  }
  0x46   :  { %s6038_s21 = smov [#allocation10]   ;;  %s5976_s13 = scalar_lea.hbm %s6715_s11, 8192 }
  0x47   :  { %s88_s23 = sshll.u32 %s6038_s21, 4  ;;  %p5977_p4 = scmp.ne.s32.totalorder %s6715_s11, %s5976_s13  ;;  %s89_s23 = int_to_ptr.vmem [resolvable:$true] %s88_s23 }
  0x48   :  { %p5980_p5 = scmp.lt.u32.totalorder %s5976_s13, %s6715_s11 }
  0x4a   :  { %p5982_p6 = pnand %p5980_p5, %p5977_p4 }
  0x4c   :  { %5985 = shalt.err (!%p5982_p6)
}
  0x4d   :  { %s5986_s28 = scalar_lea.vmem %s89_s23, 8192  ;;  %p5991_p8 = scmp.lt.s32.totalorder %s89_s23, %s89_s23 }
  0x4e   :  { %p5987_p7 = scmp.ne.s32.totalorder %s89_s23, %s5986_s28  ;;  %p5992_p9 = scmp.lt.s32.totalorder %s5986_s28, %s5986_s28 }
  0x50   :  { %p5993_p10 = por %p5992_p9, %p5991_p8 }
  0x52   :  { %p5994_p11 = pnand %p5993_p10, %p5987_p7 }
  0x54   :  { %5997 = shalt.err (!%p5994_p11)
}
  0x55   :  { %94 = dma.hbm_to_vmem [thread:$0]  %s6715_s11, 8192, %s89_s23, [#allocation9], %s6036_s6, %s6036_s6, %s6037_s20  }
  0x56   :  { %6020 = dma.done.wait [#allocation3], 8192  }
  0x57   :  { %6021 = vsyncadd [#allocation3], 4294959104 }
  0x58   :  { %6022 = dma.done.wait [#allocation6], 20480  }
  0x59   :  { %6023 = vsyncadd [#allocation6], 4294946816 }
  0x5a   :  { %6024 = dma.done.wait [#allocation9], 16384  }
  0x5b   :  { %6025 = vsyncadd [#allocation9], 4294950912  ;;  %v6178_v0 = vld [vmem:[%s6704_s0] sm:$0xff]  ;;  %v6183_v1 = vld [vmem:[%s6704_s0 + $0x8] sm:$0xff]  ;;  %v6039_v47 = vmov 0.0   ;;  %vm354_vm0 = vcmask 523264  }
  0x5c   :  { %v163_v2 = vld [vmem:[#allocation2 + $0x8] sm:$0xff]  ;;  %v139_v3 = vmul.f32 %v6178_v0, %v6178_v0  ;;  %v165_v4 = vld [vmem:[#allocation2 + $0x18] sm:$0xff]  ;;  %v162_v5 = vld [vmem:[#allocation2] sm:$0xff]  ;;  %v140_v12 = vmul.f32 %v6183_v1, %v6183_v1  ;;  %258 = vmatprep.mubr.f32.mxu0 %v6039_v47  ;;  %s6040_s27 = smov 64   ;;  %vm6041_vm1 = vmmov 0   ;;  %vm440_vm2 = vcmask 261120  }
  0x5d   :  { %v164_v6 = vld [vmem:[#allocation2 + $0x10] sm:$0xff]  ;;  %v5240_v7 = vpack.c.bf16 %v165_v4, %v163_v2  ;;  %v167_v9 = vld [vmem:[#allocation2 + $0x28] sm:$0xff]  ;;  %v169_v10 = vld [vmem:[#allocation2 + $0x38] sm:$0xff]  ;;  %s6042_s11 = smov 96   ;;  %vm517_vm4 = vcmask 64512   ;;  %vm1100_vm5 = vcmask 785408  }
  0x5e   :  { %v5242_v8 = vpack.c.bf16 %v164_v6, %v162_v5  ;;  %v166_v11 = vld [vmem:[#allocation2 + $0x20] sm:$0xff]  ;;  %141 = vadd.xlane.f32.xlu0 %v139_v3  ;;  %v5244_v13 = vpack.c.bf16 %v169_v10, %v167_v9  ;;  %v168_v14 = vld [vmem:[#allocation2 + $0x30] sm:$0xff]  ;;  %v171_v15 = vld [vmem:[#allocation2 + $0x48] sm:$0xff] }
  0x5f   :  { %v173_v16 = vld [vmem:[#allocation2 + $0x58] sm:$0xff]  ;;  %5241 = vmatprep.subr.bf16.mxu0 %v5240_v7  ;;  %v5246_v17 = vpack.c.bf16 %v168_v14, %v166_v11  ;;  %v170_v19 = vld [vmem:[#allocation2 + $0x40] sm:$0xff]  ;;  %v172_v20 = vld [vmem:[#allocation2 + $0x50] sm:$0xff] }
  0x60   :  { %5243 = vmatpush1.bf16.msra.mxu0 %v5242_v8  ;;  %v5248_v18 = vpack.c.bf16 %v173_v16, %v171_v15  ;;  %v175_v21 = vld [vmem:[#allocation2 + $0x68] sm:$0xff]  ;;  %v177_v22 = vld [vmem:[#allocation2 + $0x78] sm:$0xff]  ;;  %v5250_v23 = vpack.c.bf16 %v172_v20, %v170_v19  ;;  %v174_v25 = vld [vmem:[#allocation2 + $0x60] sm:$0xff] }
  0x61   :  { %5245 = vmatprep.subr.bf16.mxu0 %v5244_v13  ;;  %v5252_v24 = vpack.c.bf16 %v177_v22, %v175_v21  ;;  %v176_v26 = vld [vmem:[#allocation2 + $0x70] sm:$0xff]  ;;  %v179_v28 = vld [vmem:[#allocation2 + $0x88] sm:$0xff]  ;;  %v181_v29 = vld [vmem:[#allocation2 + $0x98] sm:$0xff] }
  0x62   :  { %143 = vadd.xlane.f32.xlu0 %v140_v12  ;;  %v5254_v27 = vpack.c.bf16 %v176_v26, %v174_v25  ;;  %v5256_v30 = vpack.c.bf16 %v181_v29, %v179_v28  ;;  %v178_v31 = vld [vmem:[#allocation2 + $0x80] sm:$0xff]  ;;  %v180_v32 = vld [vmem:[#allocation2 + $0x90] sm:$0xff]  ;;  %v183_v34 = vld [vmem:[#allocation2 + $0xa8] sm:$0xff] }
  0x63   :  { %v5258_v33 = vpack.c.bf16 %v180_v32, %v178_v31  ;;  %v185_v35 = vld [vmem:[#allocation2 + $0xb8] sm:$0xff]  ;;  %v182_v37 = vld [vmem:[#allocation2 + $0xa0] sm:$0xff]  ;;  %v184_v38 = vld [vmem:[#allocation2 + $0xb0] sm:$0xff] }
  0x64   :  { %5247 = vmatpush1.bf16.msra.mxu0 %v5246_v17  ;;  %v5260_v36 = vpack.c.bf16 %v185_v35, %v183_v34  ;;  %v5262_v39 = vpack.c.bf16 %v184_v38, %v182_v37  ;;  %v187_v40 = vld [vmem:[#allocation2 + $0xc8] sm:$0xff]  ;;  %v189_v41 = vld [vmem:[#allocation2 + $0xd8] sm:$0xff]  ;;  %v186_v42 = vld [vmem:[#allocation2 + $0xc0] sm:$0xff] }
  0x65   :  { %5249 = vmatprep.subr.bf16.mxu0 %v5248_v18  ;;  %v5264_v43 = vpack.c.bf16 %v189_v41, %v187_v40  ;;  %v188_v44 = vld [vmem:[#allocation2 + $0xd0] sm:$0xff]  ;;  %v191_v45 = vld [vmem:[#allocation2 + $0xe8] sm:$0xff]  ;;  %v193_v46 = vld [vmem:[#allocation2 + $0xf8] sm:$0xff] }
  0x66   :  { %v5266_v48 = vpack.c.bf16 %v188_v44, %v186_v42  ;;  %v5268_v49 = vpack.c.bf16 %v193_v46, %v191_v45  ;;  %v190_v50 = vld [vmem:[#allocation2 + $0xe0] sm:$0xff]  ;;  %v192_v51 = vld [vmem:[#allocation2 + $0xf0] sm:$0xff]  ;;  %v117_v54 = vld [vmem:[%s6707_s3 + $0x8] sm:$0xff] }
  0x67   :  { %v5270_v52 = vpack.c.bf16 %v192_v51, %v190_v50  ;;  %v116_v53 = vld [vmem:[%s6707_s3] sm:$0xff]  ;;  %v118_v55 = vld [vmem:[%s6707_s3 + $0x10] sm:$0xff]  ;;  %v119_v57 = vld [vmem:[%s6707_s3 + $0x18] sm:$0xff] }
  0x68   :  { %5251 = vmatpush1.bf16.msra.mxu0 %v5250_v23  ;;  %v6199_v56 = vpack.c.bf16 %v117_v54, %v116_v53  ;;  %v6204_v58 = vpack.c.bf16 %v119_v57, %v118_v55  ;;  %v120_v59 = vld [vmem:[%s6707_s3 + $0x20] sm:$0xff]  ;;  %v121_v60 = vld [vmem:[%s6707_s3 + $0x28] sm:$0xff]  ;;  %v122_v62 = vld [vmem:[%s6707_s3 + $0x30] sm:$0xff] }
  0x69   :  { %5253 = vmatprep.subr.bf16.mxu0 %v5252_v24  ;;  %v6216_v61 = vpack.c.bf16 %v121_v60, %v120_v59  ;;  %v123_v63 = vld [vmem:[%s6707_s3 + $0x38] sm:$0xff]  ;;  %v124_v3 = vld [vmem:[%s6707_s3 + $0x40] sm:$0xff]  ;;  %v125_v4 = vld [vmem:[%s6707_s3 + $0x48] sm:$0xff] }
  0x6a   :  { %5273 = vmatprep.subr.bf16.mxu1 %v6199_v56  ;;  %v6226_v2 = vpack.c.bf16 %v123_v63, %v122_v62  ;;  %v6236_v5 = vpack.c.bf16 %v125_v4, %v124_v3  ;;  %v126_v6 = vld [vmem:[%s6707_s3 + $0x50] sm:$0xff]  ;;  %v127_v7 = vld [vmem:[%s6707_s3 + $0x58] sm:$0xff]  ;;  %v128_v9 = vld [vmem:[%s6707_s3 + $0x60] sm:$0xff] }
  0x6b   :  { %5275 = vmatpush3.bf16.msra.mxu1 %v6199_v56  ;;  %v6246_v8 = vpack.c.bf16 %v127_v7, %v126_v6  ;;  %v129_v10 = vld [vmem:[%s6707_s3 + $0x68] sm:$0xff]  ;;  %v4603_v19 = vld [vmem:[%s6708_s4] ss:$0 sm:$0xff] }
  0x6c   :  { %5255 = vmatpush1.bf16.msra.mxu0 %v5254_v27  ;;  %5277 = vmatprep.subr.bf16.mxu1 %v6204_v58  ;;  %v6256_v11 = vpack.c.bf16 %v129_v10, %v128_v9  ;;  %v115_v31 = vld [vmem:[%s6706_s2 + $0x8] sm:$0xff]  ;;  %v112_v32 = vld [vmem:[%s6705_s1] sm:$0xff] }
  0x6d   :  { %5257 = vmatprep.subr.bf16.mxu0 %v5256_v30  ;;  %v113_v30 = vld [vmem:[%s6705_s1 + $0x8] sm:$0xff] }
  0x6f   :  { %5279 = vmatpush3.bf16.msra.mxu1 %v6204_v58 }
  0x70   :  { %5259 = vmatpush1.bf16.msra.mxu0 %v5258_v33  ;;  %5281 = vmatprep.subr.bf16.mxu1 %v6216_v61  ;;  %v114_v33 = vld [vmem:[%s6706_s2] sm:$0xff] }
  0x71   :  { %5261 = vmatprep.subr.bf16.mxu0 %v5260_v36 }
  0x73   :  { %5283 = vmatpush3.bf16.msra.mxu1 %v6216_v61 }
  0x74   :  { %5263 = vmatpush1.bf16.msra.mxu0 %v5262_v39  ;;  %5285 = vmatprep.subr.bf16.mxu1 %v6226_v2 }
  0x75   :  { %5265 = vmatprep.subr.bf16.mxu0 %v5264_v43 }
  0x77   :  { %5287 = vmatpush3.bf16.msra.mxu1 %v6226_v2 }
  0x78   :  { %5267 = vmatpush1.bf16.msra.mxu0 %v5266_v48  ;;  %5289 = vmatprep.subr.bf16.mxu1 %v6236_v5 }
  0x79   :  { %5269 = vmatprep.subr.bf16.mxu0 %v5268_v49 }
  0x7b   :  { %5291 = vmatpush3.bf16.msra.mxu1 %v6236_v5 }
  0x7c   :  { %5271 = vmatpush1.bf16.msra.mxu0 %v5270_v52  ;;  %5293 = vmatprep.subr.bf16.mxu1 %v6246_v8  ;;  %v132_v52 = vlaneseq }
  0x7d   :  { %5305 = vmatprep.subr.bf16.mxu0 %v6199_v56 }
  0x7e   :  { %v133_v53 = vshrl.u32 %v132_v52, 7  ;;  %v135_v54 = vand.u32 127, %v132_v52 }
  0x7f   :  { %5295 = vmatpush3.bf16.msra.mxu1 %v6246_v8 }
  0x80   :  { %5297 = vmatprep.subr.bf16.mxu1 %v6256_v11  ;;  %vm136_vm3 = vcmp.gt.s32.totalorder %v135_v54, %v133_v53 }
  0x81   :  { %v6324_v55 = vsel %vm136_vm3, -1e+30, %v6039_v47 }
  0x83   :  { %5299 = vmatpush3.bf16.msra.mxu1 %v6256_v11 }
  0xeb   :  { %v142_v12 = vpop.xlane.xlu0 %141 }
  0xec   :  { %v146_v13 = vmul.f32 0.0078125, %v142_v12 }
  0xee   :  { %v148_v14 = vadd.f32 1e-05, %v146_v13 }
  0xef   :  { %v144_v15 = vpop.xlane.xlu0 %143 }
  0xf0   :  { %5766 = vrsqrt.f32 %v148_v14  ;;  %v147_v16 = vmul.f32 0.0078125, %v144_v15 }
  0xf2   :  { %v149_v17 = vadd.f32 1e-05, %v147_v16 }
  0xf4   :  { %5768 = vrsqrt.f32 %v149_v17 }
  0xfa   :  { %v5767_v18 = vpop.eup %5766 }
  0xfb   :  { %v152_v20 = vmul.f32 %v5767_v18, %v6178_v0  ;;  %v130_v0 = vld [vmem:[%s6707_s3 + $0x70] sm:$0xff] }
  0xfd   :  { %v160_v21 = vmul.f32 %v4603_v19, %v152_v20 }
  0xfe   :  { %v5769_v22 = vpop.eup %5768 }
  0xff   :  { %259 = vmatmul.mubr.f32.vlgmr.msra.gmra.mrb[0].mxu0 %v160_v21  ;;  %v153_v23 = vmul.f32 %v5769_v22, %v6183_v1  ;;  %v131_v1 = vld [vmem:[%s6707_s3 + $0x78] sm:$0xff] }
 0x100   :  { %264 = vmatprep.mubr.f32.mxu0 %v6039_v47  ;;  %5307 = vmatpush3.bf16.msra.mxu0 %v6199_v56  ;;  %v6281_v25 = vpack.c.bf16 %v131_v1, %v130_v0 }
 0x101   :  { %v161_v24 = vmul.f32 %v4603_v19, %v153_v23  ;;  %5309 = vmatprep.subr.bf16.mxu0 %v6204_v58 }
 0x102   :  { %5301 = vmatprep.subr.bf16.mxu1 %v6281_v25 }
 0x103   :  { %265 = vmatmul.mubr.f32.gmra.mrb[2].mxu0 %v161_v24  ;;  %5303 = vmatpush3.bf16.msra.mxu1 %v6281_v25 }
 0x104   :  { %5311 = vmatpush3.bf16.msra.mxu0 %v6204_v58  ;;  %4956 = vmatprep.subr.mxu1 %v6039_v47 }
 0x105   :  { %5313 = vmatprep.subr.bf16.mxu0 %v6216_v61 }
 0x108   :  { %5315 = vmatpush3.bf16.msra.mxu0 %v6216_v61 }
 0x109   :  { %5317 = vmatprep.subr.bf16.mxu0 %v6226_v2 }
 0x10c   :  { %5319 = vmatpush3.bf16.msra.mxu0 %v6226_v2 }
 0x10d   :  { %4976 = vmatprep.subr.mxu0 %v6039_v47 }
 0x1d2   :  { %v260_v26 = vpop.f32.mrb[0].mxu0 }
 0x1d3   :  { %v6286_v27 = vpop.f32.mrb[1].mxu0  ;;  %4934 = vmatprep.mubr.f32.mxu1 %v260_v26  ;;  %v271_v39 = vmul.f32 %v260_v26, %v112_v32 }
 0x1d4   :  { %529 = vrot.lane.b32.xlu0 %v6286_v27, %s6040_s27  ;;  %4953 = vmatprep.mubr.msk.f32.mxu0 %vm354_vm0, %v6286_v27  ;;  %v352_v45 = vmul.f32 %v6286_v27, %v112_v32 }
 0x1d6   :  { %v266_v28 = vpop.f32.mrb[2].mxu0 }
 0x1d7   :  { %v6292_v29 = vpop.f32.mrb[3].mxu0  ;;  %4935 = vmatmul.mubr.f32.vlgmr.msra.gmra.mrb[0].mxu1 %v266_v28  ;;  %v272_v35 = vmul.f32 %v266_v28, %v113_v30 }
 0x1d8   :  { %4954 = vmatmul.mubr.msk.f32.vlgmr.msra.gmra.mrb[4].mxu0 %vm354_vm0, %v6292_v29  ;;  %4958 = vmatprep.mubr.msk.f32.mxu1 %vm6041_vm1, %v6039_v47  ;;  %v353_v41 = vmul.f32 %v6292_v29, %v113_v30 }
 0x1d9   :  { %4978 = vmatprep.mubr.msk.f32.mxu0 %vm6041_vm1, %v6039_v47 }
 0x246   :  { %v530_v51 = vpop.permute.xlu0 %529 }
 0x2aa   :  { %v4936_v34 = vpop.f32.mrb[0].mxu1 }
 0x2ab   :  { %v349_v36 = vmul.f32 %v4936_v34, %v115_v31  ;;  %v339_v37 = vpop.f32.mrb[1].mxu1  ;;  %v4955_v38 = vpop.f32.mrb[4].mxu0 }
 0x2ac   :  { %v348_v40 = vmul.f32 %v339_v37, %v114_v33  ;;  %v437_v42 = vmul.f32 %v4955_v38, %v115_v31  ;;  %v427_v43 = vpop.f32.mrb[5].mxu0 }
 0x2ad   :  { %v351_v44 = vadd.f32 %v349_v36, %v272_v35  ;;  %v436_v46 = vmul.f32 %v427_v43, %v114_v33 }
 0x2ae   :  { %v350_v48 = vadd.f32 %v348_v40, %v271_v39  ;;  %v439_v49 = vadd.f32 %v437_v42, %v353_v41 }
 0x2af   :  { %v438_v50 = vadd.f32 %v436_v46, %v352_v45 }
 0x2b0   :  { %928 = vrot.lane.b32.xlu0 %v350_v48, %s6037_s20 }
 0x2b1   :  { %4957 = vmatpush3.xpose.msk.msra.mxu1 %vm440_vm2, %v438_v50 }
 0x2b2   :  { %4961 = vmatprep.subr.mxu1 %v6039_v47 }
 0x2b4   :  { %4959 = vmatmul.mubr.msk.f32.vlgmr.msra.gmra.mrb[2].mxu1 %vm440_vm2, %v350_v48  ;;  %1425 = vrot.lane.b32.xlu0 %v439_v49, %s6042_s11 }
 0x2b5   :  { %4962 = vmatpush3.msra.mxu1 %v530_v51  ;;  %4963 = vmatprep.mubr.msk.f32.mxu1 %vm6041_vm1, %v6039_v47 }
 0x2b6   :  { %4966 = vmatprep.subr.mxu1 %v6039_v47 }
 0x2b8   :  { %1588 = vrot.lane.b32.xlu0 %v351_v44, %s6037_s20 }
 0x322   :  { %v929_v14 = vpop.permute.xlu0 %928 }
 0x326   :  { %v1426_v18 = vpop.permute.xlu0 %1425 }
 0x32a   :  { %v1589_v20 = vpop.permute.xlu0 %1588 }
 0x387   :  { %v513_v57 = vpop.f32.mrb[2].mxu1 }
 0x388   :  { %v514_v59 = vadd.f32 %v513_v57, %v6324_v55  ;;  %v4960_v60 = vpop.f32.mrb[3].mxu1 }
 0x38a   :  { %v518_v62 = vsel %vm517_vm4, %v514_v59, -inf }
 0x38b   :  { %519 = vmax.xlane.f32.xlu1 %v518_v62 }
 0x39c   :  { %605 = vrot.lane.b32.xlu1 %v350_v48, %s6042_s11 }
 0x3a0   :  { %765 = vrot.lane.b32.xlu1 %v438_v50, %s6042_s11 }
 0x418   :  { %v520_v63 = vpop.xlane.xlu1 %519 }
 0x419   :  { %v521_v3 = vsub.f32 %v514_v59, %v520_v63 }
 0x41b   :  { %v522_v4 = vmul.f32 1.442695, %v521_v3 }
 0x41c   :  { %v606_v6 = vpop.permute.xlu1 %605 }
 0x41d   :  { %5770 = vpow2.f32 %v522_v4 }
 0x420   :  { %v766_v7 = vpop.permute.xlu1 %765 }
 0x421   :  { %4977 = vmatpush3.xpose.msk.msra.mxu0 %vm440_vm2, %v766_v7 }
 0x422   :  { %4986 = vmatprep.subr.mxu0 %v6039_v47 }
 0x427   :  { %v5771_v9 = vpop.eup %5770 }
 0x428   :  { %v524_v10 = vsel %vm517_vm4, %v5771_v9, 0.0 }
 0x429   :  { %525 = vadd.xlane.f32.xlu1 %v524_v10 }
 0x43a   :  { %763 = vrot.lane.b32.xlu1 %v350_v48, %s6040_s27 }
 0x43e   :  { %1265 = vrot.lane.b32.xlu1 %v351_v44, %s6042_s11 }
 0x442   :  { %1423 = vrot.lane.b32.xlu1 %v351_v44, %s6040_s27 }
 0x4b6   :  { %v526_v12 = vpop.xlane.xlu1 %525 }
 0x4b7   :  { %5772 = vrcp.f32 %v526_v12 }
 0x4ba   :  { %v764_v13 = vpop.permute.xlu1 %763 }
 0x4bb   :  { %4979 = vmatmul.mubr.msk.f32.vlgmr.msra.gmra.mrb[6].mxu0 %vm440_vm2, %v764_v13 }
 0x4bc   :  { %4987 = vmatpush3.xpose.msk.msra.mxu0 %vm440_vm2, %v766_v7  ;;  %4988 = vmatprep.mubr.msk.f32.mxu0 %vm6041_vm1, %v6039_v47 }
 0x4bd   :  { %4996 = vmatprep.subr.mxu0 %v6039_v47 }
 0x4be   :  { %v1266_v17 = vpop.permute.xlu1 %1265 }
 0x4bf   :  { %4989 = vmatmul.mubr.msk.f32.vlgmr.msra.gmra.mrb[8].mxu0 %vm440_vm2, %v929_v14 }
 0x4c0   :  { %4997 = vmatpush3.xpose.msk.msra.mxu0 %vm440_vm2, %v439_v49  ;;  %4998 = vmatprep.mubr.msk.f32.mxu0 %vm6041_vm1, %v6039_v47 }
 0x4c1   :  { %v5773_v15 = vpop.eup %5772  ;;  %5006 = vmatprep.subr.mxu0 %v6039_v47 }
 0x4c2   :  { %v528_v16 = vmul.f32 %v5773_v15, %v5771_v9  ;;  %v1424_v19 = vpop.permute.xlu1 %1423 }
 0x4c3   :  { %4999 = vmatmul.mubr.msk.f32.vlgmr.msra.gmra.mrb[10].mxu0 %vm440_vm2, %v351_v44 }
 0x4c4   :  { %5007 = vmatpush3.xpose.msk.msra.mxu0 %vm440_vm2, %v439_v49  ;;  %4964 = vmatmul.mubr.msk.f32.vlgmr.msra.gmra.mrb[4].mxu1 %vm517_vm4, %v528_v16 }
 0x4c5   :  { %4967 = vmatpush3.xpose.msk.msra.mxu1 %vm440_vm2, %v438_v50  ;;  %5008 = vmatprep.mubr.msk.f32.mxu0 %vm6041_vm1, %v6039_v47 }
 0x4c6   :  { %5016 = vmatprep.subr.mxu0 %v6039_v47  ;;  %4968 = vmatprep.mubr.msk.f32.mxu1 %vm6041_vm1, %v6039_v47 }
 0x4c7   :  { %4971 = vmatprep.subr.mxu1 %v6039_v47  ;;  %5009 = vmatmul.mubr.msk.f32.vlgmr.msra.gmra.mrb[12].mxu0 %vm440_vm2, %v1266_v17 }
 0x4c8   :  { %5017 = vmatpush3.xpose.msk.msra.mxu0 %vm440_vm2, %v1426_v18  ;;  %4969 = vmatmul.mubr.msk.f32.vlgmr.msra.gmra.mrb[6].mxu1 %vm440_vm2, %v606_v6 }
 0x4c9   :  { %4972 = vmatpush3.msra.mxu1 %v530_v51  ;;  %5018 = vmatprep.mubr.msk.f32.mxu0 %vm6041_vm1, %v6039_v47 }
 0x4ca   :  { %5026 = vmatprep.subr.mxu0 %v6039_v47  ;;  %4973 = vmatprep.mubr.msk.f32.mxu1 %vm6041_vm1, %v6039_v47 }
 0x4cb   :  { %5019 = vmatmul.mubr.msk.f32.vlgmr.msra.gmra.mrb[14].mxu0 %vm440_vm2, %v1424_v19  ;;  %4981 = vmatprep.subr.mxu1 %v6039_v47 }
 0x4cc   :  { %5027 = vmatpush3.xpose.msk.msra.mxu0 %vm440_vm2, %v1426_v18  ;;  %5028 = vmatprep.mubr.msk.f32.mxu0 %vm6041_vm1, %v6039_v47 }
 0x4cf   :  { %5029 = vmatmul.mubr.msk.f32.vlgmr.msra.gmra.mrb[16].mxu0 %vm440_vm2, %v1589_v20 }
 0x58e   :  { %v837_v21 = vpop.f32.mrb[6].mxu0 }
 0x58f   :  { %v838_v22 = vadd.f32 %v837_v21, %v6324_v55  ;;  %v4980_v23 = vpop.f32.mrb[7].mxu0 }
 0x591   :  { %v841_v24 = vsel %vm517_vm4, %v838_v22, -inf }
 0x592   :  { %842 = vmax.xlane.f32.xlu0 %v841_v24  ;;  %v998_v0 = vpop.f32.mrb[8].mxu0 }
 0x593   :  { %v999_v1 = vadd.f32 %v998_v0, %v6324_v55  ;;  %v4990_v26 = vpop.f32.mrb[9].mxu0 }
 0x595   :  { %v1002_v28 = vsel %vm517_vm4, %v999_v1, -inf }
 0x596   :  { %1003 = vmax.xlane.f32.xlu0 %v1002_v28  ;;  %v1174_v30 = vpop.f32.mrb[10].mxu0 }
 0x597   :  { %v1175_v31 = vadd.f32 %v1174_v30, %v6324_v55  ;;  %v6375_v32 = vpop.f32.mrb[4].mxu1  ;;  %v5000_v33 = vpop.f32.mrb[11].mxu0 }
 0x598   :  { %v4965_v34 = vpop.f32.mrb[5].mxu1 }
 0x599   :  { %v1178_v35 = vsel %vm517_vm4, %v1175_v31, -inf }
 0x59a   :  { %1179 = vmax.xlane.f32.xlu0 %v1178_v35  ;;  %v1335_v36 = vpop.f32.mrb[12].mxu0 }
 0x59b   :  { %v675_v37 = vpop.f32.mrb[6].mxu1  ;;  %v5010_v38 = vpop.f32.mrb[13].mxu0  ;;  %v1336_v41 = vadd.f32 %v1335_v36, %v6324_v55 }
 0x59c   :  { %v676_v39 = vadd.f32 %v675_v37, %v6324_v55  ;;  %v4970_v40 = vpop.f32.mrb[7].mxu1 }
 0x59d   :  { %v1339_v49 = vsel %vm517_vm4, %v1336_v41, -inf }
 0x59e   :  { %v1497_v42 = vpop.f32.mrb[14].mxu0  ;;  %v679_v43 = vsel %vm517_vm4, %v676_v39, -inf }
 0x59f   :  { %v1498_v44 = vadd.f32 %v1497_v42, %v6324_v55  ;;  %680 = vmax.xlane.f32.xlu1 %v679_v43  ;;  %v5020_v45 = vpop.f32.mrb[15].mxu0 }
 0x5a1   :  { %v1501_v46 = vsel %vm517_vm4, %v1498_v44, -inf }
 0x5a2   :  { %1502 = vmax.xlane.f32.xlu0 %v1501_v46  ;;  %v1658_v48 = vpop.f32.mrb[16].mxu0 }
 0x5a3   :  { %v1659_v50 = vadd.f32 %v1658_v48, %v6324_v55  ;;  %1340 = vmax.xlane.f32.xlu1 %v1339_v49  ;;  %v5030_v51 = vpop.f32.mrb[17].mxu0 }
 0x5a5   :  { %v1662_v52 = vsel %vm517_vm4, %v1659_v50, -inf }
 0x5a7   :  { %1663 = vmax.xlane.f32.xlu1 %v1662_v52 }
 0x61f   :  { %v843_v53 = vpop.xlane.xlu0 %842 }
 0x620   :  { %v844_v54 = vsub.f32 %v838_v22, %v843_v53 }
 0x622   :  { %v845_v57 = vmul.f32 1.442695, %v844_v54 }
 0x623   :  { %v1004_v59 = vpop.xlane.xlu0 %1003 }
 0x624   :  { %5774 = vpow2.f32 %v845_v57  ;;  %v1005_v60 = vsub.f32 %v999_v1, %v1004_v59 }
 0x626   :  { %v1006_v62 = vmul.f32 1.442695, %v1005_v60 }
 0x627   :  { %v1180_v63 = vpop.xlane.xlu0 %1179 }
 0x628   :  { %5776 = vpow2.f32 %v1006_v62  ;;  %v1181_v3 = vsub.f32 %v1175_v31, %v1180_v63  ;;  %v1761_v63 = vld [vmem:[#allocation5] sm:$0xff] }
 0x62a   :  { %v1182_v4 = vmul.f32 1.442695, %v1181_v3  ;;  %v1762_v3 = vld [vmem:[#allocation5 + $0x8] sm:$0xff] }
 0x62c   :  { %5778 = vpow2.f32 %v1182_v4  ;;  %v681_v6 = vpop.xlane.xlu1 %680  ;;  %v1763_v4 = vld [vmem:[#allocation5 + $0x10] sm:$0xff] }
 0x62d   :  { %v682_v7 = vsub.f32 %v676_v39, %v681_v6  ;;  %v5320_v6 = vpack.c.bf16 %v1762_v3, %v1761_v63 }
 0x62e   :  { %v5775_v9 = vpop.eup %5774 }
 0x62f   :  { %v683_v10 = vmul.f32 1.442695, %v682_v7  ;;  %v1503_v12 = vpop.xlane.xlu0 %1502  ;;  %v847_v13 = vsel %vm517_vm4, %v5775_v9, 0.0  ;;  %v1764_v7 = vld [vmem:[#allocation5 + $0x18] sm:$0xff]  ;;  %5321 = vmatprep.subr.bf16.mxu0 %v5320_v6 }
 0x630   :  { %v1504_v14 = vsub.f32 %v1498_v44, %v1503_v12  ;;  %v1341_v15 = vpop.xlane.xlu1 %1340  ;;  %848 = vadd.xlane.f32.xlu1 %v847_v13  ;;  %v1766_v12 = vld [vmem:[#allocation5 + $0x28] sm:$0xff]  ;;  %5323 = vmatpush3.bf16.msra.mxu0 %v5320_v6 }
 0x631   :  { %5780 = vpow2.f32 %v683_v10  ;;  %v1342_v16 = vsub.f32 %v1336_v41, %v1341_v15  ;;  %v1765_v10 = vld [vmem:[#allocation5 + $0x20] sm:$0xff]  ;;  %v1768_v15 = vld [vmem:[#allocation5 + $0x38] sm:$0xff]  ;;  %v1878_v6 = vld [vmem:[#allocation7 + $0x8] sm:$0xff] }
 0x632   :  { %v5777_v17 = vpop.eup %5776  ;;  %v1505_v18 = vmul.f32 1.442695, %v1504_v14  ;;  %v5328_v13 = vpack.c.bf16 %v1766_v12, %v1765_v10  ;;  %v1767_v14 = vld [vmem:[#allocation5 + $0x30] sm:$0xff]  ;;  %v1884_v12 = vld [vmem:[#allocation7 + $0x38] sm:$0xff] }
 0x633   :  { %v1343_v19 = vmul.f32 1.442695, %v1342_v16  ;;  %v1008_v20 = vsel %vm517_vm4, %v5777_v17, 0.0  ;;  %v5332_v16 = vpack.c.bf16 %v1768_v15, %v1767_v14  ;;  %v1881_v14 = vld [vmem:[#allocation7 + $0x20] sm:$0xff] }
 0x634   :  { %5782 = vpow2.f32 %v1505_v18  ;;  %v1664_v21 = vpop.xlane.xlu1 %1663  ;;  %1009 = vadd.xlane.f32.xlu0 %v1008_v20  ;;  %v1770_v18 = vld [vmem:[#allocation5 + $0x48] sm:$0xff] }
 0x635   :  { %5784 = vpow2.f32 %v1343_v19  ;;  %v1665_v22 = vsub.f32 %v1659_v50, %v1664_v21 }
 0x636   :  { %v5779_v23 = vpop.eup %5778 }
 0x637   :  { %v1666_v24 = vmul.f32 1.442695, %v1665_v22  ;;  %v1184_v0 = vsel %vm517_vm4, %v5779_v23, 0.0 }
 0x638   :  { %1185 = vadd.xlane.f32.xlu1 %v1184_v0 }
 0x639   :  { %5786 = vpow2.f32 %v1666_v24  ;;  %v1772_v24 = vld [vmem:[#allocation5 + $0x58] sm:$0xff] }
 0x63b   :  { %v5781_v1 = vpop.eup %5780 }
 0x63c   :  { %v685_v26 = vsel %vm517_vm4, %v5781_v1, 0.0 }
 0x63d   :  { %686 = vadd.xlane.f32.xlu0 %v685_v26 }
 0x63e   :  { %v5783_v28 = vpop.eup %5782 }
 0x63f   :  { %v5785_v30 = vpop.eup %5784  ;;  %v1507_v31 = vsel %vm517_vm4, %v5783_v28, 0.0 }
 0x640   :  { %1508 = vadd.xlane.f32.xlu1 %v1507_v31  ;;  %v1345_v33 = vsel %vm517_vm4, %v5785_v30, 0.0 }
 0x641   :  { %1346 = vadd.xlane.f32.xlu0 %v1345_v33 }
 0x643   :  { %v5787_v34 = vpop.eup %5786 }
 0x644   :  { %v1668_v35 = vsel %vm517_vm4, %v5787_v34, 0.0 }
 0x645   :  { %1669 = vadd.xlane.f32.xlu0 %v1668_v35  ;;  %v1775_v35 = vld [vmem:[#allocation5 + $0x70] sm:$0xff] }
 0x651   :  { %852 = vrot.lane.b32.xlu1 %v6286_v27, %s6037_s20 }
 0x655   :  { %1512 = vrot.lane.b32.xlu1 %v6292_v29, %s6037_s20 }
 0x65b   :  { %1189 = vrot.lane.b32.xlu0 %v6292_v29, %s6040_s27 }
 0x6bd   :  { %v849_v37 = vpop.xlane.xlu1 %848 }
 0x6c1   :  { %v1010_v36 = vpop.xlane.xlu0 %1009 }
 0x6c5   :  { %v1186_v39 = vpop.xlane.xlu1 %1185 }
 0x6ca   :  { %v687_v38 = vpop.xlane.xlu0 %686 }
 0x6cb   :  { %5788 = vrcp.f32 %v687_v38 }
 0x6cc   :  { %5790 = vrcp.f32 %v849_v37 }
 0x6cd   :  { %5792 = vrcp.f32 %v1010_v36  ;;  %v1509_v40 = vpop.xlane.xlu1 %1508  ;;  %v1776_v36 = vld [vmem:[#allocation5 + $0x78] sm:$0xff] }
 0x6ce   :  { %v1347_v41 = vpop.xlane.xlu0 %1346  ;;  %5794 = vrcp.f32 %v1186_v39  ;;  %v5348_v38 = vpack.c.bf16 %v1776_v36, %v1775_v35  ;;  %v1896_v36 = vld [vmem:[#allocation7 + $0x98] sm:$0xff] }
 0x6cf   :  { %5796 = vrcp.f32 %v1347_v41 }
 0x6d0   :  { %5798 = vrcp.f32 %v1509_v40 }
 0x6d1   :  { %v853_v27 = vpop.permute.xlu1 %852 }
 0x6d2   :  { %v1670_v45 = vpop.xlane.xlu0 %1669 }
 0x6d3   :  { %5800 = vrcp.f32 %v1670_v45 }
 0x6d5   :  { %v5789_v42 = vpop.eup %5788  ;;  %v1513_v57 = vpop.permute.xlu1 %1512 }
 0x6d6   :  { %v689_v43 = vmul.f32 %v5789_v42, %v5781_v1  ;;  %v5791_v44 = vpop.eup %5790  ;;  %v1190_v50 = vpop.permute.xlu0 %1189 }
 0x6d7   :  { %v851_v29 = vmul.f32 %v5791_v44, %v5775_v9  ;;  %v5793_v46 = vpop.eup %5792  ;;  %v5324_v9 = vpack.c.bf16 %v1764_v7, %v1763_v4  ;;  %v1882_v7 = vld [vmem:[#allocation7 + $0x28] sm:$0xff] }
 0x6d8   :  { %4974 = vmatmul.mubr.msk.f32.vlgmr.msra.gmra.mrb[8].mxu1 %vm517_vm4, %v689_v43  ;;  %v1012_v48 = vmul.f32 %v5793_v46, %v5777_v17  ;;  %v5795_v49 = vpop.eup %5794  ;;  %v1769_v17 = vld [vmem:[#allocation5 + $0x40] sm:$0xff]  ;;  %v5352_v10 = vpack.c.bf16 %v1882_v7, %v1878_v6  ;;  %v1907_v6 = vld [vmem:[#allocation7 + $0xf0] sm:$0xff] }
 0x6d9   :  { %4982 = vmatpush3.msra.mxu1 %v853_v27  ;;  %4983 = vmatprep.mubr.msk.f32.mxu1 %vm6041_vm1, %v6039_v47  ;;  %v1188_v51 = vmul.f32 %v5795_v49, %v5779_v23  ;;  %v5797_v52 = vpop.eup %5796  ;;  %v5336_v19 = vpack.c.bf16 %v1770_v18, %v1769_v17  ;;  %v1771_v23 = vld [vmem:[#allocation5 + $0x50] sm:$0xff]  ;;  %v1886_v18 = vld [vmem:[#allocation7 + $0x48] sm:$0xff] }
 0x6da   :  { %4991 = vmatprep.subr.mxu1 %v6039_v47  ;;  %v1349_v53 = vmul.f32 %v5797_v52, %v5785_v30  ;;  %v5799_v54 = vpop.eup %5798  ;;  %5325 = vmatprep.subr.bf16.mxu0 %v5324_v9  ;;  %v5340_v1 = vpack.c.bf16 %v1772_v24, %v1771_v23  ;;  %v1774_v30 = vld [vmem:[#allocation5 + $0x68] sm:$0xff]  ;;  %v1883_v17 = vld [vmem:[#allocation7 + $0x30] sm:$0xff] }
 0x6db   :  { %v1511_v59 = vmul.f32 %v5799_v54, %v5783_v28  ;;  %5327 = vmatpush3.bf16.msra.mxu0 %v5324_v9  ;;  %v1773_v28 = vld [vmem:[#allocation5 + $0x60] sm:$0xff]  ;;  %v1880_v9 = vld [vmem:[#allocation7 + $0x18] sm:$0xff] }
 0x6dc   :  { %4984 = vmatmul.mubr.msk.f32.vlgmr.msra.gmra.mrb[10].mxu1 %vm517_vm4, %v851_v29  ;;  %5329 = vmatprep.subr.bf16.mxu0 %v5328_v13  ;;  %v5344_v33 = vpack.c.bf16 %v1774_v30, %v1773_v28  ;;  %v1891_v30 = vld [vmem:[#allocation7 + $0x70] sm:$0xff] }
 0x6dd   :  { %4992 = vmatpush3.msra.mxu1 %v853_v27  ;;  %4993 = vmatprep.mubr.msk.f32.mxu1 %vm6041_vm1, %v6039_v47  ;;  %v5801_v60 = vpop.eup %5800 }
 0x6de   :  { %5001 = vmatprep.subr.mxu1 %v6039_v47  ;;  %v1672_v62 = vmul.f32 %v5801_v60, %v5787_v34 }
 0x6df   :  { %5331 = vmatpush3.bf16.msra.mxu0 %v5328_v13  ;;  %v1877_v13 = vld [vmem:[#allocation7] sm:$0xff] }
 0x6e0   :  { %4994 = vmatmul.mubr.msk.f32.vlgmr.msra.gmra.mrb[12].mxu1 %vm517_vm4, %v1012_v48  ;;  %5333 = vmatprep.subr.bf16.mxu0 %v5332_v16  ;;  %v5354_v15 = vpack.c.bf16 %v1881_v14, %v1877_v13  ;;  %v1916_v14 = vld [vmem:[#allocation7 + $0x138] sm:$0xff] }
 0x6e1   :  { %5002 = vmatpush3.msra.mxu1 %v1190_v50  ;;  %5003 = vmatprep.mubr.msk.f32.mxu1 %vm6041_vm1, %v6039_v47 }
 0x6e2   :  { %5011 = vmatprep.subr.mxu1 %v6039_v47 }
 0x6e3   :  { %5335 = vmatpush3.bf16.msra.mxu0 %v5332_v16  ;;  %v1879_v16 = vld [vmem:[#allocation7 + $0x10] sm:$0xff] }
 0x6e4   :  { %5004 = vmatmul.mubr.msk.f32.vlgmr.msra.gmra.mrb[14].mxu1 %vm517_vm4, %v1188_v51  ;;  %5337 = vmatprep.subr.bf16.mxu0 %v5336_v19 }
 0x6e5   :  { %5012 = vmatpush3.msra.mxu1 %v1190_v50  ;;  %5013 = vmatprep.mubr.msk.f32.mxu1 %vm6041_vm1, %v6039_v47 }
 0x6e6   :  { %5021 = vmatprep.subr.mxu1 %v6039_v47 }
 0x6e7   :  { %5339 = vmatpush3.bf16.msra.mxu0 %v5336_v19  ;;  %v5386_v19 = vpack.c.bf16 %v1883_v17, %v1879_v16 }
 0x6e8   :  { %5014 = vmatmul.mubr.msk.f32.vlgmr.msra.gmra.mrb[16].mxu1 %vm517_vm4, %v1349_v53  ;;  %5341 = vmatprep.subr.bf16.mxu0 %v5340_v1 }
 0x6e9   :  { %5022 = vmatpush3.msra.mxu1 %v1513_v57  ;;  %5023 = vmatprep.mubr.msk.f32.mxu1 %vm6041_vm1, %v6039_v47 }
 0x6ea   :  { %5031 = vmatprep.subr.mxu1 %v6039_v47 }
 0x6eb   :  { %5343 = vmatpush3.bf16.msra.mxu0 %v5340_v1  ;;  %v1889_v1 = vld [vmem:[#allocation7 + $0x60] sm:$0xff] }
 0x6ec   :  { %5024 = vmatmul.mubr.msk.f32.vlgmr.msra.gmra.mrb[18].mxu1 %vm517_vm4, %v1511_v59  ;;  %5345 = vmatprep.subr.bf16.mxu0 %v5344_v33 }
 0x6ed   :  { %5032 = vmatpush3.msra.mxu1 %v1513_v57  ;;  %5033 = vmatprep.mubr.msk.f32.mxu1 %vm6041_vm1, %v6039_v47 }
 0x6ee   :  { %5353 = vmatprep.subr.bf16.mxu1 %v5352_v10  ;;  %v1914_v10 = vld [vmem:[#allocation7 + $0x128] sm:$0xff] }
 0x6ef   :  { %5347 = vmatpush3.bf16.msra.mxu0 %v5344_v33  ;;  %v1898_v33 = vld [vmem:[#allocation7 + $0xa8] sm:$0xff] }
 0x6f0   :  { %5034 = vmatmul.mubr.msk.f32.vlgmr.msra.gmra.mrb[20].mxu1 %vm517_vm4, %v1672_v62  ;;  %5349 = vmatprep.subr.bf16.mxu0 %v5348_v38 }
 0x6f1   :  { %2005 = vmatprep.mubr.f32.mxu1 %v6039_v47  ;;  %5355 = vmatpush1.bf16.msra.mxu1 %v5354_v15  ;;  %v1913_v15 = vld [vmem:[#allocation7 + $0x120] sm:$0xff] }
 0x6f3   :  { %5351 = vmatpush3.bf16.msra.mxu0 %v5348_v38  ;;  %v1893_v38 = vld [vmem:[#allocation7 + $0x80] sm:$0xff] }
 0x7ab   :  { %v759_v20 = vpop.f32.mrb[8].mxu1 }
 0x7ac   :  { %v4975_v21 = vpop.f32.mrb[9].mxu1 }
 0x7ad   :  { %v1888_v21 = vld [vmem:[#allocation7 + $0x58] sm:$0xff] }
 0x7af   :  { %v924_v22 = vpop.f32.mrb[10].mxu1 }
 0x7b0   :  { %v4985_v0 = vpop.f32.mrb[11].mxu1 }
 0x7b1   :  { %v1885_v0 = vld [vmem:[#allocation7 + $0x40] sm:$0xff] }
 0x7b2   :  { %v5358_v28 = vpack.c.bf16 %v1889_v1, %v1885_v0  ;;  %v1924_v0 = vld [vmem:[#allocation7 + $0x178] sm:$0xff]  ;;  %v1917_v1 = vld [vmem:[#allocation7 + $0x140] sm:$0xff] }
 0x7b3   :  { %v1082_v26 = vpop.f32.mrb[12].mxu1 }
 0x7b4   :  { %v4995_v31 = vpop.f32.mrb[13].mxu1 }
 0x7b5   :  { %v1894_v31 = vld [vmem:[#allocation7 + $0x88] sm:$0xff] }
 0x7b6   :  { %v5360_v35 = vpack.c.bf16 %v1898_v33, %v1894_v31  ;;  %v1919_v31 = vld [vmem:[#allocation7 + $0x150] sm:$0xff] }
 0x7b7   :  { %v1261_v34 = vpop.f32.mrb[14].mxu1  ;;  %v1923_v33 = vld [vmem:[#allocation7 + $0x170] sm:$0xff] }
 0x7b8   :  { %v5005_v37 = vpop.f32.mrb[15].mxu1 }
 0x7b9   :  { %v1900_v37 = vld [vmem:[#allocation7 + $0xb8] sm:$0xff] }
 0x7bb   :  { %v1419_v39 = vpop.f32.mrb[16].mxu1 }
 0x7bc   :  { %v5736_v40 = vpack.i.bf16 %v1419_v39, %v759_v20  ;;  %v5015_v41 = vpop.f32.mrb[17].mxu1  ;;  %v1890_v20 = vld [vmem:[#allocation7 + $0x68] sm:$0xff]  ;;  %v5392_v39 = vpack.c.bf16 %v1900_v37, %v1896_v36  ;;  %v1928_v37 = vld [vmem:[#allocation7 + $0x198] sm:$0xff] }
 0x7bd   :  { %v5356_v23 = vpack.c.bf16 %v1890_v20, %v1886_v18  ;;  %v1895_v41 = vld [vmem:[#allocation7 + $0x90] sm:$0xff]  ;;  %v1930_v36 = vld [vmem:[#allocation7 + $0x1a8] sm:$0xff] }
 0x7be   :  { %5737 = vrot.lane.b32.xlu1 %v5736_v40, %s6037_s20  ;;  %v1897_v40 = vld [vmem:[#allocation7 + $0xa0] sm:$0xff]  ;;  %v1911_v18 = vld [vmem:[#allocation7 + $0x110] sm:$0xff] }
 0x7bf   :  { %v1584_v42 = vpop.f32.mrb[18].mxu1  ;;  %5357 = vmatprep.subr.bf16.mxu1 %v5356_v23  ;;  %v1920_v23 = vld [vmem:[#allocation7 + $0x158] sm:$0xff] }
 0x7c0   :  { %v5741_v43 = vpack.i.bf16 %v1584_v42, %v924_v22  ;;  %v5025_v44 = vpop.f32.mrb[19].mxu1  ;;  %v1892_v22 = vld [vmem:[#allocation7 + $0x78] sm:$0xff]  ;;  %v1899_v42 = vld [vmem:[#allocation7 + $0xb0] sm:$0xff]  ;;  %5359 = vmatpush1.bf16.msra.mxu1 %v5358_v28  ;;  %v5404_v28 = vpack.c.bf16 %v1924_v0, %v1920_v23 }
 0x7c1   :  { %v5388_v24 = vpack.c.bf16 %v1892_v22, %v1888_v21  ;;  %5361 = vmatprep.subr.bf16.mxu1 %v5360_v35  ;;  %v5394_v44 = vpack.c.bf16 %v1899_v42, %v1895_v41  ;;  %v1918_v21 = vld [vmem:[#allocation7 + $0x148] sm:$0xff]  ;;  %v5406_v35 = vpack.c.bf16 %v1923_v33, %v1919_v31  ;;  %v1925_v41 = vld [vmem:[#allocation7 + $0x180] sm:$0xff]  ;;  %v2146_v0 = vld [vmem:[#allocation8 + $0x98] sm:$0xff] }
 0x7c2   :  { %5742 = vrot.lane.b32.xlu1 %v5741_v43, %s6040_s27  ;;  %v5362_v43 = vpack.c.bf16 %v1897_v40, %v1893_v38  ;;  %v1922_v22 = vld [vmem:[#allocation7 + $0x168] sm:$0xff]  ;;  %v1932_v38 = vld [vmem:[#allocation7 + $0x1b8] sm:$0xff]  ;;  %v1929_v42 = vld [vmem:[#allocation7 + $0x1a0] sm:$0xff] }
 0x7c3   :  { %v1742_v27 = vpop.f32.mrb[20].mxu1  ;;  %v5408_v40 = vpack.c.bf16 %v1932_v38, %v1928_v37  ;;  %v2147_v31 = vld [vmem:[#allocation8 + $0xa0] sm:$0xff]  ;;  %v2148_v33 = vld [vmem:[#allocation8 + $0xa8] sm:$0xff]  ;;  %v2149_v38 = vld [vmem:[#allocation8 + $0xb0] sm:$0xff] }
 0x7c4   :  { %v5746_v29 = vpack.i.bf16 %v1742_v27, %v1082_v26  ;;  %v5035_v45 = vpop.f32.mrb[21].mxu1  ;;  %v1887_v26 = vld [vmem:[#allocation7 + $0x50] sm:$0xff]  ;;  %5363 = vmatpush1.bf16.msra.mxu1 %v5362_v43 }
 0x7c5   :  { %v1927_v43 = vld [vmem:[#allocation7 + $0x190] sm:$0xff] }
 0x7c6   :  { %5747 = vrot.lane.b32.xlu0 %v5746_v29, %s6042_s11  ;;  %v5882_v29 = vld [vmem:[%s6704_s0 + $0x8] sm:$0xff] }
 0x830   :  { %v5738_v46 = vpop.permute.xlu1 %5737 }
 0x831   :  { %v5740_v49 = vunpack.i.h.bf16 %v5738_v46  ;;  %v5739_v50 = vunpack.i.l.bf16 %v5738_v46 }
 0x833   :  { %v1758_v54 = vsel %vm440_vm2, %v1261_v34, %v5740_v49  ;;  %v1098_v60 = vsel %vm440_vm2, %v6375_v32, %v5739_v50  ;;  %v5384_v32 = vpack.c.bf16 %v1884_v12, %v1880_v9  ;;  %v5390_v34 = vpack.c.bf16 %v1891_v30, %v1887_v26  ;;  %v1910_v9 = vld [vmem:[#allocation7 + $0x108] sm:$0xff]  ;;  %v1912_v12 = vld [vmem:[#allocation7 + $0x118] sm:$0xff]  ;;  %v1921_v26 = vld [vmem:[#allocation7 + $0x160] sm:$0xff] }
 0x834   :  { %v5743_v48 = vpop.permute.xlu1 %5742  ;;  %v5368_v13 = vpack.c.bf16 %v1914_v10, %v1910_v9  ;;  %v5400_v16 = vpack.c.bf16 %v1916_v14, %v1912_v12  ;;  %v5374_v30 = vpack.c.bf16 %v1921_v26, %v1917_v1  ;;  %v4630_v14 = vld [vmem:[%s6709_s5] ss:$0 sm:$0xff]  ;;  %v2129_v26 = vld [vmem:[#allocation8 + $0x10] sm:$0xff] }
 0x835   :  { %v5745_v51 = vunpack.i.h.bf16 %v5743_v48  ;;  %v5744_v52 = vunpack.i.l.bf16 %v5743_v48  ;;  %5385 = vmatprep.subr.bf16.mxu0 %v5384_v32  ;;  %v5883_v48 = vld [vmem:[%s6704_s0] sm:$0xff] }
 0x836   :  { %v1909_v32 = vld [vmem:[#allocation7 + $0x100] sm:$0xff] }
 0x837   :  { %v1099_v62 = vsel %vm354_vm0, %v1098_v60, %v5744_v52  ;;  %v1759_v63 = vsel %vm354_vm0, %v1758_v54, %v5745_v51  ;;  %v1902_v52 = vld [vmem:[#allocation7 + $0xc8] sm:$0xff]  ;;  %v1904_v54 = vld [vmem:[#allocation7 + $0xd8] sm:$0xff]  ;;  %v1901_v60 = vld [vmem:[#allocation7 + $0xc0] sm:$0xff]  ;;  %v5370_v17 = vpack.c.bf16 %v1913_v15, %v1909_v32 }
 0x838   :  { %v5748_v53 = vpop.permute.xlu0 %5747 }
 0x839   :  { %v5750_v57 = vunpack.i.h.bf16 %v5748_v53  ;;  %v5749_v59 = vunpack.i.l.bf16 %v5748_v53  ;;  %v1906_v53 = vld [vmem:[#allocation7 + $0xe8] sm:$0xff] }
 0x83b   :  { %v1101_v3 = vsel %vm1100_vm5, %v1099_v62, %v5749_v59  ;;  %v1760_v4 = vsel %vm1100_vm5, %v1759_v63, %v5750_v57  ;;  %v5364_v57 = vpack.c.bf16 %v1906_v53, %v1902_v52  ;;  %v1908_v59 = vld [vmem:[#allocation7 + $0xf8] sm:$0xff]  ;;  %v1905_v62 = vld [vmem:[#allocation7 + $0xe0] sm:$0xff] }
 0x83c   :  { %5068 = vmatprep.mubr.f32.mxu0 %v1101_v3  ;;  %v5396_v63 = vpack.c.bf16 %v1908_v59, %v1904_v54  ;;  %v5366_v3 = vpack.c.bf16 %v1905_v62, %v1901_v60  ;;  %v1940_v52 = vld [vmem:[#allocation7 + $0x1f8] sm:$0xff]  ;;  %v1933_v53 = vld [vmem:[#allocation7 + $0x1c0] sm:$0xff]  ;;  %v1935_v59 = vld [vmem:[#allocation7 + $0x1d0] sm:$0xff] }
 0x83d   :  { %5069 = vmatmul.mubr.f32.vlgmr.msra.gmra.mrb[18].mxu0 %v1760_v4  ;;  %v1903_v4 = vld [vmem:[#allocation7 + $0xd0] sm:$0xff]  ;;  %5365 = vmatprep.subr.bf16.mxu1 %v5364_v57  ;;  %v1937_v57 = vld [vmem:[#allocation7 + $0x1e0] sm:$0xff] }
 0x83e   :  { %2082 = vmatprep.mubr.f32.mxu0 %v6039_v47  ;;  %5387 = vmatpush1.bf16.msra.mxu0 %v5386_v19  ;;  %v5398_v7 = vpack.c.bf16 %v1907_v6, %v1903_v4  ;;  %v1915_v19 = vld [vmem:[#allocation7 + $0x130] sm:$0xff]  ;;  %v5382_v62 = vpack.c.bf16 %v1937_v57, %v1933_v53  ;;  %v2138_v57 = vld [vmem:[#allocation8 + $0x58] sm:$0xff] }
 0x83f   :  { %5389 = vmatprep.subr.bf16.mxu0 %v5388_v24  ;;  %5367 = vmatpush1.bf16.msra.mxu1 %v5366_v3  ;;  %v5402_v20 = vpack.c.bf16 %v1915_v19, %v1911_v18  ;;  %v5372_v24 = vpack.c.bf16 %v1922_v22, %v1918_v21  ;;  %v1939_v60 = vld [vmem:[#allocation7 + $0x1f0] sm:$0xff]  ;;  %v2143_v18 = vld [vmem:[#allocation8 + $0x80] sm:$0xff]  ;;  %v2144_v19 = vld [vmem:[#allocation8 + $0x88] sm:$0xff] }
 0x840   :  { %5369 = vmatprep.subr.bf16.mxu1 %v5368_v13  ;;  %v2127_v21 = vld [vmem:[#allocation8] sm:$0xff]  ;;  %v2128_v22 = vld [vmem:[#allocation8 + $0x8] sm:$0xff] }
 0x841   :  { %v5418_v23 = vpack.c.bf16 %v2128_v22, %v2127_v21 }
 0x842   :  { %5391 = vmatpush1.bf16.msra.mxu0 %v5390_v34  ;;  %v1926_v34 = vld [vmem:[#allocation7 + $0x188] sm:$0xff] }
 0x843   :  { %5393 = vmatprep.subr.bf16.mxu0 %v5392_v39  ;;  %5371 = vmatpush1.bf16.msra.mxu1 %v5370_v17  ;;  %v5376_v39 = vpack.c.bf16 %v1930_v36, %v1926_v34  ;;  %v5424_v34 = vpack.c.bf16 %v2148_v33, %v2147_v31  ;;  %v2132_v36 = vld [vmem:[#allocation8 + $0x28] sm:$0xff] }
 0x844   :  { %5373 = vmatprep.subr.bf16.mxu1 %v5372_v24  ;;  %v2145_v24 = vld [vmem:[#allocation8 + $0x90] sm:$0xff] }
 0x845   :  { %v5420_v1 = vpack.c.bf16 %v2146_v0, %v2145_v24 }
 0x846   :  { %5395 = vmatpush1.bf16.msra.mxu0 %v5394_v44  ;;  %v5378_v44 = vpack.c.bf16 %v1929_v42, %v1925_v41  ;;  %v2133_v41 = vld [vmem:[#allocation8 + $0x30] sm:$0xff]  ;;  %v2134_v42 = vld [vmem:[#allocation8 + $0x38] sm:$0xff] }
 0x847   :  { %5397 = vmatprep.subr.bf16.mxu0 %v5396_v63  ;;  %5375 = vmatpush1.bf16.msra.mxu1 %v5374_v30  ;;  %v5414_v63 = vpack.c.bf16 %v1939_v60, %v1935_v59  ;;  %v2155_v60 = vld [vmem:[#allocation8 + $0xe0] sm:$0xff] }
 0x848   :  { %5377 = vmatprep.subr.bf16.mxu1 %v5376_v39  ;;  %v2150_v39 = vld [vmem:[#allocation8 + $0xb8] sm:$0xff] }
 0x84a   :  { %5399 = vmatpush1.bf16.msra.mxu0 %v5398_v7 }
 0x84b   :  { %5401 = vmatprep.subr.bf16.mxu0 %v5400_v16  ;;  %5379 = vmatpush1.bf16.msra.mxu1 %v5378_v44  ;;  %v2151_v44 = vld [vmem:[#allocation8 + $0xc0] sm:$0xff] }
 0x84e   :  { %5403 = vmatpush1.bf16.msra.mxu0 %v5402_v20  ;;  %v5416_v20 = vpack.c.bf16 %v2144_v19, %v2143_v18 }
 0x84f   :  { %5405 = vmatprep.subr.bf16.mxu0 %v5404_v28  ;;  %v2130_v28 = vld [vmem:[#allocation8 + $0x18] sm:$0xff] }
 0x850   :  { %v5422_v30 = vpack.c.bf16 %v2130_v28, %v2129_v26 }
 0x852   :  { %5407 = vmatpush1.bf16.msra.mxu0 %v5406_v35  ;;  %v2131_v35 = vld [vmem:[#allocation8 + $0x20] sm:$0xff] }
 0x853   :  { %5409 = vmatprep.subr.bf16.mxu0 %v5408_v40  ;;  %v5426_v37 = vpack.c.bf16 %v2132_v36, %v2131_v35  ;;  %v5428_v40 = vpack.c.bf16 %v2150_v39, %v2149_v38 }
 0x910   :  { %v5070_v27 = vpop.f32.mrb[18].mxu0 }
 0x911   :  { %v6438_v45 = vadd.f32 %v5882_v29, %v5070_v27  ;;  %v1843_v46 = vpop.f32.mrb[19].mxu0  ;;  %v1931_v27 = vld [vmem:[#allocation7 + $0x1b0] sm:$0xff]  ;;  %v1934_v29 = vld [vmem:[#allocation7 + $0x1c8] sm:$0xff] }
 0x912   :  { %v6443_v49 = vadd.f32 %v5883_v48, %v1843_v46  ;;  %v1938_v46 = vld [vmem:[#allocation7 + $0x1e8] sm:$0xff]  ;;  %v5410_v48 = vpack.c.bf16 %v1931_v27, %v1927_v43  ;;  %v5430_v43 = vpack.c.bf16 %v2134_v42, %v2133_v41 }
 0x913   :  { %v1856_v50 = vmul.f32 %v6438_v45, %v6438_v45  ;;  %v2152_v27 = vld [vmem:[#allocation8 + $0xc8] sm:$0xff] }
 0x914   :  { %v1855_v51 = vmul.f32 %v6443_v49, %v6443_v49  ;;  %5411 = vmatpush1.bf16.msra.mxu0 %v5410_v48  ;;  %v2136_v48 = vld [vmem:[#allocation8 + $0x48] sm:$0xff] }
 0x915   :  { %1859 = vadd.xlane.f32.xlu0 %v1856_v50  ;;  %v5380_v50 = vpack.c.bf16 %v1938_v46, %v1934_v29  ;;  %v5432_v29 = vpack.c.bf16 %v2152_v27, %v2151_v44  ;;  %v2135_v46 = vld [vmem:[#allocation8 + $0x40] sm:$0xff] }
 0x916   :  { %1857 = vadd.xlane.f32.xlu1 %v1855_v51  ;;  %v1936_v51 = vld [vmem:[#allocation7 + $0x1d8] sm:$0xff] }
 0x917   :  { %v5412_v54 = vpack.c.bf16 %v1940_v52, %v1936_v51  ;;  %5381 = vmatprep.subr.bf16.mxu1 %v5380_v50  ;;  %v5434_v50 = vpack.c.bf16 %v2136_v48, %v2135_v46  ;;  %v2153_v51 = vld [vmem:[#allocation8 + $0xd0] sm:$0xff]  ;;  %v2154_v52 = vld [vmem:[#allocation8 + $0xd8] sm:$0xff]  ;;  %v2262_v48 = vld [vmem:[#allocation2 + $0x108] sm:$0xff] }
 0x918   :  { %5383 = vmatpush1.bf16.msra.mxu1 %v5382_v62  ;;  %v5436_v53 = vpack.c.bf16 %v2154_v52, %v2153_v51  ;;  %v2156_v62 = vld [vmem:[#allocation8 + $0xe8] sm:$0xff]  ;;  %v2261_v51 = vld [vmem:[#allocation2 + $0x100] sm:$0xff] }
 0x919   :  { %5413 = vmatprep.subr.bf16.mxu0 %v5412_v54  ;;  %5417 = vmatprep.subr.bf16.mxu1 %v5416_v20  ;;  %v2137_v54 = vld [vmem:[#allocation8 + $0x50] sm:$0xff] }
 0x91a   :  { %5415 = vmatpush1.bf16.msra.mxu0 %v5414_v63  ;;  %v5438_v59 = vpack.c.bf16 %v2138_v57, %v2137_v54  ;;  %v5440_v63 = vpack.c.bf16 %v2156_v62, %v2155_v60  ;;  %v2268_v54 = vld [vmem:[#allocation2 + $0x138] sm:$0xff]  ;;  %v2267_v60 = vld [vmem:[#allocation2 + $0x130] sm:$0xff]  ;;  %v2270_v62 = vld [vmem:[#allocation2 + $0x148] sm:$0xff] }
 0x9a2   :  { %v1860_v3 = vpop.xlane.xlu0 %1859 }
 0x9a3   :  { %v1862_v4 = vmul.f32 0.0078125, %v1860_v3  ;;  %v1858_v6 = vpop.xlane.xlu1 %1857  ;;  %v2139_v3 = vld [vmem:[#allocation8 + $0x60] sm:$0xff] }
 0x9a4   :  { %v1861_v7 = vmul.f32 0.0078125, %v1858_v6 }
 0x9a5   :  { %v1864_v9 = vadd.f32 1e-05, %v1862_v4  ;;  %v2140_v4 = vld [vmem:[#allocation8 + $0x68] sm:$0xff] }
 0x9a6   :  { %v1863_v10 = vadd.f32 1e-05, %v1861_v7  ;;  %v5442_v6 = vpack.c.bf16 %v2140_v4, %v2139_v3  ;;  %v2157_v7 = vld [vmem:[#allocation8 + $0xf0] sm:$0xff]  ;;  %v2269_v3 = vld [vmem:[#allocation2 + $0x140] sm:$0xff] }
 0x9a7   :  { %5802 = vrsqrt.f32 %v1864_v9  ;;  %v2158_v9 = vld [vmem:[#allocation8 + $0xf8] sm:$0xff]  ;;  %v2271_v4 = vld [vmem:[#allocation2 + $0x150] sm:$0xff] }
 0x9a8   :  { %5804 = vrsqrt.f32 %v1863_v10  ;;  %v5444_v10 = vpack.c.bf16 %v2158_v9, %v2157_v7  ;;  %v2276_v7 = vld [vmem:[#allocation2 + $0x178] sm:$0xff]  ;;  %v5458_v9 = vpack.c.bf16 %v2271_v4, %v2269_v3  ;;  %v5885_v4 = vld [vmem:[%s6706_s2 + $0x8] sm:$0xff] }
 0x9b1   :  { %v5803_v12 = vpop.eup %5802 }
 0x9b2   :  { %v5805_v13 = vpop.eup %5804  ;;  %v1868_v16 = vmul.f32 %v5803_v12, %v6438_v45  ;;  %v2141_v12 = vld [vmem:[#allocation8 + $0x70] sm:$0xff] }
 0x9b3   :  { %v1867_v32 = vmul.f32 %v5805_v13, %v6443_v49  ;;  %v2142_v13 = vld [vmem:[#allocation8 + $0x78] sm:$0xff] }
 0x9b4   :  { %v1876_v17 = vmul.f32 %v4630_v14, %v1868_v16 }
 0x9b5   :  { %v1875_v15 = vmul.f32 %v4630_v14, %v1867_v32  ;;  %v5446_v14 = vpack.c.bf16 %v2142_v13, %v2141_v12 }
 0x9b7   :  { %2006 = vmatmul.mubr.f32.vlgmr.msra.gmra.mrb[22].mxu1 %v1875_v15  ;;  %2083 = vmatmul.mubr.f32.vlgmr.msra.gmra.mrb[20].mxu0 %v1875_v15 }
 0x9b8   :  { %2011 = vmatprep.mubr.f32.mxu1 %v6039_v47  ;;  %2088 = vmatprep.mubr.f32.mxu0 %v6039_v47 }
 0x9b9   :  { %5419 = vmatpush3.bf16.msra.mxu1 %v5418_v23 }
 0x9ba   :  { %5421 = vmatprep.subr.bf16.mxu1 %v5420_v1 }
 0x9bb   :  { %2012 = vmatmul.mubr.f32.gmra.mrb[24].mxu1 %v1876_v17  ;;  %2089 = vmatmul.mubr.f32.gmra.mrb[22].mxu0 %v1876_v17 }
 0x9bc   :  { %2357 = vmatprep.mubr.f32.mxu0 %v6039_v47 }
 0x9bd   :  { %5423 = vmatpush3.bf16.msra.mxu1 %v5422_v30 }
 0x9be   :  { %5425 = vmatprep.subr.bf16.mxu1 %v5424_v34 }
 0x9c1   :  { %5427 = vmatpush3.bf16.msra.mxu1 %v5426_v37 }
 0x9c2   :  { %5429 = vmatprep.subr.bf16.mxu1 %v5428_v40 }
 0x9c5   :  { %5431 = vmatpush3.bf16.msra.mxu1 %v5430_v43 }
 0x9c6   :  { %5433 = vmatprep.subr.bf16.mxu1 %v5432_v29 }
 0x9c9   :  { %5435 = vmatpush3.bf16.msra.mxu1 %v5434_v50  ;;  %v2264_v50 = vld [vmem:[#allocation2 + $0x118] sm:$0xff] }
 0x9ca   :  { %5437 = vmatprep.subr.bf16.mxu1 %v5436_v53  ;;  %v5448_v52 = vpack.c.bf16 %v2264_v50, %v2262_v48  ;;  %v2263_v53 = vld [vmem:[#allocation2 + $0x110] sm:$0xff] }
 0x9cb   :  { %v5450_v57 = vpack.c.bf16 %v2263_v53, %v2261_v51 }
 0x9cc   :  { %5449 = vmatprep.subr.bf16.mxu0 %v5448_v52 }
 0x9cd   :  { %5439 = vmatpush3.bf16.msra.mxu1 %v5438_v59  ;;  %5451 = vmatpush1.bf16.msra.mxu0 %v5450_v57  ;;  %v4636_v57 = vld [vmem:[%s6708_s4 + $0x1] ss:$0 sm:$0xff] }
 0x9ce   :  { %5441 = vmatprep.subr.bf16.mxu1 %v5440_v63 }
 0x9d1   :  { %5443 = vmatpush3.bf16.msra.mxu1 %v5442_v6  ;;  %v2274_v6 = vld [vmem:[#allocation2 + $0x168] sm:$0xff] }
 0x9d2   :  { %5445 = vmatprep.subr.bf16.mxu1 %v5444_v10  ;;  %v5460_v10 = vpack.c.bf16 %v2276_v7, %v2274_v6 }
 0x9d5   :  { %5447 = vmatpush3.bf16.msra.mxu1 %v5446_v14 }
 0x9d6   :  { %5481 = vmatprep.subr.bf16.mxu1 %v6199_v56 }
 0xa8a   :  { %v2007_v32 = vpop.f32.mrb[22].mxu1  ;;  %v2084_v15 = vpop.f32.mrb[20].mxu0 }
 0xa8b   :  { %v4631_v16 = vmul.f32 -1.442695, %v2007_v32  ;;  %v2009_v17 = vpop.f32.mrb[23].mxu1  ;;  %v2086_v18 = vpop.f32.mrb[21].mxu0 }
 0xa8c   :  { %v4632_v19 = vmul.f32 -1.442695, %v2009_v17 }
 0xa8d   :  { %5806 = vpow2.f32 %v4631_v16 }
 0xa8e   :  { %5808 = vpow2.f32 %v4632_v19  ;;  %v2013_v20 = vpop.f32.mrb[24].mxu1  ;;  %v2090_v21 = vpop.f32.mrb[22].mxu0 }
 0xa8f   :  { %v4633_v22 = vmul.f32 -1.442695, %v2013_v20  ;;  %v2015_v23 = vpop.f32.mrb[25].mxu1  ;;  %v2092_v24 = vpop.f32.mrb[23].mxu0 }
 0xa90   :  { %v4634_v0 = vmul.f32 -1.442695, %v2015_v23 }
 0xa91   :  { %5810 = vpow2.f32 %v4633_v22  ;;  %v2275_v22 = vld [vmem:[#allocation2 + $0x170] sm:$0xff] }
 0xa92   :  { %5812 = vpow2.f32 %v4634_v0 }
 0xa97   :  { %v5807_v1 = vpop.eup %5806 }
 0xa98   :  { %v5809_v26 = vpop.eup %5808  ;;  %v2107_v28 = vadd.f32 1.0, %v5807_v1  ;;  %v2277_v1 = vld [vmem:[#allocation2 + $0x180] sm:$0xff] }
 0xa99   :  { %v2108_v30 = vadd.f32 1.0, %v5809_v26  ;;  %v2279_v26 = vld [vmem:[#allocation2 + $0x190] sm:$0xff] }
 0xa9a   :  { %5814 = vrcp.f32 %v2107_v28  ;;  %v5466_v28 = vpack.c.bf16 %v2279_v26, %v2277_v1 }
 0xa9b   :  { %v5811_v31 = vpop.eup %5810  ;;  %5816 = vrcp.f32 %v2108_v30  ;;  %v2282_v30 = vld [vmem:[#allocation2 + $0x1a8] sm:$0xff] }
 0xa9c   :  { %v5813_v33 = vpop.eup %5812  ;;  %v2109_v34 = vadd.f32 1.0, %v5811_v31 }
 0xa9d   :  { %v2110_v35 = vadd.f32 1.0, %v5813_v33  ;;  %v2281_v33 = vld [vmem:[#allocation2 + $0x1a0] sm:$0xff] }
 0xa9e   :  { %5818 = vrcp.f32 %v2109_v34  ;;  %v2283_v34 = vld [vmem:[#allocation2 + $0x1b0] sm:$0xff] }
 0xa9f   :  { %5820 = vrcp.f32 %v2110_v35  ;;  %v5470_v35 = vpack.c.bf16 %v2283_v34, %v2281_v33 }
 0xaa4   :  { %v5815_v36 = vpop.eup %5814 }
 0xaa5   :  { %v5817_v37 = vpop.eup %5816  ;;  %v2119_v38 = vmul.f32 %v5815_v36, %v2007_v32  ;;  %v2286_v36 = vld [vmem:[#allocation2 + $0x1c8] sm:$0xff] }
 0xaa6   :  { %v2120_v39 = vmul.f32 %v5817_v37, %v2009_v17  ;;  %v2288_v37 = vld [vmem:[#allocation2 + $0x1d8] sm:$0xff] }
 0xaa7   :  { %v2123_v40 = vmul.f32 %v2119_v38, %v2084_v15  ;;  %v5472_v38 = vpack.c.bf16 %v2288_v37, %v2286_v36 }
 0xaa8   :  { %v5819_v41 = vpop.eup %5818  ;;  %v2124_v42 = vmul.f32 %v2120_v39, %v2086_v18  ;;  %v2285_v39 = vld [vmem:[#allocation2 + $0x1c0] sm:$0xff] }
 0xaa9   :  { %v5821_v43 = vpop.eup %5820  ;;  %v2121_v44 = vmul.f32 %v5819_v41, %v2013_v20 }
 0xaaa   :  { %v2122_v27 = vmul.f32 %v5821_v43, %v2015_v23  ;;  %2223 = vmatprep.mubr.f32.mxu1 %v2124_v42  ;;  %v2290_v42 = vld [vmem:[#allocation2 + $0x1e8] sm:$0xff]  ;;  %v2292_v43 = vld [vmem:[#allocation2 + $0x1f8] sm:$0xff] }
 0xaab   :  { %v2125_v29 = vmul.f32 %v2121_v44, %v2090_v21  ;;  %2224 = vmatmul.mubr.f32.vlgmr.msra.gmra.mrb[26].mxu1 %v2123_v40  ;;  %v2273_v21 = vld [vmem:[#allocation2 + $0x160] sm:$0xff]  ;;  %v2287_v40 = vld [vmem:[#allocation2 + $0x1d0] sm:$0xff]  ;;  %v5476_v44 = vpack.c.bf16 %v2292_v43, %v2290_v42 }
 0xaac   :  { %v2126_v46 = vmul.f32 %v2122_v27, %v2092_v24  ;;  %5483 = vmatpush3.bf16.msra.mxu1 %v6199_v56  ;;  %v5462_v23 = vpack.c.bf16 %v2275_v22, %v2273_v21  ;;  %v2280_v24 = vld [vmem:[#allocation2 + $0x198] sm:$0xff]  ;;  %v5474_v41 = vpack.c.bf16 %v2287_v40, %v2285_v39  ;;  %v2289_v27 = vld [vmem:[#allocation2 + $0x1e0] sm:$0xff] }
 0xaad   :  { %5485 = vmatprep.subr.bf16.mxu1 %v6204_v58 }
 0xaae   :  { %2228 = vmatprep.mubr.f32.mxu1 %v2126_v46 }
 0xaaf   :  { %2229 = vmatmul.mubr.f32.gmra.mrb[28].mxu1 %v2125_v29  ;;  %v2291_v29 = vld [vmem:[#allocation2 + $0x1f0] sm:$0xff] }
 0xab0   :  { %5487 = vmatpush3.bf16.msra.mxu1 %v6204_v58  ;;  %v5478_v46 = vpack.c.bf16 %v2291_v29, %v2289_v27 }
 0xab1   :  { %5489 = vmatprep.subr.bf16.mxu1 %v6216_v61 }
 0xab4   :  { %5491 = vmatpush3.bf16.msra.mxu1 %v6216_v61 }
 0xab5   :  { %5493 = vmatprep.subr.bf16.mxu1 %v6226_v2 }
 0xab8   :  { %5495 = vmatpush3.bf16.msra.mxu1 %v6226_v2 }
 0xab9   :  { %5497 = vmatprep.subr.bf16.mxu1 %v6236_v5 }
 0xabc   :  { %5499 = vmatpush3.bf16.msra.mxu1 %v6236_v5  ;;  %v2266_v5 = vld [vmem:[#allocation2 + $0x128] sm:$0xff] }
 0xabd   :  { %5501 = vmatprep.subr.bf16.mxu1 %v6246_v8  ;;  %v5452_v59 = vpack.c.bf16 %v2268_v54, %v2266_v5 }
 0xabf   :  { %5453 = vmatprep.subr.bf16.mxu0 %v5452_v59 }
 0xac0   :  { %5503 = vmatpush3.bf16.msra.mxu1 %v6246_v8  ;;  %v2265_v8 = vld [vmem:[#allocation2 + $0x120] sm:$0xff] }
 0xac1   :  { %5505 = vmatprep.subr.bf16.mxu1 %v6256_v11  ;;  %v5454_v63 = vpack.c.bf16 %v2267_v60, %v2265_v8 }
 0xac3   :  { %5455 = vmatpush1.bf16.msra.mxu0 %v5454_v63 }
 0xac4   :  { %5507 = vmatpush3.bf16.msra.mxu1 %v6256_v11  ;;  %v2272_v11 = vld [vmem:[#allocation2 + $0x158] sm:$0xff] }
 0xac5   :  { %5509 = vmatprep.subr.bf16.mxu1 %v6281_v25 }
 0xac8   :  { %5511 = vmatpush3.bf16.msra.mxu1 %v6281_v25  ;;  %v5456_v25 = vpack.c.bf16 %v2272_v11, %v2270_v62 }
 0xac9   :  { %5125 = vmatprep.subr.mxu1 %v6039_v47 }
 0xaca   :  { %5457 = vmatprep.subr.bf16.mxu0 %v5456_v25 }
 0xacb   :  { %5459 = vmatpush1.bf16.msra.mxu0 %v5458_v9 }
 0xacc   :  { %5461 = vmatprep.subr.bf16.mxu0 %v5460_v10  ;;  %v5886_v10 = vld [vmem:[%s6705_s1] sm:$0xff] }
 0xacf   :  { %5463 = vmatpush1.bf16.msra.mxu0 %v5462_v23 }
 0xb7e   :  { %v4780_v12 = vpop.f32.mrb[26].mxu1 }
 0xb7f   :  { %v4781_v13 = vpop.f32.mrb[27].mxu1 }
 0xb80   :  { %v4782_v14 = vadd.f32 %v4781_v13, %v4780_v12  ;;  %v5887_v13 = vld [vmem:[%s6706_s2] sm:$0xff] }
 0xb82   :  { %v6475_v32 = vadd.f32 %v4782_v14, %v6443_v49  ;;  %v4783_v15 = vpop.f32.mrb[28].mxu1  ;;  %v2278_v49 = vld [vmem:[#allocation2 + $0x188] sm:$0xff] }
 0xb83   :  { %v4784_v16 = vpop.f32.mrb[29].mxu1  ;;  %v5464_v0 = vpack.c.bf16 %v2280_v24, %v2278_v49 }
 0xb84   :  { %v4785_v17 = vadd.f32 %v4784_v16, %v4783_v15  ;;  %v2238_v18 = vmul.f32 %v6475_v32, %v6475_v32 }
 0xb85   :  { %5465 = vmatprep.subr.bf16.mxu0 %v5464_v0 }
 0xb86   :  { %v6480_v19 = vadd.f32 %v4785_v17, %v6438_v45  ;;  %2240 = vadd.xlane.f32.xlu0 %v2238_v18  ;;  %5467 = vmatpush1.bf16.msra.mxu0 %v5466_v28  ;;  %v2284_v45 = vld [vmem:[#allocation2 + $0x1b8] sm:$0xff] }
 0xb87   :  { %v5468_v31 = vpack.c.bf16 %v2284_v45, %v2282_v30 }
 0xb88   :  { %v2239_v20 = vmul.f32 %v6480_v19, %v6480_v19 }
 0xb89   :  { %5469 = vmatprep.subr.bf16.mxu0 %v5468_v31 }
 0xb8a   :  { %2242 = vadd.xlane.f32.xlu0 %v2239_v20  ;;  %5471 = vmatpush1.bf16.msra.mxu0 %v5470_v35 }
 0xb8b   :  { %5473 = vmatprep.subr.bf16.mxu0 %v5472_v38 }
 0xb8e   :  { %5475 = vmatpush1.bf16.msra.mxu0 %v5474_v41 }
 0xb8f   :  { %5477 = vmatprep.subr.bf16.mxu0 %v5476_v44 }
 0xb92   :  { %5479 = vmatpush1.bf16.msra.mxu0 %v5478_v46 }
 0xb93   :  { %5513 = vmatprep.subr.bf16.mxu0 %v6199_v56 }
 0xc13   :  { %v2241_v48 = vpop.xlane.xlu0 %2240 }
 0xc14   :  { %v2244_v50 = vmul.f32 0.0078125, %v2241_v48 }
 0xc16   :  { %v2246_v51 = vadd.f32 1e-05, %v2244_v50 }
 0xc17   :  { %v2243_v52 = vpop.xlane.xlu0 %2242 }
 0xc18   :  { %5822 = vrsqrt.f32 %v2246_v51  ;;  %v2245_v53 = vmul.f32 0.0078125, %v2243_v52 }
 0xc1a   :  { %v2247_v5 = vadd.f32 1e-05, %v2245_v53 }
 0xc1c   :  { %5824 = vrsqrt.f32 %v2247_v5 }
 0xc22   :  { %v5823_v54 = vpop.eup %5822 }
 0xc23   :  { %v2250_v59 = vmul.f32 %v5823_v54, %v6475_v32 }
 0xc25   :  { %v2258_v8 = vmul.f32 %v4636_v57, %v2250_v59 }
 0xc26   :  { %v5825_v60 = vpop.eup %5824 }
 0xc27   :  { %2358 = vmatmul.mubr.f32.vlgmr.msra.gmra.mrb[24].mxu0 %v2258_v8  ;;  %v2251_v62 = vmul.f32 %v5825_v60, %v6480_v19 }
 0xc28   :  { %2363 = vmatprep.mubr.f32.mxu0 %v6039_v47  ;;  %5515 = vmatpush3.bf16.msra.mxu0 %v6199_v56 }
 0xc29   :  { %v2259_v11 = vmul.f32 %v4636_v57, %v2251_v62  ;;  %5517 = vmatprep.subr.bf16.mxu0 %v6204_v58 }
 0xc2b   :  { %2364 = vmatmul.mubr.f32.gmra.mrb[26].mxu0 %v2259_v11 }
 0xc2c   :  { %5519 = vmatpush3.bf16.msra.mxu0 %v6204_v58 }
 0xc2d   :  { %5521 = vmatprep.subr.bf16.mxu0 %v6216_v61 }
 0xc30   :  { %5523 = vmatpush3.bf16.msra.mxu0 %v6216_v61  ;;  %v5884_v61 = vld [vmem:[%s6705_s1 + $0x8] sm:$0xff] }
 0xc31   :  { %5525 = vmatprep.subr.bf16.mxu0 %v6226_v2 }
 0xc34   :  { %5527 = vmatpush3.bf16.msra.mxu0 %v6226_v2 }
 0xc35   :  { %5145 = vmatprep.subr.mxu0 %v6039_v47 }
 0xcfa   :  { %v2359_v63 = vpop.f32.mrb[24].mxu0 }
 0xcfb   :  { %v6499_v25 = vpop.f32.mrb[25].mxu0  ;;  %5103 = vmatprep.mubr.f32.mxu1 %v2359_v63  ;;  %v2370_v12 = vmul.f32 %v5886_v10, %v2359_v63 }
 0xcfc   :  { %5122 = vmatprep.mubr.msk.f32.mxu0 %vm354_vm0, %v6499_v25  ;;  %v2451_v20 = vmul.f32 %v5886_v10, %v6499_v25 }
 0xcfe   :  { %v2365_v56 = vpop.f32.mrb[26].mxu0 }
 0xcff   :  { %v6503_v3 = vpop.f32.mrb[27].mxu0  ;;  %5104 = vmatmul.mubr.f32.vlgmr.msra.gmra.mrb[30].mxu1 %v2365_v56  ;;  %v2371_v2 = vmul.f32 %v5884_v61, %v2365_v56 }
 0xd00   :  { %5123 = vmatmul.mubr.msk.f32.vlgmr.msra.gmra.mrb[28].mxu0 %vm354_vm0, %v6503_v3  ;;  %5127 = vmatprep.mubr.msk.f32.mxu1 %vm6041_vm1, %v6039_v47  ;;  %v2452_v15 = vmul.f32 %v5884_v61, %v6503_v3 }
 0xd01   :  { %5147 = vmatprep.mubr.msk.f32.mxu0 %vm6041_vm1, %v6039_v47 }
 0xdd2   :  { %v5105_v58 = vpop.f32.mrb[30].mxu1 }
 0xdd3   :  { %v2448_v6 = vmul.f32 %v5885_v4, %v5105_v58  ;;  %v2438_v7 = vpop.f32.mrb[31].mxu1  ;;  %v5124_v9 = vpop.f32.mrb[28].mxu0 }
 0xdd4   :  { %v2447_v14 = vmul.f32 %v5887_v13, %v2438_v7  ;;  %v2535_v16 = vmul.f32 %v5885_v4, %v5124_v9  ;;  %v2525_v17 = vpop.f32.mrb[29].mxu0 }
 0xdd5   :  { %v2450_v18 = vadd.f32 %v2448_v6, %v2371_v2  ;;  %v2534_v21 = vmul.f32 %v5887_v13, %v2525_v17 }
 0xdd6   :  { %v2449_v22 = vadd.f32 %v2447_v14, %v2370_v12  ;;  %v2537_v23 = vadd.f32 %v2535_v16, %v2452_v15 }
 0xdd7   :  { %v2536_v49 = vadd.f32 %v2534_v21, %v2451_v20 }
 0xdd9   :  { %5126 = vmatpush3.xpose.msk.msra.mxu1 %vm440_vm2, %v2536_v49 }
 0xdda   :  { %5130 = vmatprep.subr.mxu1 %v6039_v47 }
 0xddc   :  { %5128 = vmatmul.mubr.msk.f32.vlgmr.msra.gmra.mrb[32].mxu1 %vm440_vm2, %v2449_v22 }
 0xddd   :  { %5132 = vmatprep.mubr.msk.f32.mxu1 %vm6041_vm1, %v6039_v47 }
 0xeaf   :  { %v2610_v24 = vpop.f32.mrb[32].mxu1 }
 0xeb0   :  { %v2611_v0 = vadd.f32 %v2610_v24, %v6324_v55  ;;  %v5129_v1 = vpop.f32.mrb[33].mxu1 }
 0xeb2   :  { %v2614_v26 = vsel %vm517_vm4, %v2611_v0, -inf }
 0xeb3   :  { %2615 = vmax.xlane.f32.xlu1 %v2614_v26 }
 0xec4   :  { %2625 = vrot.lane.b32.xlu1 %v6499_v25, %s6040_s27 }
 0xec8   :  { %2861 = vrot.lane.b32.xlu1 %v2536_v49, %s6042_s11 }
 0xecc   :  { %2859 = vrot.lane.b32.xlu1 %v2449_v22, %s6040_s27 }
 0xed0   :  { %3024 = vrot.lane.b32.xlu1 %v2449_v22, %s6037_s20 }
 0xed4   :  { %3520 = vrot.lane.b32.xlu1 %v2537_v23, %s6042_s11 }
 0xed8   :  { %3683 = vrot.lane.b32.xlu1 %v2450_v18, %s6037_s20 }
 0xf40   :  { %v2616_v28 = vpop.xlane.xlu1 %2615 }
 0xf41   :  { %v2617_v30 = vsub.f32 %v2611_v0, %v2616_v28 }
 0xf43   :  { %v2618_v45 = vmul.f32 1.442695, %v2617_v30 }
 0xf44   :  { %v2626_v31 = vpop.permute.xlu1 %2625 }
 0xf45   :  { %5826 = vpow2.f32 %v2618_v45  ;;  %5131 = vmatpush3.msra.mxu1 %v2626_v31 }
 0xf46   :  { %5135 = vmatprep.subr.mxu1 %v6039_v47 }
 0xf48   :  { %v2862_v33 = vpop.permute.xlu1 %2861 }
 0xf49   :  { %5146 = vmatpush3.xpose.msk.msra.mxu0 %vm440_vm2, %v2862_v33 }
 0xf4a   :  { %5155 = vmatprep.subr.mxu0 %v6039_v47 }
 0xf4c   :  { %v2860_v34 = vpop.permute.xlu1 %2859 }
 0xf4d   :  { %5148 = vmatmul.mubr.msk.f32.vlgmr.msra.gmra.mrb[30].mxu0 %vm440_vm2, %v2860_v34 }
 0xf4e   :  { %5156 = vmatpush3.xpose.msk.msra.mxu0 %vm440_vm2, %v2862_v33  ;;  %5157 = vmatprep.mubr.msk.f32.mxu0 %vm6041_vm1, %v6039_v47 }
 0xf4f   :  { %v5827_v35 = vpop.eup %5826  ;;  %5165 = vmatprep.subr.mxu0 %v6039_v47 }
 0xf50   :  { %v3025_v36 = vpop.permute.xlu1 %3024  ;;  %v2620_v37 = vsel %vm517_vm4, %v5827_v35, 0.0 }
 0xf51   :  { %2621 = vadd.xlane.f32.xlu0 %v2620_v37  ;;  %5158 = vmatmul.mubr.msk.f32.vlgmr.msra.gmra.mrb[32].mxu0 %vm440_vm2, %v3025_v36 }
 0xf52   :  { %5166 = vmatpush3.xpose.msk.msra.mxu0 %vm440_vm2, %v2537_v23  ;;  %5167 = vmatprep.mubr.msk.f32.mxu0 %vm6041_vm1, %v6039_v47 }
 0xf53   :  { %5175 = vmatprep.subr.mxu0 %v6039_v47 }
 0xf54   :  { %v3521_v41 = vpop.permute.xlu1 %3520 }
 0xf55   :  { %5168 = vmatmul.mubr.msk.f32.vlgmr.msra.gmra.mrb[34].mxu0 %vm440_vm2, %v2450_v18 }
 0xf56   :  { %5176 = vmatpush3.xpose.msk.msra.mxu0 %vm440_vm2, %v2537_v23  ;;  %5177 = vmatprep.mubr.msk.f32.mxu0 %vm6041_vm1, %v6039_v47 }
 0xf57   :  { %5185 = vmatprep.subr.mxu0 %v6039_v47 }
 0xf58   :  { %v3684_v27 = vpop.permute.xlu1 %3683 }
 0xf67   :  { %2701 = vrot.lane.b32.xlu0 %v2449_v22, %s6042_s11 }
 0xf6b   :  { %3360 = vrot.lane.b32.xlu0 %v2450_v18, %s6042_s11 }
 0xf6f   :  { %3518 = vrot.lane.b32.xlu0 %v2450_v18, %s6040_s27 }
 0xfde   :  { %v2622_v38 = vpop.xlane.xlu0 %2621 }
 0xfdf   :  { %5828 = vrcp.f32 %v2622_v38 }
 0xfe2   :  { %v2702_v39 = vpop.permute.xlu0 %2701 }
 0xfe6   :  { %v3361_v40 = vpop.permute.xlu0 %3360 }
 0xfe7   :  { %5178 = vmatmul.mubr.msk.f32.vlgmr.msra.gmra.mrb[36].mxu0 %vm440_vm2, %v3361_v40 }
 0xfe8   :  { %5186 = vmatpush3.xpose.msk.msra.mxu0 %vm440_vm2, %v3521_v41  ;;  %5187 = vmatprep.mubr.msk.f32.mxu0 %vm6041_vm1, %v6039_v47 }
 0xfe9   :  { %v5829_v42 = vpop.eup %5828  ;;  %5195 = vmatprep.subr.mxu0 %v6039_v47 }
 0xfea   :  { %v2624_v43 = vmul.f32 %v5829_v42, %v5827_v35  ;;  %v3519_v44 = vpop.permute.xlu0 %3518 }
 0xfeb   :  { %5188 = vmatmul.mubr.msk.f32.vlgmr.msra.gmra.mrb[38].mxu0 %vm440_vm2, %v3519_v44 }
 0xfec   :  { %5196 = vmatpush3.xpose.msk.msra.mxu0 %vm440_vm2, %v3521_v41  ;;  %5133 = vmatmul.mubr.msk.f32.vlgmr.msra.gmra.mrb[34].mxu1 %vm517_vm4, %v2624_v43 }
 0xfed   :  { %5136 = vmatpush3.xpose.msk.msra.mxu1 %vm440_vm2, %v2536_v49  ;;  %5197 = vmatprep.mubr.msk.f32.mxu0 %vm6041_vm1, %v6039_v47 }
 0xfee   :  { %5137 = vmatprep.mubr.msk.f32.mxu1 %vm6041_vm1, %v6039_v47  ;;  %5140 = vmatprep.subr.mxu1 %v6039_v47 }
 0xfef   :  { %5198 = vmatmul.mubr.msk.f32.vlgmr.msra.gmra.mrb[40].mxu0 %vm440_vm2, %v3684_v27 }
 0xff0   :  { %5138 = vmatmul.mubr.msk.f32.vlgmr.msra.gmra.mrb[36].mxu1 %vm440_vm2, %v2702_v39 }
 0xff1   :  { %5141 = vmatpush3.msra.mxu1 %v2626_v31  ;;  %5142 = vmatprep.mubr.msk.f32.mxu1 %vm6041_vm1, %v6039_v47 }
 0xff2   :  { %5150 = vmatprep.subr.mxu1 %v6039_v47 }
0x1020   :  { %v2933_v29 = vpop.f32.mrb[30].mxu0 }
0x1021   :  { %v2934_v46 = vadd.f32 %v2933_v29, %v6324_v55  ;;  %v5149_v48 = vpop.f32.mrb[31].mxu0 }
0x1023   :  { %v2937_v50 = vsel %vm517_vm4, %v2934_v46, -inf }
0x1024   :  { %v3094_v51 = vpop.f32.mrb[32].mxu0  ;;  %2938 = vmax.xlane.f32.xlu1 %v2937_v50 }
0x1025   :  { %v5159_v52 = vpop.f32.mrb[33].mxu0  ;;  %v3095_v9 = vadd.f32 %v3094_v51, %v6324_v55 }
0x1027   :  { %v3098_v14 = vsel %vm517_vm4, %v3095_v9, -inf }
0x1028   :  { %v3269_v53 = vpop.f32.mrb[34].mxu0 }
0x1029   :  { %v5169_v5 = vpop.f32.mrb[35].mxu0  ;;  %v3270_v13 = vadd.f32 %v3269_v53, %v6324_v55 }
0x102b   :  { %v3273_v16 = vsel %vm517_vm4, %v3270_v13, -inf }
0x10b1   :  { %v2939_v56 = vpop.xlane.xlu1 %2938 }
0x10b2   :  { %v2940_v7 = vsub.f32 %v2934_v46, %v2939_v56 }
0x10b4   :  { %v2941_v12 = vmul.f32 1.442695, %v2940_v7 }
0x10b6   :  { %5830 = vpow2.f32 %v2941_v12 }
0x10ba   :  { %v3430_v54 = vpop.f32.mrb[36].mxu0 }
0x10bb   :  { %v5179_v57 = vpop.f32.mrb[37].mxu0  ;;  %v3431_v15 = vadd.f32 %v3430_v54, %v6324_v55 }
0x10bd   :  { %v3434_v18 = vsel %vm517_vm4, %v3431_v15, -inf }
0x10be   :  { %v3592_v59 = vpop.f32.mrb[38].mxu0 }
0x10bf   :  { %v3593_v8 = vadd.f32 %v3592_v59, %v6324_v55  ;;  %v6583_v60 = vpop.f32.mrb[34].mxu1  ;;  %v5189_v62 = vpop.f32.mrb[39].mxu0 }
0x10c0   :  { %v5134_v11 = vpop.f32.mrb[35].mxu1  ;;  %v6596_v21 = vpop.eup %5830 }
0x10c1   :  { %v3596_v63 = vsel %vm517_vm4, %v3593_v8, -inf  ;;  %v2943_v22 = vsel %vm517_vm4, %v6596_v21, 0.0 }
0x10c2   :  { %3597 = vmax.xlane.f32.xlu1 %v3596_v63  ;;  %v3753_v58 = vpop.f32.mrb[40].mxu0 }
0x10c3   :  { %v2771_v61 = vpop.f32.mrb[36].mxu1  ;;  %v5199_v2 = vpop.f32.mrb[41].mxu0  ;;  %v3754_v17 = vadd.f32 %v3753_v58, %v6324_v55 }
0x10c4   :  { %v2772_v4 = vadd.f32 %v2771_v61, %v6324_v55  ;;  %v5139_v6 = vpop.f32.mrb[37].mxu1 }
0x10c5   :  { %v3757_v20 = vsel %vm517_vm4, %v3754_v17, -inf }
0x10c6   :  { %v2775_v10 = vsel %vm517_vm4, %v2772_v4, -inf }
0x10c7   :  { %2776 = vmax.xlane.f32.xlu0 %v2775_v10 }
0x10cb   :  { %3099 = vmax.xlane.f32.xlu0 %v3098_v14 }
0x10cf   :  { %3274 = vmax.xlane.f32.xlu0 %v3273_v16  ;;  %v3857_v16 = vld [vmem:[#allocation5 + $0x80] sm:$0xff] }
0x10d3   :  { %3435 = vmax.xlane.f32.xlu0 %v3434_v18  ;;  %v3859_v18 = vld [vmem:[#allocation5 + $0x90] sm:$0xff] }
0x10d7   :  { %3758 = vmax.xlane.f32.xlu0 %v3757_v20 }
0x10db   :  { %2944 = vadd.xlane.f32.xlu0 %v2943_v22 }
0x114f   :  { %v3598_v49 = vpop.xlane.xlu1 %3597 }
0x1150   :  { %v3599_v1 = vsub.f32 %v3593_v8, %v3598_v49  ;;  %v3862_v49 = vld [vmem:[#allocation5 + $0xa8] sm:$0xff] }
0x1152   :  { %v3600_v30 = vmul.f32 1.442695, %v3599_v1  ;;  %v3864_v1 = vld [vmem:[#allocation5 + $0xb8] sm:$0xff] }
0x1154   :  { %v2777_v23 = vpop.xlane.xlu0 %2776 }
0x1155   :  { %v2778_v45 = vsub.f32 %v2772_v4, %v2777_v23  ;;  %v3861_v23 = vld [vmem:[#allocation5 + $0xa0] sm:$0xff] }
0x1157   :  { %v2779_v35 = vmul.f32 1.442695, %v2778_v45 }
0x1158   :  { %v3100_v24 = vpop.xlane.xlu0 %3099 }
0x1159   :  { %v3101_v0 = vsub.f32 %v3095_v9, %v3100_v24  ;;  %v5536_v24 = vpack.c.bf16 %v3862_v49, %v3861_v23  ;;  %v3984_v23 = vld [vmem:[#allocation7 + $0x248] sm:$0xff] }
0x115b   :  { %v3102_v26 = vmul.f32 1.442695, %v3101_v0  ;;  %v3863_v0 = vld [vmem:[#allocation5 + $0xb0] sm:$0xff] }
0x115c   :  { %v3275_v28 = vpop.xlane.xlu0 %3274 }
0x115d   :  { %5832 = vpow2.f32 %v3102_v26  ;;  %v3276_v55 = vsub.f32 %v3270_v13, %v3275_v28  ;;  %v5540_v26 = vpack.c.bf16 %v3864_v1, %v3863_v0  ;;  %v3865_v28 = vld [vmem:[#allocation5 + $0xc0] sm:$0xff]  ;;  %v3986_v0 = vld [vmem:[#allocation7 + $0x258] sm:$0xff] }
0x115e   :  { %v3990_v1 = vld [vmem:[#allocation7 + $0x278] sm:$0xff] }
0x115f   :  { %v3277_v31 = vmul.f32 1.442695, %v3276_v55  ;;  %v3866_v55 = vld [vmem:[#allocation5 + $0xc8] sm:$0xff] }
0x1160   :  { %v3436_v33 = vpop.xlane.xlu0 %3435 }
0x1161   :  { %5834 = vpow2.f32 %v3277_v31  ;;  %v3437_v34 = vsub.f32 %v3431_v15, %v3436_v33 }
0x1162   :  { %5836 = vpow2.f32 %v3600_v30  ;;  %v5544_v30 = vpack.c.bf16 %v3866_v55, %v3865_v28  ;;  %v5596_v28 = vpack.c.bf16 %v3990_v1, %v3986_v0  ;;  %v3983_v55 = vld [vmem:[#allocation7 + $0x240] sm:$0xff]  ;;  %v4024_v0 = vld [vmem:[#allocation7 + $0x388] sm:$0xff] }
0x1163   :  { %v3438_v36 = vmul.f32 1.442695, %v3437_v34  ;;  %v3867_v34 = vld [vmem:[#allocation5 + $0xd0] sm:$0xff] }
0x1164   :  { %v3759_v37 = vpop.xlane.xlu0 %3758 }
0x1165   :  { %5838 = vpow2.f32 %v3438_v36  ;;  %v3760_v38 = vsub.f32 %v3754_v17, %v3759_v37  ;;  %v3858_v17 = vld [vmem:[#allocation5 + $0x88] sm:$0xff] }
0x1166   :  { %5840 = vpow2.f32 %v2779_v35  ;;  %v5528_v20 = vpack.c.bf16 %v3858_v17, %v3857_v16  ;;  %v3868_v35 = vld [vmem:[#allocation5 + $0xd8] sm:$0xff]  ;;  %v3975_v17 = vld [vmem:[#allocation7 + $0x200] sm:$0xff] }
0x1167   :  { %v5833_v39 = vpop.eup %5832  ;;  %v3761_v40 = vmul.f32 1.442695, %v3760_v38  ;;  %v5548_v37 = vpack.c.bf16 %v3868_v35, %v3867_v34  ;;  %v3982_v16 = vld [vmem:[#allocation7 + $0x238] sm:$0xff]  ;;  %v3992_v34 = vld [vmem:[#allocation7 + $0x288] sm:$0xff] }
0x1168   :  { %v3104_v41 = vsel %vm517_vm4, %v5833_v39, 0.0  ;;  %v2945_v54 = vpop.xlane.xlu0 %2944  ;;  %5529 = vmatprep.subr.bf16.mxu0 %v5528_v20  ;;  %v3996_v35 = vld [vmem:[#allocation7 + $0x2a8] sm:$0xff] }
0x1169   :  { %3105 = vadd.xlane.f32.xlu1 %v3104_v41  ;;  %5842 = vpow2.f32 %v3761_v40  ;;  %5531 = vmatpush3.bf16.msra.mxu0 %v5528_v20  ;;  %v3870_v40 = vld [vmem:[#allocation5 + $0xe8] sm:$0xff] }
0x116b   :  { %v5835_v42 = vpop.eup %5834 }
0x116c   :  { %v3279_v43 = vsel %vm517_vm4, %v5835_v42, 0.0  ;;  %v6602_v44 = vpop.eup %5836 }
0x116d   :  { %3280 = vadd.xlane.f32.xlu0 %v3279_v43  ;;  %v3602_v46 = vsel %vm517_vm4, %v6602_v44, 0.0 }
0x116f   :  { %v5839_v27 = vpop.eup %5838 }
0x1170   :  { %v3440_v29 = vsel %vm517_vm4, %v5839_v27, 0.0  ;;  %v5841_v48 = vpop.eup %5840 }
0x1171   :  { %3441 = vadd.xlane.f32.xlu1 %v3440_v29  ;;  %3603 = vadd.xlane.f32.xlu0 %v3602_v46  ;;  %v2781_v50 = vsel %vm517_vm4, %v5841_v48, 0.0 }
0x1173   :  { %v5843_v51 = vpop.eup %5842 }
0x1174   :  { %v3763_v52 = vsel %vm517_vm4, %v5843_v51, 0.0 }
0x1175   :  { %2782 = vadd.xlane.f32.xlu1 %v2781_v50 }
0x1179   :  { %3764 = vadd.xlane.f32.xlu1 %v3763_v52 }
0x1187   :  { %2948 = vrot.lane.b32.xlu0 %v6499_v25, %s6037_s20 }
0x118a   :  { %3284 = vrot.lane.b32.xlu1 %v6503_v3, %s6040_s27 }
0x118e   :  { %3607 = vrot.lane.b32.xlu1 %v6503_v3, %s6037_s20 }
0x11f6   :  { %v3106_v53 = vpop.xlane.xlu1 %3105 }
0x11fa   :  { %v3281_v59 = vpop.xlane.xlu0 %3280 }
0x11fe   :  { %v3442_v5 = vpop.xlane.xlu1 %3441  ;;  %v3604_v8 = vpop.xlane.xlu0 %3603 }
0x1202   :  { %v2783_v57 = vpop.xlane.xlu1 %2782  ;;  %v2949_v25 = vpop.permute.xlu0 %2948 }
0x1203   :  { %5844 = vrcp.f32 %v2783_v57 }
0x1204   :  { %5846 = vrcp.f32 %v2945_v54 }
0x1205   :  { %5848 = vrcp.f32 %v3106_v53 }
0x1206   :  { %5850 = vrcp.f32 %v3281_v59  ;;  %v3765_v56 = vpop.xlane.xlu1 %3764 }
0x1207   :  { %5852 = vrcp.f32 %v3442_v5 }
0x1208   :  { %5854 = vrcp.f32 %v3604_v8 }
0x1209   :  { %5856 = vrcp.f32 %v3765_v56 }
0x120a   :  { %v3285_v4 = vpop.permute.xlu1 %3284 }
0x120d   :  { %v5845_v62 = vpop.eup %5844 }
0x120e   :  { %v2785_v11 = vmul.f32 %v5845_v62, %v5841_v48  ;;  %v5847_v63 = vpop.eup %5846  ;;  %v3608_v12 = vpop.permute.xlu1 %3607 }
0x120f   :  { %v2947_v3 = vmul.f32 %v5847_v63, %v6596_v21  ;;  %v5849_v58 = vpop.eup %5848  ;;  %v3860_v21 = vld [vmem:[#allocation5 + $0x98] sm:$0xff] }
0x1210   :  { %5143 = vmatmul.mubr.msk.f32.vlgmr.msra.gmra.mrb[38].mxu1 %vm517_vm4, %v2785_v11  ;;  %v3108_v61 = vmul.f32 %v5849_v58, %v5833_v39  ;;  %v5851_v2 = vpop.eup %5850  ;;  %v5532_v22 = vpack.c.bf16 %v3860_v21, %v3859_v18  ;;  %v3869_v39 = vld [vmem:[#allocation5 + $0xe0] sm:$0xff]  ;;  %v3977_v21 = vld [vmem:[#allocation7 + $0x210] sm:$0xff] }
0x1211   :  { %5151 = vmatpush3.msra.mxu1 %v2949_v25  ;;  %5152 = vmatprep.mubr.msk.f32.mxu1 %vm6041_vm1, %v6039_v47  ;;  %v3283_v6 = vmul.f32 %v5851_v2, %v5835_v42  ;;  %v5853_v7 = vpop.eup %5852  ;;  %v5552_v42 = vpack.c.bf16 %v3870_v40, %v3869_v39  ;;  %v3979_v18 = vld [vmem:[#allocation7 + $0x220] sm:$0xff]  ;;  %v3998_v39 = vld [vmem:[#allocation7 + $0x2b8] sm:$0xff] }
0x1212   :  { %5160 = vmatprep.subr.mxu1 %v6039_v47  ;;  %v3444_v9 = vmul.f32 %v5853_v7, %v5839_v27  ;;  %v5855_v10 = vpop.eup %5854  ;;  %5533 = vmatprep.subr.bf16.mxu0 %v5532_v22  ;;  %v3872_v27 = vld [vmem:[#allocation5 + $0xf8] sm:$0xff]  ;;  %v5562_v20 = vpack.c.bf16 %v3979_v18, %v3975_v17  ;;  %v3991_v40 = vld [vmem:[#allocation7 + $0x280] sm:$0xff] }
0x1213   :  { %v3606_v13 = vmul.f32 %v5855_v10, %v6602_v44  ;;  %v5857_v14 = vpop.eup %5856  ;;  %5535 = vmatpush3.bf16.msra.mxu0 %v5532_v22  ;;  %v3871_v44 = vld [vmem:[#allocation5 + $0xf0] sm:$0xff]  ;;  %v4018_v17 = vld [vmem:[#allocation7 + $0x358] sm:$0xff] }
0x1214   :  { %5153 = vmatmul.mubr.msk.f32.vlgmr.msra.gmra.mrb[40].mxu1 %vm517_vm4, %v2947_v3  ;;  %v3767_v15 = vmul.f32 %v5857_v14, %v5843_v51  ;;  %5537 = vmatprep.subr.bf16.mxu0 %v5536_v24  ;;  %v5556_v46 = vpack.c.bf16 %v3872_v27, %v3871_v44  ;;  %v3978_v14 = vld [vmem:[#allocation7 + $0x218] sm:$0xff]  ;;  %v3981_v22 = vld [vmem:[#allocation7 + $0x230] sm:$0xff] }
0x1215   :  { %5161 = vmatpush3.msra.mxu1 %v2949_v25  ;;  %5162 = vmatprep.mubr.msk.f32.mxu1 %vm6041_vm1, %v6039_v47  ;;  %v5594_v49 = vpack.c.bf16 %v3981_v22, %v3977_v21  ;;  %v3997_v44 = vld [vmem:[#allocation7 + $0x2b0] sm:$0xff]  ;;  %v4019_v21 = vld [vmem:[#allocation7 + $0x360] sm:$0xff] }
0x1216   :  { %5170 = vmatprep.subr.mxu1 %v6039_v47 }
0x1217   :  { %5539 = vmatpush3.bf16.msra.mxu0 %v5536_v24  ;;  %v3988_v24 = vld [vmem:[#allocation7 + $0x268] sm:$0xff] }
0x1218   :  { %5163 = vmatmul.mubr.msk.f32.vlgmr.msra.gmra.mrb[42].mxu1 %vm517_vm4, %v3108_v61  ;;  %5541 = vmatprep.subr.bf16.mxu0 %v5540_v26 }
0x1219   :  { %5171 = vmatpush3.msra.mxu1 %v3285_v4  ;;  %5172 = vmatprep.mubr.msk.f32.mxu1 %vm6041_vm1, %v6039_v47 }
0x121a   :  { %5180 = vmatprep.subr.mxu1 %v6039_v47 }
0x121b   :  { %5543 = vmatpush3.bf16.msra.mxu0 %v5540_v26  ;;  %v5564_v26 = vpack.c.bf16 %v3988_v24, %v3984_v23  ;;  %v4021_v24 = vld [vmem:[#allocation7 + $0x370] sm:$0xff] }
0x121c   :  { %5173 = vmatmul.mubr.msk.f32.vlgmr.msra.gmra.mrb[44].mxu1 %vm517_vm4, %v3283_v6  ;;  %5545 = vmatprep.subr.bf16.mxu0 %v5544_v30 }
0x121d   :  { %5181 = vmatpush3.msra.mxu1 %v3285_v4  ;;  %5182 = vmatprep.mubr.msk.f32.mxu1 %vm6041_vm1, %v6039_v47 }
0x121e   :  { %5190 = vmatprep.subr.mxu1 %v6039_v47 }
0x121f   :  { %5547 = vmatpush3.bf16.msra.mxu0 %v5544_v30  ;;  %v3987_v30 = vld [vmem:[#allocation7 + $0x260] sm:$0xff] }
0x1220   :  { %5183 = vmatmul.mubr.msk.f32.vlgmr.msra.gmra.mrb[46].mxu1 %vm517_vm4, %v3444_v9  ;;  %5549 = vmatprep.subr.bf16.mxu0 %v5548_v37 }
0x1221   :  { %5191 = vmatpush3.msra.mxu1 %v3608_v12  ;;  %5192 = vmatprep.mubr.msk.f32.mxu1 %vm6041_vm1, %v6039_v47 }
0x1222   :  { %5200 = vmatprep.subr.mxu1 %v6039_v47 }
0x1223   :  { %5551 = vmatpush3.bf16.msra.mxu0 %v5548_v37  ;;  %v5568_v37 = vpack.c.bf16 %v3996_v35, %v3992_v34  ;;  %v4025_v34 = vld [vmem:[#allocation7 + $0x390] sm:$0xff] }
0x1224   :  { %5193 = vmatmul.mubr.msk.f32.vlgmr.msra.gmra.mrb[48].mxu1 %vm517_vm4, %v3606_v13  ;;  %5553 = vmatprep.subr.bf16.mxu0 %v5552_v42  ;;  %v3980_v13 = vld [vmem:[#allocation7 + $0x228] sm:$0xff] }
0x1225   :  { %5201 = vmatpush3.msra.mxu1 %v3608_v12  ;;  %5202 = vmatprep.mubr.msk.f32.mxu1 %vm6041_vm1, %v6039_v47  ;;  %v3976_v12 = vld [vmem:[#allocation7 + $0x208] sm:$0xff] }
0x1227   :  { %5555 = vmatpush3.bf16.msra.mxu0 %v5552_v42  ;;  %v3995_v42 = vld [vmem:[#allocation7 + $0x2a0] sm:$0xff] }
0x1228   :  { %5203 = vmatmul.mubr.msk.f32.vlgmr.msra.gmra.mrb[50].mxu1 %vm517_vm4, %v3767_v15  ;;  %5557 = vmatprep.subr.bf16.mxu0 %v5556_v46  ;;  %v5560_v15 = vpack.c.bf16 %v3980_v13, %v3976_v12  ;;  %v5570_v27 = vpack.c.bf16 %v3995_v42, %v3991_v40  ;;  %v4009_v12 = vld [vmem:[#allocation7 + $0x310] sm:$0xff]  ;;  %v4038_v42 = vld [vmem:[#allocation7 + $0x3f8] sm:$0xff] }
0x1229   :  { %4103 = vmatprep.mubr.f32.mxu1 %v6039_v47  ;;  %v4013_v13 = vld [vmem:[#allocation7 + $0x330] sm:$0xff] }
0x122a   :  { %5561 = vmatprep.subr.bf16.mxu1 %v5560_v15  ;;  %v4016_v15 = vld [vmem:[#allocation7 + $0x348] sm:$0xff] }
0x122b   :  { %5559 = vmatpush3.bf16.msra.mxu0 %v5556_v46  ;;  %5563 = vmatpush1.bf16.msra.mxu1 %v5562_v20  ;;  %v4015_v20 = vld [vmem:[#allocation7 + $0x340] sm:$0xff] }
0x122c   :  { %5565 = vmatprep.subr.bf16.mxu1 %v5564_v26  ;;  %v5582_v23 = vpack.c.bf16 %v4019_v21, %v4015_v20  ;;  %v4028_v26 = vld [vmem:[#allocation7 + $0x3a8] sm:$0xff]  ;;  %v4248_v21 = vld [vmem:[#allocation8 + $0x1b0] sm:$0xff] }
0x12e3   :  { %v2855_v45 = vpop.f32.mrb[38].mxu1 }
0x12e4   :  { %v5144_v31 = vpop.f32.mrb[39].mxu1 }
0x12e5   :  { %v5566_v31 = vpack.c.bf16 %v3987_v30, %v3983_v55  ;;  %v4030_v55 = vld [vmem:[#allocation7 + $0x3b8] sm:$0xff]  ;;  %v5584_v30 = vpack.c.bf16 %v4028_v26, %v4024_v0  ;;  %v4251_v26 = vld [vmem:[#allocation8 + $0x1c8] sm:$0xff] }
0x12e7   :  { %v3020_v33 = vpop.f32.mrb[40].mxu1  ;;  %5567 = vmatpush1.bf16.msra.mxu1 %v5566_v31  ;;  %v4023_v31 = vld [vmem:[#allocation7 + $0x380] sm:$0xff] }
0x12e8   :  { %v5154_v36 = vpop.f32.mrb[41].mxu1  ;;  %5569 = vmatprep.subr.bf16.mxu1 %v5568_v37  ;;  %v4032_v37 = vld [vmem:[#allocation7 + $0x3c8] sm:$0xff] }
0x12eb   :  { %v3178_v38 = vpop.f32.mrb[42].mxu1  ;;  %5571 = vmatpush1.bf16.msra.mxu1 %v5570_v27  ;;  %v4035_v27 = vld [vmem:[#allocation7 + $0x3e0] sm:$0xff] }
0x12ec   :  { %v5164_v41 = vpop.f32.mrb[43].mxu1 }
0x12ef   :  { %v3356_v43 = vpop.f32.mrb[44].mxu1 }
0x12f0   :  { %v5174_v29 = vpop.f32.mrb[45].mxu1 }
0x12f3   :  { %v3514_v48 = vpop.f32.mrb[46].mxu1 }
0x12f4   :  { %v5751_v50 = vpack.i.bf16 %v3514_v48, %v2855_v45  ;;  %v5184_v51 = vpop.f32.mrb[47].mxu1  ;;  %v3985_v45 = vld [vmem:[#allocation7 + $0x250] sm:$0xff] }
0x12f6   :  { %5752 = vrot.lane.b32.xlu1 %v5751_v50, %s6037_s20 }
0x12f7   :  { %v3679_v52 = vpop.f32.mrb[48].mxu1 }
0x12f8   :  { %v5756_v53 = vpack.i.bf16 %v3679_v52, %v3020_v33  ;;  %v5194_v5 = vpop.f32.mrb[49].mxu1  ;;  %v3989_v33 = vld [vmem:[#allocation7 + $0x270] sm:$0xff] }
0x12f9   :  { %v5598_v36 = vpack.c.bf16 %v3989_v33, %v3985_v45  ;;  %v4000_v5 = vld [vmem:[#allocation7 + $0x2c8] sm:$0xff]  ;;  %v4027_v33 = vld [vmem:[#allocation7 + $0x3a0] sm:$0xff] }
0x12fa   :  { %5757 = vrot.lane.b32.xlu0 %v5756_v53, %s6040_s27  ;;  %v5586_v35 = vpack.c.bf16 %v4027_v33, %v4023_v31  ;;  %v4252_v31 = vld [vmem:[#allocation8 + $0x1d0] sm:$0xff]  ;;  %v4253_v33 = vld [vmem:[#allocation8 + $0x1d8] sm:$0xff] }
0x12fb   :  { %v3837_v54 = vpop.f32.mrb[50].mxu1 }
0x12fc   :  { %v5761_v57 = vpack.i.bf16 %v3837_v54, %v3178_v38  ;;  %v5204_v59 = vpop.f32.mrb[51].mxu1  ;;  %v3994_v38 = vld [vmem:[#allocation7 + $0x298] sm:$0xff]  ;;  %v4004_v54 = vld [vmem:[#allocation7 + $0x2e8] sm:$0xff] }
0x12fd   :  { %v5600_v41 = vpack.c.bf16 %v3998_v39, %v3994_v38  ;;  %v5572_v59 = vpack.c.bf16 %v4004_v54, %v4000_v5  ;;  %v4036_v38 = vld [vmem:[#allocation7 + $0x3e8] sm:$0xff] }
0x12fe   :  { %5762 = vrot.lane.b32.xlu1 %v5761_v57, %s6042_s11  ;;  %v4002_v57 = vld [vmem:[#allocation7 + $0x2d8] sm:$0xff]  ;;  %v5588_v40 = vpack.c.bf16 %v4036_v38, %v4032_v37  ;;  %v4254_v38 = vld [vmem:[#allocation8 + $0x1e0] sm:$0xff] }
0x12ff   :  { %5573 = vmatprep.subr.bf16.mxu1 %v5572_v59 }
0x1368   :  { %v5753_v8 = vpop.permute.xlu1 %5752 }
0x1369   :  { %v5755_v11 = vunpack.i.h.bf16 %v5753_v8  ;;  %v5754_v63 = vunpack.i.l.bf16 %v5753_v8  ;;  %v4006_v8 = vld [vmem:[#allocation7 + $0x2f8] sm:$0xff] }
0x136b   :  { %v3853_v58 = vsel %vm440_vm2, %v3356_v43, %v5755_v11  ;;  %v3194_v4 = vsel %vm440_vm2, %v6583_v60, %v5754_v63  ;;  %v5592_v60 = vpack.c.bf16 %v3982_v16, %v3978_v14  ;;  %v3993_v43 = vld [vmem:[#allocation7 + $0x290] sm:$0xff]  ;;  %v5604_v11 = vpack.c.bf16 %v4006_v8, %v4002_v57  ;;  %v4020_v16 = vld [vmem:[#allocation7 + $0x368] sm:$0xff] }
0x136c   :  { %v5758_v62 = vpop.permute.xlu0 %5757  ;;  %v5602_v29 = vpack.c.bf16 %v3997_v44, %v3993_v43  ;;  %v5610_v14 = vpack.c.bf16 %v4013_v13, %v4009_v12  ;;  %v5580_v18 = vpack.c.bf16 %v4020_v16, %v4016_v15  ;;  %v4031_v43 = vld [vmem:[#allocation7 + $0x3c0] sm:$0xff]  ;;  %v4228_v12 = vld [vmem:[#allocation8 + $0x110] sm:$0xff]  ;;  %v4229_v13 = vld [vmem:[#allocation8 + $0x118] sm:$0xff] }
0x136d   :  { %v5760_v25 = vunpack.i.h.bf16 %v5758_v62  ;;  %v5759_v3 = vunpack.i.l.bf16 %v5758_v62  ;;  %5593 = vmatprep.subr.bf16.mxu0 %v5592_v60  ;;  %v3999_v62 = vld [vmem:[#allocation7 + $0x2c0] sm:$0xff]  ;;  %v4022_v60 = vld [vmem:[#allocation7 + $0x378] sm:$0xff]  ;;  %v4247_v16 = vld [vmem:[#allocation8 + $0x1a8] sm:$0xff] }
0x136e   :  { %v5612_v22 = vpack.c.bf16 %v4022_v60, %v4018_v17  ;;  %v4246_v15 = vld [vmem:[#allocation8 + $0x1a0] sm:$0xff]  ;;  %v4231_v60 = vld [vmem:[#allocation8 + $0x128] sm:$0xff] }
0x136f   :  { %v3195_v6 = vsel %vm354_vm0, %v3194_v4, %v5759_v3  ;;  %v3854_v7 = vsel %vm354_vm0, %v3853_v58, %v5760_v25  ;;  %v4001_v25 = vld [vmem:[#allocation7 + $0x2d0] sm:$0xff]  ;;  %v4012_v58 = vld [vmem:[#allocation7 + $0x328] sm:$0xff]  ;;  %v4014_v4 = vld [vmem:[#allocation7 + $0x338] sm:$0xff]  ;;  %v5632_v17 = vpack.c.bf16 %v4247_v16, %v4246_v15 }
0x1370   :  { %v5763_v56 = vpop.permute.xlu1 %5762 }
0x1371   :  { %v5765_v61 = vunpack.i.h.bf16 %v5763_v56  ;;  %v5764_v2 = vunpack.i.l.bf16 %v5763_v56  ;;  %v4008_v56 = vld [vmem:[#allocation7 + $0x308] sm:$0xff] }
0x1373   :  { %v3196_v9 = vsel %vm1100_vm5, %v3195_v6, %v5764_v2  ;;  %v3855_v10 = vsel %vm1100_vm5, %v3854_v7, %v5765_v61  ;;  %v4010_v61 = vld [vmem:[#allocation7 + $0x318] sm:$0xff]  ;;  %v5576_v2 = vpack.c.bf16 %v4012_v58, %v4008_v56  ;;  %v4007_v6 = vld [vmem:[#allocation7 + $0x300] sm:$0xff]  ;;  %v4243_v58 = vld [vmem:[#allocation8 + $0x188] sm:$0xff] }
0x1374   :  { %5237 = vmatprep.mubr.f32.mxu0 %v3196_v9  ;;  %v4011_v7 = vld [vmem:[#allocation7 + $0x320] sm:$0xff]  ;;  %v5608_v9 = vpack.c.bf16 %v4014_v4, %v4010_v61  ;;  %v4227_v4 = vld [vmem:[#allocation8 + $0x108] sm:$0xff] }
0x1375   :  { %5238 = vmatmul.mubr.f32.vlgmr.msra.gmra.mrb[42].mxu0 %v3855_v10  ;;  %v5578_v10 = vpack.c.bf16 %v4011_v7, %v4007_v6  ;;  %v4242_v56 = vld [vmem:[#allocation8 + $0x180] sm:$0xff]  ;;  %v4244_v7 = vld [vmem:[#allocation8 + $0x190] sm:$0xff] }
0x1376   :  { %4180 = vmatprep.mubr.f32.mxu0 %v6039_v47  ;;  %5595 = vmatpush1.bf16.msra.mxu0 %v5594_v49  ;;  %v4017_v49 = vld [vmem:[#allocation7 + $0x350] sm:$0xff]  ;;  %v5624_v61 = vpack.c.bf16 %v4243_v58, %v4242_v56 }
0x1377   :  { %5597 = vmatprep.subr.bf16.mxu0 %v5596_v28  ;;  %v5614_v1 = vpack.c.bf16 %v4021_v24, %v4017_v49  ;;  %v4026_v28 = vld [vmem:[#allocation7 + $0x398] sm:$0xff]  ;;  %v4232_v49 = vld [vmem:[#allocation8 + $0x130] sm:$0xff] }
0x1378   :  { %v5616_v45 = vpack.c.bf16 %v4030_v55, %v4026_v28  ;;  %v4233_v24 = vld [vmem:[#allocation8 + $0x138] sm:$0xff]  ;;  %v4234_v55 = vld [vmem:[#allocation8 + $0x140] sm:$0xff] }
0x1379   :  { %v5638_v0 = vpack.c.bf16 %v4233_v24, %v4232_v49  ;;  %v4361_v49 = vld [vmem:[#allocation10 + $0x18] sm:$0xff] }
0x137a   :  { %5599 = vmatpush1.bf16.msra.mxu0 %v5598_v36  ;;  %v4029_v36 = vld [vmem:[#allocation7 + $0x3b0] sm:$0xff] }
0x137b   :  { %5601 = vmatprep.subr.bf16.mxu0 %v5600_v41  ;;  %v5618_v39 = vpack.c.bf16 %v4029_v36, %v4025_v34  ;;  %v4034_v41 = vld [vmem:[#allocation7 + $0x3d8] sm:$0xff]  ;;  %v5644_v34 = vpack.c.bf16 %v4253_v33, %v4252_v31  ;;  %v4367_v31 = vld [vmem:[#allocation10 + $0x48] sm:$0xff] }
0x137c   :  { %v5620_v44 = vpack.c.bf16 %v4038_v42, %v4034_v41  ;;  %v4237_v36 = vld [vmem:[#allocation8 + $0x158] sm:$0xff]  ;;  %v4238_v41 = vld [vmem:[#allocation8 + $0x160] sm:$0xff]  ;;  %v4239_v42 = vld [vmem:[#allocation8 + $0x168] sm:$0xff] }
0x137e   :  { %5603 = vmatpush1.bf16.msra.mxu0 %v5602_v29  ;;  %v4033_v29 = vld [vmem:[#allocation7 + $0x3d0] sm:$0xff] }
0x137f   :  { %5605 = vmatprep.subr.bf16.mxu0 %v5604_v11  ;;  %v4664_v11 = vld [vmem:[%s6709_s5 + $0x1] ss:$0 sm:$0xff] }
0x1448   :  { %v5239_v46 = vpop.f32.mrb[42].mxu0 }
0x1449   :  { %v6654_v48 = vadd.f32 %v5239_v46, %v6480_v19  ;;  %v3939_v50 = vpop.f32.mrb[43].mxu0  ;;  %v4003_v19 = vld [vmem:[#allocation7 + $0x2e0] sm:$0xff]  ;;  %v4037_v46 = vld [vmem:[#allocation7 + $0x3f0] sm:$0xff] }
0x144a   :  { %v6657_v51 = vadd.f32 %v3939_v50, %v6475_v32  ;;  %v5574_v63 = vpack.c.bf16 %v4003_v19, %v3999_v62  ;;  %v4005_v32 = vld [vmem:[#allocation7 + $0x2f0] sm:$0xff]  ;;  %v5590_v50 = vpack.c.bf16 %v4035_v27, %v4031_v43  ;;  %v5650_v43 = vpack.c.bf16 %v4239_v42, %v4238_v41  ;;  %v4257_v27 = vld [vmem:[#allocation8 + $0x1f8] sm:$0xff] }
0x144b   :  { %v3953_v52 = vmul.f32 %v6654_v48, %v6654_v48  ;;  %v5606_v3 = vpack.c.bf16 %v4005_v32, %v4001_v25  ;;  %v4368_v41 = vld [vmem:[#allocation10 + $0x50] sm:$0xff] }
0x144c   :  { %v3952_v53 = vmul.f32 %v6657_v51, %v6657_v51  ;;  %5575 = vmatpush1.bf16.msra.mxu1 %v5574_v63 }
0x144d   :  { %3956 = vadd.xlane.f32.xlu1 %v3953_v52  ;;  %5607 = vmatpush1.bf16.msra.mxu0 %v5606_v3  ;;  %v5622_v52 = vpack.c.bf16 %v4037_v46, %v4033_v29  ;;  %v4240_v46 = vld [vmem:[#allocation8 + $0x170] sm:$0xff] }
0x144e   :  { %3954 = vadd.xlane.f32.xlu0 %v3952_v53  ;;  %5577 = vmatprep.subr.bf16.mxu1 %v5576_v2  ;;  %v4226_v2 = vld [vmem:[#allocation8 + $0x100] sm:$0xff] }
0x144f   :  { %5609 = vmatprep.subr.bf16.mxu0 %v5608_v9  ;;  %v5626_v6 = vpack.c.bf16 %v4227_v4, %v4226_v2  ;;  %v4245_v9 = vld [vmem:[#allocation8 + $0x198] sm:$0xff] }
0x1450   :  { %5579 = vmatpush1.bf16.msra.mxu1 %v5578_v10  ;;  %v5628_v10 = vpack.c.bf16 %v4245_v9, %v4244_v7 }
0x1451   :  { %5611 = vmatpush1.bf16.msra.mxu0 %v5610_v14  ;;  %5581 = vmatprep.subr.bf16.mxu1 %v5580_v18  ;;  %v5630_v14 = vpack.c.bf16 %v4229_v13, %v4228_v12  ;;  %v4230_v18 = vld [vmem:[#allocation8 + $0x120] sm:$0xff] }
0x1452   :  { %5613 = vmatprep.subr.bf16.mxu0 %v5612_v22  ;;  %v5634_v20 = vpack.c.bf16 %v4231_v60, %v4230_v18  ;;  %v4249_v22 = vld [vmem:[#allocation8 + $0x1b8] sm:$0xff] }
0x1454   :  { %5583 = vmatpush1.bf16.msra.mxu1 %v5582_v23  ;;  %v5636_v23 = vpack.c.bf16 %v4249_v22, %v4248_v21  ;;  %v4359_v22 = vld [vmem:[#allocation10 + $0x8] sm:$0xff] }
0x1455   :  { %5615 = vmatpush1.bf16.msra.mxu0 %v5614_v1  ;;  %5585 = vmatprep.subr.bf16.mxu1 %v5584_v30  ;;  %v4250_v1 = vld [vmem:[#allocation8 + $0x1c0] sm:$0xff]  ;;  %v4235_v30 = vld [vmem:[#allocation8 + $0x148] sm:$0xff] }
0x1456   :  { %5617 = vmatprep.subr.bf16.mxu0 %v5616_v45  ;;  %v5640_v28 = vpack.c.bf16 %v4251_v26, %v4250_v1  ;;  %v5642_v45 = vpack.c.bf16 %v4235_v30, %v4234_v55  ;;  %v4358_v1 = vld [vmem:[#allocation10] sm:$0xff]  ;;  %v4360_v30 = vld [vmem:[#allocation10 + $0x10] sm:$0xff] }
0x1457   :  { %v4362_v26 = vld [vmem:[#allocation10 + $0x20] sm:$0xff] }
0x1458   :  { %5587 = vmatpush1.bf16.msra.mxu1 %v5586_v35  ;;  %v4236_v35 = vld [vmem:[#allocation8 + $0x150] sm:$0xff]  ;;  %v5658_v55 = vpack.c.bf16 %v4362_v26, %v4358_v1 }
0x1459   :  { %5619 = vmatpush1.bf16.msra.mxu0 %v5618_v39  ;;  %5589 = vmatprep.subr.bf16.mxu1 %v5588_v40  ;;  %v5646_v37 = vpack.c.bf16 %v4237_v36, %v4236_v35  ;;  %v4255_v39 = vld [vmem:[#allocation8 + $0x1e8] sm:$0xff]  ;;  %v4369_v35 = vld [vmem:[#allocation10 + $0x58] sm:$0xff]  ;;  %v4396_v1 = vld [vmem:[#allocation10 + $0x130] sm:$0xff] }
0x145a   :  { %5621 = vmatprep.subr.bf16.mxu0 %v5620_v44  ;;  %v5648_v40 = vpack.c.bf16 %v4255_v39, %v4254_v38  ;;  %v4256_v44 = vld [vmem:[#allocation8 + $0x1f0] sm:$0xff]  ;;  %v4373_v36 = vld [vmem:[#allocation10 + $0x78] sm:$0xff]  ;;  %v4366_v39 = vld [vmem:[#allocation10 + $0x40] sm:$0xff] }
0x145b   :  { %v5652_v29 = vpack.c.bf16 %v4257_v27, %v4256_v44  ;;  %v5692_v38 = vpack.c.bf16 %v4373_v36, %v4369_v35  ;;  %v4375_v44 = vld [vmem:[#allocation10 + $0x88] sm:$0xff] }
0x145c   :  { %5591 = vmatpush1.bf16.msra.mxu1 %v5590_v50  ;;  %v4241_v50 = vld [vmem:[#allocation8 + $0x178] sm:$0xff]  ;;  %v4379_v27 = vld [vmem:[#allocation10 + $0xa8] sm:$0xff] }
0x145d   :  { %5623 = vmatpush1.bf16.msra.mxu0 %v5622_v52  ;;  %5625 = vmatprep.subr.bf16.mxu1 %v5624_v61  ;;  %v5654_v52 = vpack.c.bf16 %v4241_v50, %v4240_v46  ;;  %v5664_v46 = vpack.c.bf16 %v4379_v27, %v4375_v44  ;;  %v4377_v50 = vld [vmem:[#allocation10 + $0x98] sm:$0xff]  ;;  %v4406_v27 = vld [vmem:[#allocation10 + $0x180] sm:$0xff] }
0x145e   :  { %v4413_v44 = vld [vmem:[#allocation10 + $0x1b8] sm:$0xff] }
0x14da   :  { %v3957_v53 = vpop.xlane.xlu1 %3956 }
0x14db   :  { %v3959_v5 = vmul.f32 0.0078125, %v3957_v53  ;;  %v3955_v54 = vpop.xlane.xlu0 %3954 }
0x14dc   :  { %v3958_v57 = vmul.f32 0.0078125, %v3955_v54 }
0x14dd   :  { %v3961_v59 = vadd.f32 1e-05, %v3959_v5 }
0x14de   :  { %v3960_v8 = vadd.f32 1e-05, %v3958_v57 }
0x14df   :  { %5858 = vrsqrt.f32 %v3961_v59 }
0x14e0   :  { %5860 = vrsqrt.f32 %v3960_v8 }
0x14e9   :  { %v5859_v62 = vpop.eup %5858 }
0x14ea   :  { %v5861_v19 = vpop.eup %5860  ;;  %v3965_v32 = vmul.f32 %v5859_v62, %v6654_v48 }
0x14eb   :  { %v3964_v63 = vmul.f32 %v5861_v19, %v6657_v51 }
0x14ec   :  { %v3973_v3 = vmul.f32 %v4664_v11, %v3965_v32 }
0x14ed   :  { %v3972_v25 = vmul.f32 %v4664_v11, %v3964_v63 }
0x14ef   :  { %4104 = vmatmul.mubr.f32.vlgmr.msra.gmra.mrb[52].mxu1 %v3972_v25  ;;  %4181 = vmatmul.mubr.f32.vlgmr.msra.gmra.mrb[44].mxu0 %v3972_v25 }
0x14f0   :  { %4109 = vmatprep.mubr.f32.mxu1 %v6039_v47  ;;  %4186 = vmatprep.mubr.f32.mxu0 %v6039_v47 }
0x14f1   :  { %5627 = vmatpush3.bf16.msra.mxu1 %v5626_v6 }
0x14f2   :  { %5629 = vmatprep.subr.bf16.mxu1 %v5628_v10 }
0x14f3   :  { %4110 = vmatmul.mubr.f32.gmra.mrb[54].mxu1 %v3973_v3  ;;  %4187 = vmatmul.mubr.f32.gmra.mrb[46].mxu0 %v3973_v3 }
0x14f4   :  { %4486 = vmatprep.mubr.f32.mxu0 %v6039_v47 }
0x14f5   :  { %5631 = vmatpush3.bf16.msra.mxu1 %v5630_v14 }
0x14f6   :  { %5633 = vmatprep.subr.bf16.mxu1 %v5632_v17 }
0x14f9   :  { %5635 = vmatpush3.bf16.msra.mxu1 %v5634_v20 }
0x14fa   :  { %5637 = vmatprep.subr.bf16.mxu1 %v5636_v23  ;;  %v4363_v23 = vld [vmem:[#allocation10 + $0x28] sm:$0xff] }
0x14fb   :  { %v5656_v24 = vpack.c.bf16 %v4363_v23, %v4359_v22  ;;  %v4397_v22 = vld [vmem:[#allocation10 + $0x138] sm:$0xff]  ;;  %v4394_v23 = vld [vmem:[#allocation10 + $0x120] sm:$0xff] }
0x14fd   :  { %5639 = vmatpush3.bf16.msra.mxu1 %v5638_v0  ;;  %v4365_v0 = vld [vmem:[#allocation10 + $0x38] sm:$0xff]  ;;  %5657 = vmatprep.subr.bf16.mxu0 %v5656_v24 }
0x14fe   :  { %5641 = vmatprep.subr.bf16.mxu1 %v5640_v28  ;;  %v5688_v28 = vpack.c.bf16 %v4365_v0, %v4361_v49  ;;  %5659 = vmatpush1.bf16.msra.mxu0 %v5658_v55  ;;  %v4392_v0 = vld [vmem:[#allocation10 + $0x110] sm:$0xff]  ;;  %v4403_v55 = vld [vmem:[#allocation10 + $0x168] sm:$0xff] }
0x14ff   :  { %v5706_v26 = vpack.c.bf16 %v4396_v1, %v4392_v0 }
0x1501   :  { %5643 = vmatpush3.bf16.msra.mxu1 %v5642_v45  ;;  %v4364_v45 = vld [vmem:[#allocation10 + $0x30] sm:$0xff] }
0x1502   :  { %5645 = vmatprep.subr.bf16.mxu1 %v5644_v34  ;;  %v5690_v33 = vpack.c.bf16 %v4364_v45, %v4360_v30  ;;  %v4371_v34 = vld [vmem:[#allocation10 + $0x68] sm:$0xff]  ;;  %v4401_v30 = vld [vmem:[#allocation10 + $0x158] sm:$0xff] }
0x1505   :  { %5647 = vmatpush3.bf16.msra.mxu1 %v5646_v37  ;;  %v5660_v37 = vpack.c.bf16 %v4371_v34, %v4367_v31  ;;  %v4405_v31 = vld [vmem:[#allocation10 + $0x178] sm:$0xff]  ;;  %v4402_v34 = vld [vmem:[#allocation10 + $0x160] sm:$0xff] }
0x1506   :  { %5649 = vmatprep.subr.bf16.mxu1 %v5648_v40  ;;  %v4370_v40 = vld [vmem:[#allocation10 + $0x60] sm:$0xff]  ;;  %v5708_v35 = vpack.c.bf16 %v4405_v31, %v4401_v30 }
0x1507   :  { %v5662_v42 = vpack.c.bf16 %v4370_v40, %v4366_v39  ;;  %5661 = vmatprep.subr.bf16.mxu0 %v5660_v37  ;;  %v4400_v37 = vld [vmem:[#allocation10 + $0x150] sm:$0xff]  ;;  %v4407_v40 = vld [vmem:[#allocation10 + $0x188] sm:$0xff] }
0x1509   :  { %5651 = vmatpush3.bf16.msra.mxu1 %v5650_v43  ;;  %v4372_v43 = vld [vmem:[#allocation10 + $0x70] sm:$0xff]  ;;  %5663 = vmatpush1.bf16.msra.mxu0 %v5662_v42  ;;  %v4409_v42 = vld [vmem:[#allocation10 + $0x198] sm:$0xff] }
0x150a   :  { %5653 = vmatprep.subr.bf16.mxu1 %v5652_v29  ;;  %v5694_v29 = vpack.c.bf16 %v4372_v43, %v4368_v41  ;;  %5665 = vmatprep.subr.bf16.mxu0 %v5664_v46  ;;  %v4411_v41 = vld [vmem:[#allocation10 + $0x1a8] sm:$0xff]  ;;  %v5712_v46 = vpack.c.bf16 %v4413_v44, %v4409_v42 }
0x150b   :  { %v5680_v43 = vpack.c.bf16 %v4411_v41, %v4407_v40 }
0x150d   :  { %5655 = vmatpush3.bf16.msra.mxu1 %v5654_v52  ;;  %v4381_v52 = vld [vmem:[#allocation10 + $0xb8] sm:$0xff] }
0x150e   :  { %5689 = vmatprep.subr.bf16.mxu1 %v5688_v28  ;;  %v4399_v28 = vld [vmem:[#allocation10 + $0x148] sm:$0xff] }
0x150f   :  { %v5676_v45 = vpack.c.bf16 %v4403_v55, %v4399_v28 }
0x15c2   :  { %v4105_v53 = vpop.f32.mrb[52].mxu1  ;;  %v4182_v5 = vpop.f32.mrb[44].mxu0 }
0x15c3   :  { %v4665_v54 = vmul.f32 -1.442695, %v4105_v53  ;;  %v4107_v57 = vpop.f32.mrb[53].mxu1  ;;  %v4184_v59 = vpop.f32.mrb[45].mxu0 }
0x15c4   :  { %v4666_v8 = vmul.f32 -1.442695, %v4107_v57 }
0x15c5   :  { %5862 = vpow2.f32 %v4665_v54  ;;  %v4378_v54 = vld [vmem:[#allocation10 + $0xa0] sm:$0xff] }
0x15c6   :  { %5864 = vpow2.f32 %v4666_v8  ;;  %v4111_v62 = vpop.f32.mrb[54].mxu1  ;;  %v4188_v19 = vpop.f32.mrb[46].mxu0 }
0x15c7   :  { %v4667_v11 = vmul.f32 -1.442695, %v4111_v62  ;;  %v4113_v63 = vpop.f32.mrb[55].mxu1  ;;  %v4190_v25 = vpop.f32.mrb[47].mxu0 }
0x15c8   :  { %v4668_v32 = vmul.f32 -1.442695, %v4113_v63 }
0x15c9   :  { %5866 = vpow2.f32 %v4667_v11  ;;  %v4385_v11 = vld [vmem:[#allocation10 + $0xd8] sm:$0xff] }
0x15ca   :  { %5868 = vpow2.f32 %v4668_v32  ;;  %v4389_v32 = vld [vmem:[#allocation10 + $0xf8] sm:$0xff] }
0x15cf   :  { %v5863_v3 = vpop.eup %5862 }
0x15d0   :  { %v5865_v56 = vpop.eup %5864  ;;  %v4205_v58 = vadd.f32 1.0, %v5863_v3  ;;  %v5700_v3 = vpack.c.bf16 %v4389_v32, %v4385_v11  ;;  %v4418_v11 = vld [vmem:[#allocation10 + $0x1e0] sm:$0xff]  ;;  %v4416_v32 = vld [vmem:[#allocation10 + $0x1d0] sm:$0xff] }
0x15d1   :  { %v4206_v61 = vadd.f32 1.0, %v5865_v56 }
0x15d2   :  { %5870 = vrcp.f32 %v4205_v58 }
0x15d3   :  { %v5867_v2 = vpop.eup %5866  ;;  %5872 = vrcp.f32 %v4206_v61 }
0x15d4   :  { %v5869_v4 = vpop.eup %5868  ;;  %v4207_v6 = vadd.f32 1.0, %v5867_v2 }
0x15d5   :  { %v4208_v7 = vadd.f32 1.0, %v5869_v4 }
0x15d6   :  { %5874 = vrcp.f32 %v4207_v6 }
0x15d7   :  { %5876 = vrcp.f32 %v4208_v7 }
0x15dc   :  { %v5871_v9 = vpop.eup %5870 }
0x15dd   :  { %v5873_v10 = vpop.eup %5872  ;;  %v4217_v12 = vmul.f32 %v5871_v9, %v4105_v53  ;;  %v4374_v53 = vld [vmem:[#allocation10 + $0x80] sm:$0xff] }
0x15de   :  { %v4218_v13 = vmul.f32 %v5873_v10, %v4107_v57  ;;  %v4376_v57 = vld [vmem:[#allocation10 + $0x90] sm:$0xff]  ;;  %v5666_v8 = vpack.c.bf16 %v4378_v54, %v4374_v53  ;;  %v4415_v54 = vld [vmem:[#allocation10 + $0x1c8] sm:$0xff] }
0x15df   :  { %v4221_v14 = vmul.f32 %v4217_v12, %v4182_v5  ;;  %v5696_v5 = vpack.c.bf16 %v4381_v52, %v4377_v50  ;;  %v4408_v52 = vld [vmem:[#allocation10 + $0x190] sm:$0xff] }
0x15e0   :  { %v5875_v15 = vpop.eup %5874  ;;  %v4222_v16 = vmul.f32 %v4218_v13, %v4184_v59  ;;  %v4380_v59 = vld [vmem:[#allocation10 + $0xb0] sm:$0xff]  ;;  %5667 = vmatpush1.bf16.msra.mxu0 %v5666_v8  ;;  %v4382_v13 = vld [vmem:[#allocation10 + $0xc0] sm:$0xff] }
0x15e1   :  { %v5877_v17 = vpop.eup %5876  ;;  %v4219_v18 = vmul.f32 %v5875_v15, %v4111_v62  ;;  %v4383_v62 = vld [vmem:[#allocation10 + $0xc8] sm:$0xff]  ;;  %v4384_v15 = vld [vmem:[#allocation10 + $0xd0] sm:$0xff] }
0x15e2   :  { %v4220_v60 = vmul.f32 %v5877_v17, %v4113_v63  ;;  %4322 = vmatprep.mubr.f32.mxu1 %v4222_v16  ;;  %v5698_v63 = vpack.c.bf16 %v4380_v59, %v4376_v57  ;;  %v4412_v53 = vld [vmem:[#allocation10 + $0x1b0] sm:$0xff]  ;;  %v4419_v57 = vld [vmem:[#allocation10 + $0x1e8] sm:$0xff]  ;;  %v4417_v59 = vld [vmem:[#allocation10 + $0x1d8] sm:$0xff] }
0x15e3   :  { %v4223_v20 = vmul.f32 %v4219_v18, %v4188_v19  ;;  %4323 = vmatmul.mubr.f32.vlgmr.msra.gmra.mrb[56].mxu1 %v4221_v14  ;;  %v4387_v19 = vld [vmem:[#allocation10 + $0xe8] sm:$0xff]  ;;  %v4386_v14 = vld [vmem:[#allocation10 + $0xe0] sm:$0xff]  ;;  %v5684_v8 = vpack.c.bf16 %v4419_v57, %v4415_v54 }
0x15e4   :  { %v4224_v21 = vmul.f32 %v4220_v60, %v4190_v25  ;;  %5691 = vmatpush1.bf16.msra.mxu1 %v5690_v33  ;;  %v5668_v25 = vpack.c.bf16 %v4387_v19, %v4383_v62  ;;  %v5670_v16 = vpack.c.bf16 %v4386_v14, %v4382_v13  ;;  %v4391_v18 = vld [vmem:[#allocation10 + $0x108] sm:$0xff]  ;;  %v4398_v33 = vld [vmem:[#allocation10 + $0x140] sm:$0xff]  ;;  %v4421_v62 = vld [vmem:[#allocation10 + $0x1f8] sm:$0xff] }
0x15e5   :  { %5693 = vmatprep.subr.bf16.mxu1 %v5692_v38  ;;  %v4395_v60 = vld [vmem:[#allocation10 + $0x128] sm:$0xff]  ;;  %v5678_v36 = vpack.c.bf16 %v4402_v34, %v4398_v33  ;;  %v4404_v38 = vld [vmem:[#allocation10 + $0x170] sm:$0xff]  ;;  %v4414_v19 = vld [vmem:[#allocation10 + $0x1c0] sm:$0xff] }
0x15e6   :  { %4327 = vmatprep.mubr.f32.mxu1 %v4224_v21  ;;  %5669 = vmatprep.subr.bf16.mxu0 %v5668_v25  ;;  %v5672_v21 = vpack.c.bf16 %v4395_v60, %v4391_v18  ;;  %v5710_v39 = vpack.c.bf16 %v4404_v38, %v4400_v37  ;;  %v5686_v25 = vpack.c.bf16 %v4418_v11, %v4414_v19  ;;  %v4669_v13 = vld [vmem:[%s6714_s10] ss:$0 sm:$0xff]  ;;  %s6043_s10 = smov [#allocation11]  }
0x15e7   :  { %4328 = vmatmul.mubr.f32.gmra.mrb[58].mxu1 %v4223_v20  ;;  %5671 = vmatpush1.bf16.msra.mxu0 %v5670_v16  ;;  %v4393_v20 = vld [vmem:[#allocation10 + $0x118] sm:$0xff]  ;;  %s4589_s8 = sshll.u32 %s6043_s10, 4  ;;  %s4590_s8 = int_to_ptr.vmem [resolvable:$true] %s4589_s8 }
0x15e8   :  { %4563 = vmatprep.mubr.f32.mxu1 %v6039_v47  ;;  %5695 = vmatpush1.bf16.msra.mxu1 %v5694_v29  ;;  %v5704_v49 = vpack.c.bf16 %v4397_v22, %v4393_v20  ;;  %v4410_v29 = vld [vmem:[#allocation10 + $0x1a0] sm:$0xff]  ;;  %s5998_s26 = scalar_lea.vmem %s4590_s8, 1024  ;;  %p6003_p13 = scmp.lt.s32.totalorder %s4590_s8, %s4590_s8 }
0x15e9   :  { %5697 = vmatprep.subr.bf16.mxu1 %v5696_v5  ;;  %5673 = vmatprep.subr.bf16.mxu0 %v5672_v21  ;;  %v5682_v50 = vpack.c.bf16 %v4410_v29, %v4406_v27  ;;  %v5714_v5 = vpack.c.bf16 %v4412_v53, %v4408_v52  ;;  %p5999_p12 = scmp.ne.s32.totalorder %s4590_s8, %s5998_s26  ;;  %p6004_p0 = scmp.lt.s32.totalorder %s5998_s26, %s5998_s26 }
0x15eb   :  { %p6005_p1 = por %p6004_p0, %p6003_p13 }
0x15ec   :  { %5699 = vmatpush1.bf16.msra.mxu1 %v5698_v63  ;;  %v5716_v63 = vpack.c.bf16 %v4421_v62, %v4417_v59 }
0x15ed   :  { %5701 = vmatprep.subr.bf16.mxu1 %v5700_v3  ;;  %v4420_v3 = vld [vmem:[#allocation10 + $0x1f0] sm:$0xff]  ;;  %p6006_p2 = pnand %p6005_p1, %p5999_p12 }
0x16b6   :  { %v4896_v56 = vpop.f32.mrb[56].mxu1 }
0x16b7   :  { %v4897_v58 = vpop.f32.mrb[57].mxu1 }
0x16b8   :  { %v4898_v61 = vadd.f32 %v4897_v58, %v4896_v56  ;;  %v5718_v56 = vpack.c.bf16 %v4420_v3, %v4416_v32 }
0x16ba   :  { %v6673_v2 = vadd.f32 %v4898_v61, %v6657_v51  ;;  %v4899_v4 = vpop.f32.mrb[58].mxu1  ;;  %v4388_v51 = vld [vmem:[#allocation10 + $0xf0] sm:$0xff] }
0x16bb   :  { %v4900_v6 = vpop.f32.mrb[59].mxu1  ;;  %v5702_v17 = vpack.c.bf16 %v4388_v51, %v4384_v15 }
0x16bc   :  { %v4901_v7 = vadd.f32 %v4900_v6, %v4899_v4  ;;  %v4336_v9 = vmul.f32 %v6673_v2, %v6673_v2 }
0x16bd   :  { %5703 = vmatpush1.bf16.msra.mxu1 %v5702_v17 }
0x16be   :  { %v6678_v10 = vadd.f32 %v4901_v7, %v6654_v48  ;;  %4338 = vadd.xlane.f32.xlu0 %v4336_v9  ;;  %v4390_v48 = vld [vmem:[#allocation10 + $0x100] sm:$0xff]  ;;  %5705 = vmatprep.subr.bf16.mxu1 %v5704_v49 }
0x16bf   :  { %v5674_v24 = vpack.c.bf16 %v4394_v23, %v4390_v48 }
0x16c0   :  { %v4337_v12 = vmul.f32 %v6678_v10, %v6678_v10 }
0x16c1   :  { %5675 = vmatpush1.bf16.msra.mxu0 %v5674_v24  ;;  %5707 = vmatpush1.bf16.msra.mxu1 %v5706_v26 }
0x16c2   :  { %4340 = vadd.xlane.f32.xlu0 %v4337_v12  ;;  %5677 = vmatprep.subr.bf16.mxu0 %v5676_v45 }
0x16c3   :  { %5709 = vmatprep.subr.bf16.mxu1 %v5708_v35 }
0x16c5   :  { %5679 = vmatpush1.bf16.msra.mxu0 %v5678_v36  ;;  %5711 = vmatpush1.bf16.msra.mxu1 %v5710_v39 }
0x16c6   :  { %5681 = vmatprep.subr.bf16.mxu0 %v5680_v43  ;;  %5713 = vmatprep.subr.bf16.mxu1 %v5712_v46 }
0x16c9   :  { %5683 = vmatpush1.bf16.msra.mxu0 %v5682_v50  ;;  %5715 = vmatpush1.bf16.msra.mxu1 %v5714_v5 }
0x16ca   :  { %5685 = vmatprep.subr.bf16.mxu0 %v5684_v8  ;;  %5717 = vmatprep.subr.bf16.mxu1 %v5716_v63 }
0x16cd   :  { %5687 = vmatpush1.bf16.msra.mxu0 %v5686_v25  ;;  %5719 = vmatpush1.bf16.msra.mxu1 %v5718_v56 }
0x174b   :  { %v4339_v58 = vpop.xlane.xlu0 %4338 }
0x174c   :  { %v4342_v61 = vmul.f32 0.0078125, %v4339_v58 }
0x174e   :  { %v4344_v4 = vadd.f32 1e-05, %v4342_v61 }
0x174f   :  { %v4341_v6 = vpop.xlane.xlu0 %4340 }
0x1750   :  { %5878 = vrsqrt.f32 %v4344_v4  ;;  %v4343_v7 = vmul.f32 0.0078125, %v4341_v6 }
0x1752   :  { %v4345_v9 = vadd.f32 1e-05, %v4343_v7 }
0x1754   :  { %5880 = vrsqrt.f32 %v4345_v9 }
0x175a   :  { %v5879_v12 = vpop.eup %5878 }
0x175b   :  { %v4348_v14 = vmul.f32 %v5879_v12, %v6673_v2 }
0x175d   :  { %v4356_v15 = vmul.f32 %v4669_v13, %v4348_v14 }
0x175e   :  { %v5881_v16 = vpop.eup %5880 }
0x175f   :  { %4487 = vmatmul.mubr.f32.vlgmr.msra.gmra.mrb[48].mxu0 %v4356_v15  ;;  %4564 = vmatmul.mubr.f32.vlgmr.msra.gmra.mrb[60].mxu1 %v4356_v15  ;;  %v4349_v51 = vmul.f32 %v5881_v16, %v6678_v10 }
0x1760   :  { %4492 = vmatprep.mubr.f32.mxu0 %v6039_v47  ;;  %4569 = vmatprep.mubr.f32.mxu1 %v6039_v47 }
0x1761   :  { %v4357_v17 = vmul.f32 %v4669_v13, %v4349_v51 }
0x1763   :  { %4493 = vmatmul.mubr.f32.gmra.mrb[50].mxu0 %v4357_v17  ;;  %4570 = vmatmul.mubr.f32.gmra.mrb[62].mxu1 %v4357_v17 }
0x1832   :  { %v4488_v18 = vpop.f32.mrb[48].mxu0  ;;  %v4565_v60 = vpop.f32.mrb[60].mxu1 }
0x1833   :  { %4576 = vst [vmem:[#allocation11] sm:$0xff] %v4488_v18  ;;  %4578 = vst [vmem:[#allocation11 + $0x10] sm:$0xff] %v4565_v60  ;;  %v4490_v20 = vpop.f32.mrb[49].mxu0  ;;  %v4567_v21 = vpop.f32.mrb[61].mxu1 }
0x1834   :  { %4577 = vst [vmem:[#allocation11 + $0x8] sm:$0xff] %v4490_v20  ;;  %4579 = vst [vmem:[#allocation11 + $0x18] sm:$0xff] %v4567_v21 }
0x1836   :  { %v4494_v2 = vpop.f32.mrb[50].mxu0  ;;  %v4571_v22 = vpop.f32.mrb[62].mxu1 }
0x1837   :  { %4580 = vst [vmem:[#allocation11 + $0x20] sm:$0xff] %v4494_v2  ;;  %4582 = vst [vmem:[#allocation11 + $0x30] sm:$0xff] %v4571_v22  ;;  %v4496_v10 = vpop.f32.mrb[51].mxu0  ;;  %v4573_v47 = vpop.f32.mrb[63].mxu1 }
0x1838   :  { %4581 = vst [vmem:[#allocation11 + $0x28] sm:$0xff] %v4496_v10  ;;  %4583 = vst [vmem:[#allocation11 + $0x38] sm:$0xff] %v4573_v47 }
0x1839   :  { %6009 = shalt.err (!%p6006_p2)
}
0x183a   :  { %s6010_s29 = scalar_lea.hbm %s6716_s12, 1024 }
0x183b   :  { %p6011_p3 = scmp.ne.s32.totalorder %s6716_s12, %s6010_s29  ;;  %p6014_p4 = scmp.lt.u32.totalorder %s6010_s29, %s6716_s12 }
0x183d   :  { %p6016_p5 = pnand %p6014_p4, %p6011_p3 }
0x183f   :  { %6019 = shalt.err (!%p6016_p5)
}
0x1840   :  { %4595 = dma.vmem_to_hbm [thread:$0]  %s4590_s8, 1024, %s6716_s12, [#allocation4], %s6036_s6, %s6036_s6, %s6037_s20  }
0x1841   :  { %6026 = dma.done.wait [#allocation4], 1024  }
0x1842   :  { %6027 = vsyncadd [#allocation4], 4294966272 }
0x1843   :  { %4599 = vsyncpa [#allocation3], 1 }
0x1844   :  { %4600 = vsyncpa [#allocation6], 1 }
0x1845   :  { %4601 = vsyncpa [#allocation9], 1 }
0x1846   :  { %4602 = vsyncpa [#allocation4], 1 }

</bundles_post_ra>
